<compile_context>
chip_gen: v7x
topology: tpu7x:2x2x1
jax: 0.10.0
libtpu: 0.0.40
codegen_flags: <defaults>
</compile_context>

<pallas_src>
import functools
import math

import jax
import jax.numpy as jnp
from jax.experimental import pallas as pl
from jax.experimental.pallas import tpu as pltpu

LN_EPS = 1e-5


def _round_up(x, m):
    return (x + m - 1) // m * m


# ------------------------------ fused kernel --------------------------------

def _att_classifier_kernel(x_ref, w_in_ref, attn_w_ref, ffn_w1_ref, ffn_w2_ref,
                           ffn_b1_ref, w_out_ref, small_ref, o_ref,
                           *, B, S, D, H, L):
    f32 = jnp.float32
    bf16 = jnp.bfloat16

    # Column offsets inside the packed attention-weight tensor (lane dim 12*D):
    # [enc wq|wk|wv, enc wo, dec-self wq|wk|wv, dec-self wo,
    #  dec-cross wq, dec-cross wk|wv, dec-cross wo]
    E_QKV, E_O = 0, 3 * D
    DS_QKV, DS_O = 4 * D, 7 * D
    DC_Q, DC_KV, DC_O = 8 * D, 9 * D, 11 * D

    def row(r, w):
        # Static (row, width) slice of the consolidated small-parameter tensor.
        return small_ref[r:r + 1, :w]                       # (1, w) f32

    def mm(a, w):
        # bf16 x bf16 MXU matmul with f32 accumulation.
        return jnp.dot(a.astype(bf16), w, preferred_element_type=f32)

    def layer_norm(x, g, b):
        mean = jnp.mean(x, axis=-1, keepdims=True)
        var = jnp.mean((x - mean) ** 2, axis=-1, keepdims=True)
        return (x - mean) * jax.lax.rsqrt(var + LN_EPS) * g + b

    def mh_attn(q, k, v):
        # q/k/v: (B*S, D) f32; 1/sqrt(head_dim) already folded into q.
        # TODO(synk): head-batched 'bqhd,bkhd->bhqk' einsum needs a
        # multi-batch-dim dot_general / sublane<->major transpose that Mosaic
        # does not lower reliably at these shapes; H is tiny, so the static
        # head loop only costs a couple of extra small MXU pushes.
        Dh = D // H
        q3 = q.reshape(B, S, D)
        k3 = k.reshape(B, S, D)
        v3 = v.reshape(B, S, D)
        outs = []
        for h in range(H):
            sl = slice(h * Dh, (h + 1) * Dh)
            s = jnp.einsum('bqd,bkd->bqk', q3[:, :, sl], k3[:, :, sl],
                           preferred_element_type=f32)
            s = s - jnp.max(s, axis=-1, keepdims=True)
            p = jnp.exp(s)
            p = p * pl.reciprocal(jnp.sum(p, axis=-1, keepdims=True),
                                  approx=True)
            outs.append(jnp.einsum('bqk,bkd->bqd', p, v3[:, :, sl],
                                   preferred_element_type=f32))
        return jnp.concatenate(outs, axis=-1).reshape(B * S, D)

    def self_attn(x2, aw, qkv_col, o_col, bqkv_r, bo_r):
        # Packed QKV projection: one (., D) @ (D, 3D) matmul.
        qkv = mm(x2, aw[:, qkv_col:qkv_col + 3 * D]) + row(bqkv_r, 3 * D)
        ctx = mh_attn(qkv[:, :D], qkv[:, D:2 * D], qkv[:, 2 * D:])
        return mm(ctx, aw[:, o_col:o_col + D]) + row(bo_r, D)

    def cross_attn(xq, mem, aw, bq_r, bkv_r, bo_r):
        q = mm(xq, aw[:, DC_Q:DC_Q + D]) + row(bq_r, D)
        kv = mm(mem, aw[:, DC_KV:DC_KV + 2 * D]) + row(bkv_r, 2 * D)
        ctx = mh_attn(q, kv[:, :D], kv[:, D:])
        return mm(ctx, aw[:, DC_O:DC_O + D]) + row(bo_r, D)

    def ffn(x2, side, l, b2_r):
        h = mm(x2, ffn_w1_ref[side, l]) + ffn_b1_ref[side, l]
        h = jnp.maximum(h, 0.0)
        return mm(h, ffn_w2_ref[side, l]) + row(b2_r, D)

    # ---- input layer: Linear + ReLU ----
    x = x_ref[...]                                           # (B*S, Din_pad)
    h0 = jnp.maximum(mm(x, w_in_ref[...]) + row(0, D), 0.0)  # (B*S, D)

    # ---- encoder (post-norm) ----
    mem = h0
    for l in range(L):                                       # small static L
        aw = attn_w_ref[l]                                   # (D, 12D) bf16
        eb = 6 + 7 * l
        sa = self_attn(mem, aw, E_QKV, E_O, eb + 0, eb + 1)
        mem = layer_norm(mem + sa, row(eb + 3, D), row(eb + 4, D))
        ff = ffn(mem, 0, l, eb + 2)
        mem = layer_norm(mem + ff, row(eb + 5, D), row(eb + 6, D))
    mem = layer_norm(mem, row(1, D), row(2, D))              # final enc norm

    # ---- decoder (post-norm), tgt = src (see TODO at top) ----
    out = h0
    for l in range(L):
        aw = attn_w_ref[l]
        db = 6 + 7 * L + 12 * l
        sa = self_attn(out, aw, DS_QKV, DS_O, db + 0, db + 1)
        out = layer_norm(out + sa, row(db + 6, D), row(db + 7, D))
        ca = cross_attn(out, mem, aw, db + 2, db + 3, db + 4)
        out = layer_norm(out + ca, row(db + 8, D), row(db + 9, D))
        ff = ffn(out, 1, l, db + 5)
        out = layer_norm(out + ff, row(db + 10, D), row(db + 11, D))
    out = layer_norm(out, row(3, D), row(4, D))              # final dec norm

    # ---- output head: (B, S*D) @ (S*D, O_pad), computed as a sum over S of
    # (B, D) @ (D, O_pad) blocks (w_out is passed pre-reshaped to (S, D, O_pad)).
    # TODO(synk): collapse into one contraction once Mosaic supports the
    # sublane->lane (B*S, D) -> (B, S*D) reshape for these shapes.
    O_pad = o_ref.shape[-1]
    out3 = out.reshape(B, S, D)
    acc = mm(out3[:, 0, :], w_out_ref[0])
    for s in range(1, S):
        acc = acc + mm(out3[:, s, :], w_out_ref[s])
    o_ref[...] = (acc + row(5, O_pad)).astype(o_ref.dtype)


# ------------------------------ params / packing ----------------------------

def _dense_init(key, fan_in, fan_out, scale=0.1):
    kw, kb = jax.random.split(key)
    return {"w": scale * jax.random.normal(kw, (fan_in, fan_out), jnp.float32),
            "b": scale * jax.random.normal(kb, (fan_out,), jnp.float32)}


def _mha_init(key, d):
    kq, kk, kv, ko = jax.random.split(key, 4)
    q, k, v, o = (_dense_init(kq, d, d), _dense_init(kk, d, d),
                  _dense_init(kv, d, d), _dense_init(ko, d, d))
    return {"wq": q["w"], "bq": q["b"], "wk": k["w"], "bk": k["b"],
            "wv": v["w"], "bv": v["b"], "wo": o["w"], "bo": o["b"]}


def _ln_init(d):
    return {"w": jnp.ones((d,), jnp.float32), "b": jnp.zeros((d,), jnp.float32)}


def init_params(key, att_dim, att_layer, n_concat, input_dim, output_dim,
                dim_feedforward):
    keys = jax.random.split(key, 2 + 2 * att_layer)
    params = {
        "input": _dense_init(keys[0], input_dim, att_dim),
        "output": _dense_init(keys[1], n_concat * att_dim, output_dim),
        "enc_layers": [],
        "dec_layers": [],
        "enc_norm": _ln_init(att_dim),
        "dec_norm": _ln_init(att_dim),
    }
    for i in range(att_layer):
        ek = jax.random.split(keys[2 + i], 3)
        params["enc_layers"].append({
            "self_attn": _mha_init(ek[0], att_dim),
            "linear1": _dense_init(ek[1], att_dim, dim_feedforward),
            "linear2": _dense_init(ek[2], dim_feedforward, att_dim),
            "norm1": _ln_init(att_dim),
            "norm2": _ln_init(att_dim),
        })
        dk = jax.random.split(keys[2 + att_layer + i], 4)
        params["dec_layers"].append({
            "self_attn": _mha_init(dk[0], att_dim),
            "cross_attn": _mha_init(dk[1], att_dim),
            "linear1": _dense_init(dk[2], att_dim, dim_feedforward),
            "linear2": _dense_init(dk[3], dim_feedforward, att_dim),
            "norm1": _ln_init(att_dim),
            "norm2": _ln_init(att_dim),
            "norm3": _ln_init(att_dim),
        })
    return params


def pack_params(params, att_head):
    """One-time host-side packing of all parameters into 7 kernel operands.

    - All matmul weights -> bf16 (MXU-native); biases / LN params stay f32.
    - Q|K|V concatenated into one weight per attention; 1/sqrt(head_dim)
      folded into the q projection (free at prep time).
    - Every attention weight matrix of a layer packed into one (D, 12D) slab.
    - enc/dec FFN weights and first-layer biases stacked along a leading axis.
    - All biases / LayerNorm gammas & betas consolidated into a single
      (rows, SMALL_W) f32 tensor (one DMA descriptor instead of ~40).
    - Output head lane-padded to a multiple of 128 for lane-dense stores.
    """
    w_in_f = params["input"]["w"]
    Din, D = w_in_f.shape
    enc, dec = params["enc_layers"], params["dec_layers"]
    L = len(enc)
    F = enc[0]["linear1"]["w"].shape[1]
    SD, Odim = params["output"]["w"].shape
    S = SD // D
    scale = 1.0 / math.sqrt(D // att_head)

    DIN_PAD = _round_up(Din, 8)
    OUT_PAD = _round_up(Odim, 128)
    SMALL_W = max(128, _round_up(3 * D, 128), OUT_PAD)
    bf16 = jnp.bfloat16

    # Input-layer weight, contraction dim zero-padded to a tile multiple.
    w_in = jnp.pad(w_in_f, ((0, DIN_PAD - Din), (0, 0))).astype(bf16)

    # All attention weights of (encoder layer l, decoder layer l) in one slab.
    def attn_pack(enc_l, dec_l):
        e = enc_l["self_attn"]
        ds = dec_l["self_attn"]
        dc = dec_l["cross_attn"]
        return jnp.concatenate(
            [e["wq"] * scale, e["wk"], e["wv"], e["wo"],
             ds["wq"] * scale, ds["wk"], ds["wv"], ds["wo"],
             dc["wq"] * scale, dc["wk"], dc["wv"], dc["wo"]], axis=1)

    attn_w = jnp.stack([attn_pack(enc[l], dec[l]) for l in range(L)]).astype(bf16)

    # FFN weights / first biases: index 0 = encoder, 1 = decoder.
    # TODO(synk): on v7x store these as fp8 (e4m3) - native MXU input there.
    ffn_w1 = jnp.stack([jnp.stack([l["linear1"]["w"] for l in enc]),
                        jnp.stack([l["linear1"]["w"] for l in dec])]).astype(bf16)
    ffn_w2 = jnp.stack([jnp.stack([l["linear2"]["w"] for l in enc]),
                        jnp.stack([l["linear2"]["w"] for l in dec])]).astype(bf16)
    ffn_b1 = jnp.stack([jnp.stack([l["linear1"]["b"].reshape(1, F) for l in enc]),
                        jnp.stack([l["linear1"]["b"].reshape(1, F) for l in dec])])

    # Output head weight: (S, D, OUT_PAD) bf16, lane-padded with zeros.
    w_out = jnp.pad(params["output"]["w"].reshape(S, D, Odim),
                    ((0, 0), (0, 0), (0, OUT_PAD - Odim))).astype(bf16)

    # Consolidated small f32 parameters, one (zero-padded) row each.
    rows = []

    def add(v):
        v = jnp.asarray(v, jnp.float32).reshape(-1)
        rows.append(jnp.pad(v, (0, SMALL_W - v.shape[0])))

    add(params["input"]["b"])                    # 0: b_in
    add(params["enc_norm"]["w"])                 # 1: final encoder norm gamma
    add(params["enc_norm"]["b"])                 # 2: final encoder norm beta
    add(params["dec_norm"]["w"])                 # 3: final decoder norm gamma
    add(params["dec_norm"]["b"])                 # 4: final decoder norm beta
    add(params["output"]["b"])                   # 5: b_out (lane-padded)
    for l in enc:                                # base row = 6 + 7*layer
        a = l["self_attn"]
        add(jnp.concatenate([a["bq"] * scale, a["bk"], a["bv"]]))
        add(a["bo"])
        add(l["linear2"]["b"])
        add(l["norm1"]["w"]); add(l["norm1"]["b"])
        add(l["norm2"]["w"]); add(l["norm2"]["b"])
    for l in dec:                                # base row = 6 + 7*L + 12*layer
        a = l["self_attn"]; c = l["cross_attn"]
        add(jnp.concatenate([a["bq"] * scale, a["bk"], a["bv"]]))
        add(a["bo"])
        add(c["bq"] * scale)
        add(jnp.concatenate([c["bk"], c["bv"]]))
        add(c["bo"])
        add(l["linear2"]["b"])
        add(l["norm1"]["w"]); add(l["norm1"]["b"])
        add(l["norm2"]["w"]); add(l["norm2"]["b"])
        add(l["norm3"]["w"]); add(l["norm3"]["b"])
    n_rows = len(rows)
    rows += [jnp.zeros((SMALL_W,), jnp.float32)] * (_round_up(n_rows, 8) - n_rows)
    small = jnp.stack(rows)

    return (w_in, attn_w, ffn_w1, ffn_w2, ffn_b1, w_out, small)


# --------------------------------- forward ----------------------------------

def att_classifier_forward(x, packed, *, att_dim, att_head, att_layer,
                           n_concat, input_dim, output_dim):
    w_in, attn_w, ffn_w1, ffn_w2, ffn_b1, w_out, small = packed

    x3 = x.reshape(-1, n_concat, input_dim)      # torch: x.view(-1, n_concat, input_dim)
    N = x3.shape[0]
    x_flat = x3.reshape(N * n_concat, input_dim).astype(jnp.float32)
    din_pad = w_in.shape[0]
    if din_pad != input_dim:                      # tile-align first matmul K dim
        x_flat = jnp.pad(x_flat, ((0, 0), (0, din_pad - input_dim)))
    out_pad = w_out.shape[-1]

    kernel = functools.partial(
        _att_classifier_kernel,
        B=N, S=n_concat, D=att_dim, H=att_head, L=att_layer)

    vmem = pltpu.MemorySpace.VMEM
    # Single fused kernel, no grid: the whole payload (~0.65 MB, mostly bf16
    # weights) plus all activations stays resident in VMEM on every chip.
    # TODO(synk): for production batch sizes add a row-tile grid over the
    # (B*S) axis with dimension_semantics=("parallel",) (uses v7x's second
    # TensorCore and restores double-buffered activation DMA); for large
    # att_layer stream per-layer weights (grid L axis or pltpu.emit_pipeline)
    # instead of preloading all layers.
    y = pl.pallas_call(
        kernel,
        out_shape=jax.ShapeDtypeStruct((N, out_pad), jnp.float32),
        in_specs=[pl.BlockSpec(memory_space=vmem)] * 8,
        out_specs=pl.BlockSpec(memory_space=vmem),
    )(x_flat, w_in, attn_w, ffn_w1, ffn_w2, ffn_b1, w_out, small)
    return y[:, :output_dim]                      # drop lane padding


if __name__ == "__main__":
    att_dim, att_head, att_layer = 32, 2, 1
    n_concat, input_dim, output_dim = 8, 39, 41
    dim_feedforward = 2048  # torch.nn.Transformer default
    B = 2

    key = jax.random.PRNGKey(0)
    kp, kx = jax.random.split(key)
    params = init_params(kp, att_dim, att_layer, n_concat, input_dim,
                         output_dim, dim_feedforward)
    packed = pack_params(params, att_head)        # one-time weight packing
    x = jax.random.normal(kx, (B, n_concat, input_dim), jnp.float32)

    fwd = jax.jit(functools.partial(
        att_classifier_forward, att_dim=att_dim, att_head=att_head,
        att_layer=att_layer, n_concat=n_concat, input_dim=input_dim,
        output_dim=output_dim))
    out = fwd(x, packed)
    jax.block_until_ready(out)
    assert out.shape == (B, output_dim), out.shape
    assert bool(jnp.all(jnp.isfinite(out)))
    print("KERNEL_OK")
</pallas_src>

<mosaic_0001>
module attributes {stable_mosaic.version = 11 : i64} {
  func.func @_att_classifier_kernel(%arg0: memref<16x40xf32, #tpu.memory_space<vmem>>, %arg1: memref<40x32xbf16, #tpu.memory_space<vmem>>, %arg2: memref<1x32x384xbf16, #tpu.memory_space<vmem>>, %arg3: memref<2x1x32x2048xbf16, #tpu.memory_space<vmem>>, %arg4: memref<2x1x2048x32xbf16, #tpu.memory_space<vmem>>, %arg5: memref<2x1x1x2048xf32, #tpu.memory_space<vmem>>, %arg6: memref<8x32x128xbf16, #tpu.memory_space<vmem>>, %arg7: memref<32x128xf32, #tpu.memory_space<vmem>>, %arg8: memref<2x128xf32, #tpu.memory_space<vmem>>) attributes {dimension_semantics = [], scalar_prefetch = 0 : i64, scratch_operands = 0 : i64, tpu.core_type = #tpu.core_type<tc>} {
    %c0 = arith.constant 0 : index
    %c0_0 = arith.constant 0 : index
    %0 = vector.load %arg0[%c0, %c0_0] : memref<16x40xf32, #tpu.memory_space<vmem>>, vector<16x40xf32>
    %c0_1 = arith.constant 0 : index
    %c0_2 = arith.constant 0 : index
    %1 = vector.load %arg1[%c0_1, %c0_2] : memref<40x32xbf16, #tpu.memory_space<vmem>>, vector<40x32xbf16>
    %2 = arith.truncf %0 : vector<16x40xf32> to vector<16x40xbf16>
    %cst = arith.constant dense<0.000000e+00> : vector<16x32xf32>
    %3 = tpu.matmul %2, %1, %cst {dimension_numbers = #tpu.dot_dimension_numbers<[1], [0], [0], [1], [0, 0, 1, 1], [], []>} : vector<16x40xbf16>, vector<40x32xbf16>, vector<16x32xf32> -> vector<16x32xf32>
    %c0_3 = arith.constant 0 : index
    %c0_4 = arith.constant 0 : index
    %4 = vector.load %arg7[%c0_3, %c0_4] : memref<32x128xf32, #tpu.memory_space<vmem>>, vector<1x32xf32>
    %5 = vector.broadcast %4 : vector<1x32xf32> to vector<16x32xf32>
    %6 = arith.addf %3, %5 : vector<16x32xf32>
    %cst_5 = arith.constant 0.000000e+00 : f32
    %7 = vector.broadcast %cst_5 : f32 to vector<16x32xf32>
    %8 = arith.maximumf %6, %7 : vector<16x32xf32>
    %c0_6 = arith.constant 0 : index
    %c0_7 = arith.constant 0 : index
    %c0_8 = arith.constant 0 : index
    %9 = vector.load %arg2[%c0_6, %c0_7, %c0_8] : memref<1x32x384xbf16, #tpu.memory_space<vmem>>, vector<1x32x384xbf16>
    %10 = vector.shape_cast %9 : vector<1x32x384xbf16> to vector<32x384xbf16>
    %11 = vector.extract_strided_slice %10 {offsets = [0, 0], sizes = [32, 96], strides = [1, 1]} : vector<32x384xbf16> to vector<32x96xbf16>
    %12 = arith.truncf %8 : vector<16x32xf32> to vector<16x32xbf16>
    %cst_9 = arith.constant dense<0.000000e+00> : vector<16x96xf32>
    %13 = tpu.matmul %12, %11, %cst_9 {dimension_numbers = #tpu.dot_dimension_numbers<[1], [0], [0], [1], [0, 0, 1, 1], [], []>} : vector<16x32xbf16>, vector<32x96xbf16>, vector<16x96xf32> -> vector<16x96xf32>
    %c6 = arith.constant 6 : index
    %c0_10 = arith.constant 0 : index
    %14 = vector.load %arg7[%c6, %c0_10] : memref<32x128xf32, #tpu.memory_space<vmem>>, vector<1x96xf32>
    %15 = vector.broadcast %14 : vector<1x96xf32> to vector<16x96xf32>
    %16 = arith.addf %13, %15 : vector<16x96xf32>
    %17 = vector.extract_strided_slice %16 {offsets = [0, 0], sizes = [16, 32], strides = [1, 1]} : vector<16x96xf32> to vector<16x32xf32>
    %18 = vector.extract_strided_slice %16 {offsets = [0, 32], sizes = [16, 32], strides = [1, 1]} : vector<16x96xf32> to vector<16x32xf32>
    %19 = vector.extract_strided_slice %16 {offsets = [0, 64], sizes = [16, 32], strides = [1, 1]} : vector<16x96xf32> to vector<16x32xf32>
    %20 = vector.shape_cast %17 : vector<16x32xf32> to vector<2x8x32xf32>
    %21 = vector.shape_cast %18 : vector<16x32xf32> to vector<2x8x32xf32>
    %22 = vector.shape_cast %19 : vector<16x32xf32> to vector<2x8x32xf32>
    %23 = vector.extract_strided_slice %20 {offsets = [0, 0, 0], sizes = [2, 8, 16], strides = [1, 1, 1]} : vector<2x8x32xf32> to vector<2x8x16xf32>
    %24 = vector.extract_strided_slice %21 {offsets = [0, 0, 0], sizes = [2, 8, 16], strides = [1, 1, 1]} : vector<2x8x32xf32> to vector<2x8x16xf32>
    "tpu.trace_start"() <{level = 10 : i32, message = "bqd,bkd->bqk"}> : () -> ()
    %cst_11 = arith.constant dense<0.000000e+00> : vector<2x8x8xf32>
    %25 = tpu.matmul %23, %24, %cst_11 {dimension_numbers = #tpu.dot_dimension_numbers<[2], [2], [1], [1], [0, 0, 0, 1, 1, 1], [0], [0]>} : vector<2x8x16xf32>, vector<2x8x16xf32>, vector<2x8x8xf32> -> vector<2x8x8xf32>
    "tpu.trace_stop"() : () -> ()
    %cst_12 = arith.constant dense<0xFF800000> : vector<2x8xf32>
    %26 = vector.multi_reduction <maximumf>, %25, %cst_12 [2] : vector<2x8x8xf32> to vector<2x8xf32>
    %27 = vector.shape_cast %26 : vector<2x8xf32> to vector<2x8x1xf32>
    %28 = vector.broadcast %27 : vector<2x8x1xf32> to vector<2x8x8xf32>
    %29 = arith.subf %25, %28 : vector<2x8x8xf32>
    %30 = math.exp %29 : vector<2x8x8xf32>
    %cst_13 = arith.constant dense<0.000000e+00> : vector<2x8xf32>
    %31 = vector.multi_reduction <add>, %30, %cst_13 [2] : vector<2x8x8xf32> to vector<2x8xf32>
    %32 = vector.shape_cast %31 : vector<2x8xf32> to vector<2x8x1xf32>
    %33 = tpu.reciprocal %32 {approx = true} : vector<2x8x1xf32> -> vector<2x8x1xf32>
    %34 = vector.broadcast %33 : vector<2x8x1xf32> to vector<2x8x8xf32>
    %35 = arith.mulf %30, %34 : vector<2x8x8xf32>
    %36 = vector.extract_strided_slice %22 {offsets = [0, 0, 0], sizes = [2, 8, 16], strides = [1, 1, 1]} : vector<2x8x32xf32> to vector<2x8x16xf32>
    "tpu.trace_start"() <{level = 10 : i32, message = "bqk,bkd->bqd"}> : () -> ()
    %cst_14 = arith.constant dense<0.000000e+00> : vector<2x8x16xf32>
    %37 = tpu.matmul %35, %36, %cst_14 {dimension_numbers = #tpu.dot_dimension_numbers<[2], [1], [1], [2], [0, 0, 0, 1, 1, 2], [0], [0]>} : vector<2x8x8xf32>, vector<2x8x16xf32>, vector<2x8x16xf32> -> vector<2x8x16xf32>
    "tpu.trace_stop"() : () -> ()
    %38 = vector.extract_strided_slice %20 {offsets = [0, 0, 16], sizes = [2, 8, 16], strides = [1, 1, 1]} : vector<2x8x32xf32> to vector<2x8x16xf32>
    %39 = vector.extract_strided_slice %21 {offsets = [0, 0, 16], sizes = [2, 8, 16], strides = [1, 1, 1]} : vector<2x8x32xf32> to vector<2x8x16xf32>
    "tpu.trace_start"() <{level = 10 : i32, message = "bqd,bkd->bqk"}> : () -> ()
    %cst_15 = arith.constant dense<0.000000e+00> : vector<2x8x8xf32>
    %40 = tpu.matmul %38, %39, %cst_15 {dimension_numbers = #tpu.dot_dimension_numbers<[2], [2], [1], [1], [0, 0, 0, 1, 1, 1], [0], [0]>} : vector<2x8x16xf32>, vector<2x8x16xf32>, vector<2x8x8xf32> -> vector<2x8x8xf32>
    "tpu.trace_stop"() : () -> ()
    %cst_16 = arith.constant dense<0xFF800000> : vector<2x8xf32>
    %41 = vector.multi_reduction <maximumf>, %40, %cst_16 [2] : vector<2x8x8xf32> to vector<2x8xf32>
    %42 = vector.shape_cast %41 : vector<2x8xf32> to vector<2x8x1xf32>
    %43 = vector.broadcast %42 : vector<2x8x1xf32> to vector<2x8x8xf32>
    %44 = arith.subf %40, %43 : vector<2x8x8xf32>
    %45 = math.exp %44 : vector<2x8x8xf32>
    %cst_17 = arith.constant dense<0.000000e+00> : vector<2x8xf32>
    %46 = vector.multi_reduction <add>, %45, %cst_17 [2] : vector<2x8x8xf32> to vector<2x8xf32>
    %47 = vector.shape_cast %46 : vector<2x8xf32> to vector<2x8x1xf32>
    %48 = tpu.reciprocal %47 {approx = true} : vector<2x8x1xf32> -> vector<2x8x1xf32>
    %49 = vector.broadcast %48 : vector<2x8x1xf32> to vector<2x8x8xf32>
    %50 = arith.mulf %45, %49 : vector<2x8x8xf32>
    %51 = vector.extract_strided_slice %22 {offsets = [0, 0, 16], sizes = [2, 8, 16], strides = [1, 1, 1]} : vector<2x8x32xf32> to vector<2x8x16xf32>
    "tpu.trace_start"() <{level = 10 : i32, message = "bqk,bkd->bqd"}> : () -> ()
    %cst_18 = arith.constant dense<0.000000e+00> : vector<2x8x16xf32>
    %52 = tpu.matmul %50, %51, %cst_18 {dimension_numbers = #tpu.dot_dimension_numbers<[2], [1], [1], [2], [0, 0, 0, 1, 1, 2], [0], [0]>} : vector<2x8x8xf32>, vector<2x8x16xf32>, vector<2x8x16xf32> -> vector<2x8x16xf32>
    "tpu.trace_stop"() : () -> ()
    %53 = tpu.concatenate %37, %52 in 2 : vector<2x8x16xf32>, vector<2x8x16xf32> -> vector<2x8x32xf32>
    %54 = vector.shape_cast %53 : vector<2x8x32xf32> to vector<16x32xf32>
    %55 = vector.extract_strided_slice %10 {offsets = [0, 96], sizes = [32, 32], strides = [1, 1]} : vector<32x384xbf16> to vector<32x32xbf16>
    %56 = arith.truncf %54 : vector<16x32xf32> to vector<16x32xbf16>
    %cst_19 = arith.constant dense<0.000000e+00> : vector<16x32xf32>
    %57 = tpu.matmul %56, %55, %cst_19 {dimension_numbers = #tpu.dot_dimension_numbers<[1], [0], [0], [1], [0, 0, 1, 1], [], []>} : vector<16x32xbf16>, vector<32x32xbf16>, vector<16x32xf32> -> vector<16x32xf32>
    %c7 = arith.constant 7 : index
    %c0_20 = arith.constant 0 : index
    %58 = vector.load %arg7[%c7, %c0_20] : memref<32x128xf32, #tpu.memory_space<vmem>>, vector<1x32xf32>
    %59 = vector.broadcast %58 : vector<1x32xf32> to vector<16x32xf32>
    %60 = arith.addf %57, %59 : vector<16x32xf32>
    %61 = arith.addf %8, %60 : vector<16x32xf32>
    %c9 = arith.constant 9 : index
    %c0_21 = arith.constant 0 : index
    %62 = vector.load %arg7[%c9, %c0_21] : memref<32x128xf32, #tpu.memory_space<vmem>>, vector<1x32xf32>
    %c10 = arith.constant 10 : index
    %c0_22 = arith.constant 0 : index
    %63 = vector.load %arg7[%c10, %c0_22] : memref<32x128xf32, #tpu.memory_space<vmem>>, vector<1x32xf32>
    %cst_23 = arith.constant dense<0.000000e+00> : vector<16xf32>
    %64 = vector.multi_reduction <add>, %61, %cst_23 [1] : vector<16x32xf32> to vector<16xf32>
    %65 = vector.shape_cast %64 : vector<16xf32> to vector<16x1xf32>
    %cst_24 = arith.constant 3.200000e+01 : f32
    %66 = vector.broadcast %cst_24 : f32 to vector<16x1xf32>
    %67 = arith.divf %65, %66 : vector<16x1xf32>
    %68 = vector.broadcast %67 : vector<16x1xf32> to vector<16x32xf32>
    %69 = arith.subf %61, %68 : vector<16x32xf32>
    %70 = arith.mulf %69, %69 : vector<16x32xf32>
    %cst_25 = arith.constant dense<0.000000e+00> : vector<16xf32>
    %71 = vector.multi_reduction <add>, %70, %cst_25 [1] : vector<16x32xf32> to vector<16xf32>
    %72 = vector.shape_cast %71 : vector<16xf32> to vector<16x1xf32>
    %cst_26 = arith.constant 3.200000e+01 : f32
    %73 = vector.broadcast %cst_26 : f32 to vector<16x1xf32>
    %74 = arith.divf %72, %73 : vector<16x1xf32>
    %75 = vector.broadcast %67 : vector<16x1xf32> to vector<16x32xf32>
    %76 = arith.subf %61, %75 : vector<16x32xf32>
    %cst_27 = arith.constant 9.99999974E-6 : f32
    %77 = vector.broadcast %cst_27 : f32 to vector<16x1xf32>
    %78 = arith.addf %74, %77 : vector<16x1xf32>
    %79 = math.rsqrt %78 : vector<16x1xf32>
    %80 = vector.broadcast %79 : vector<16x1xf32> to vector<16x32xf32>
    %81 = arith.mulf %76, %80 : vector<16x32xf32>
    %82 = vector.broadcast %62 : vector<1x32xf32> to vector<16x32xf32>
    %83 = arith.mulf %81, %82 : vector<16x32xf32>
    %84 = vector.broadcast %63 : vector<1x32xf32> to vector<16x32xf32>
    %85 = arith.addf %83, %84 : vector<16x32xf32>
    %c0_28 = arith.constant 0 : index
    %c0_29 = arith.constant 0 : index
    %c0_30 = arith.constant 0 : index
    %c0_31 = arith.constant 0 : index
    %86 = vector.load %arg3[%c0_28, %c0_29, %c0_30, %c0_31] : memref<2x1x32x2048xbf16, #tpu.memory_space<vmem>>, vector<1x1x32x2048xbf16>
    %87 = vector.shape_cast %86 : vector<1x1x32x2048xbf16> to vector<32x2048xbf16>
    %88 = arith.truncf %85 : vector<16x32xf32> to vector<16x32xbf16>
    %cst_32 = arith.constant dense<0.000000e+00> : vector<16x2048xf32>
    %89 = tpu.matmul %88, %87, %cst_32 {dimension_numbers = #tpu.dot_dimension_numbers<[1], [0], [0], [1], [0, 0, 1, 1], [], []>} : vector<16x32xbf16>, vector<32x2048xbf16>, vector<16x2048xf32> -> vector<16x2048xf32>
    %c0_33 = arith.constant 0 : index
    %c0_34 = arith.constant 0 : index
    %c0_35 = arith.constant 0 : index
    %c0_36 = arith.constant 0 : index
    %90 = vector.load %arg5[%c0_33, %c0_34, %c0_35, %c0_36] : memref<2x1x1x2048xf32, #tpu.memory_space<vmem>>, vector<1x1x1x2048xf32>
    %91 = vector.shape_cast %90 : vector<1x1x1x2048xf32> to vector<1x2048xf32>
    %92 = vector.broadcast %91 : vector<1x2048xf32> to vector<16x2048xf32>
    %93 = arith.addf %89, %92 : vector<16x2048xf32>
    %cst_37 = arith.constant 0.000000e+00 : f32
    %94 = vector.broadcast %cst_37 : f32 to vector<16x2048xf32>
    %95 = arith.maximumf %93, %94 : vector<16x2048xf32>
    %c0_38 = arith.constant 0 : index
    %c0_39 = arith.constant 0 : index
    %c0_40 = arith.constant 0 : index
    %c0_41 = arith.constant 0 : index
    %96 = vector.load %arg4[%c0_38, %c0_39, %c0_40, %c0_41] : memref<2x1x2048x32xbf16, #tpu.memory_space<vmem>>, vector<1x1x2048x32xbf16>
    %97 = vector.shape_cast %96 : vector<1x1x2048x32xbf16> to vector<2048x32xbf16>
    %98 = arith.truncf %95 : vector<16x2048xf32> to vector<16x2048xbf16>
    %cst_42 = arith.constant dense<0.000000e+00> : vector<16x32xf32>
    %99 = tpu.matmul %98, %97, %cst_42 {dimension_numbers = #tpu.dot_dimension_numbers<[1], [0], [0], [1], [0, 0, 1, 1], [], []>} : vector<16x2048xbf16>, vector<2048x32xbf16>, vector<16x32xf32> -> vector<16x32xf32>
    %c8 = arith.constant 8 : index
    %c0_43 = arith.constant 0 : index
    %100 = vector.load %arg7[%c8, %c0_43] : memref<32x128xf32, #tpu.memory_space<vmem>>, vector<1x32xf32>
    %101 = vector.broadcast %100 : vector<1x32xf32> to vector<16x32xf32>
    %102 = arith.addf %99, %101 : vector<16x32xf32>
    %103 = arith.addf %85, %102 : vector<16x32xf32>
    %c11 = arith.constant 11 : index
    %c0_44 = arith.constant 0 : index
    %104 = vector.load %arg7[%c11, %c0_44] : memref<32x128xf32, #tpu.memory_space<vmem>>, vector<1x32xf32>
    %c12 = arith.constant 12 : index
    %c0_45 = arith.constant 0 : index
    %105 = vector.load %arg7[%c12, %c0_45] : memref<32x128xf32, #tpu.memory_space<vmem>>, vector<1x32xf32>
    %cst_46 = arith.constant dense<0.000000e+00> : vector<16xf32>
    %106 = vector.multi_reduction <add>, %103, %cst_46 [1] : vector<16x32xf32> to vector<16xf32>
    %107 = vector.shape_cast %106 : vector<16xf32> to vector<16x1xf32>
    %cst_47 = arith.constant 3.200000e+01 : f32
    %108 = vector.broadcast %cst_47 : f32 to vector<16x1xf32>
    %109 = arith.divf %107, %108 : vector<16x1xf32>
    %110 = vector.broadcast %109 : vector<16x1xf32> to vector<16x32xf32>
    %111 = arith.subf %103, %110 : vector<16x32xf32>
    %112 = arith.mulf %111, %111 : vector<16x32xf32>
    %cst_48 = arith.constant dense<0.000000e+00> : vector<16xf32>
    %113 = vector.multi_reduction <add>, %112, %cst_48 [1] : vector<16x32xf32> to vector<16xf32>
    %114 = vector.shape_cast %113 : vector<16xf32> to vector<16x1xf32>
    %cst_49 = arith.constant 3.200000e+01 : f32
    %115 = vector.broadcast %cst_49 : f32 to vector<16x1xf32>
    %116 = arith.divf %114, %115 : vector<16x1xf32>
    %117 = vector.broadcast %109 : vector<16x1xf32> to vector<16x32xf32>
    %118 = arith.subf %103, %117 : vector<16x32xf32>
    %cst_50 = arith.constant 9.99999974E-6 : f32
    %119 = vector.broadcast %cst_50 : f32 to vector<16x1xf32>
    %120 = arith.addf %116, %119 : vector<16x1xf32>
    %121 = math.rsqrt %120 : vector<16x1xf32>
    %122 = vector.broadcast %121 : vector<16x1xf32> to vector<16x32xf32>
    %123 = arith.mulf %118, %122 : vector<16x32xf32>
    %124 = vector.broadcast %104 : vector<1x32xf32> to vector<16x32xf32>
    %125 = arith.mulf %123, %124 : vector<16x32xf32>
    %126 = vector.broadcast %105 : vector<1x32xf32> to vector<16x32xf32>
    %127 = arith.addf %125, %126 : vector<16x32xf32>
    %c1 = arith.constant 1 : index
    %c0_51 = arith.constant 0 : index
    %128 = vector.load %arg7[%c1, %c0_51] : memref<32x128xf32, #tpu.memory_space<vmem>>, vector<1x32xf32>
    %c2 = arith.constant 2 : index
    %c0_52 = arith.constant 0 : index
    %129 = vector.load %arg7[%c2, %c0_52] : memref<32x128xf32, #tpu.memory_space<vmem>>, vector<1x32xf32>
    %cst_53 = arith.constant dense<0.000000e+00> : vector<16xf32>
    %130 = vector.multi_reduction <add>, %127, %cst_53 [1] : vector<16x32xf32> to vector<16xf32>
    %131 = vector.shape_cast %130 : vector<16xf32> to vector<16x1xf32>
    %cst_54 = arith.constant 3.200000e+01 : f32
    %132 = vector.broadcast %cst_54 : f32 to vector<16x1xf32>
    %133 = arith.divf %131, %132 : vector<16x1xf32>
    %134 = vector.broadcast %133 : vector<16x1xf32> to vector<16x32xf32>
    %135 = arith.subf %127, %134 : vector<16x32xf32>
    %136 = arith.mulf %135, %135 : vector<16x32xf32>
    %cst_55 = arith.constant dense<0.000000e+00> : vector<16xf32>
    %137 = vector.multi_reduction <add>, %136, %cst_55 [1] : vector<16x32xf32> to vector<16xf32>
    %138 = vector.shape_cast %137 : vector<16xf32> to vector<16x1xf32>
    %cst_56 = arith.constant 3.200000e+01 : f32
    %139 = vector.broadcast %cst_56 : f32 to vector<16x1xf32>
    %140 = arith.divf %138, %139 : vector<16x1xf32>
    %141 = vector.broadcast %133 : vector<16x1xf32> to vector<16x32xf32>
    %142 = arith.subf %127, %141 : vector<16x32xf32>
    %cst_57 = arith.constant 9.99999974E-6 : f32
    %143 = vector.broadcast %cst_57 : f32 to vector<16x1xf32>
    %144 = arith.addf %140, %143 : vector<16x1xf32>
    %145 = math.rsqrt %144 : vector<16x1xf32>
    %146 = vector.broadcast %145 : vector<16x1xf32> to vector<16x32xf32>
    %147 = arith.mulf %142, %146 : vector<16x32xf32>
    %148 = vector.broadcast %128 : vector<1x32xf32> to vector<16x32xf32>
    %149 = arith.mulf %147, %148 : vector<16x32xf32>
    %150 = vector.broadcast %129 : vector<1x32xf32> to vector<16x32xf32>
    %151 = arith.addf %149, %150 : vector<16x32xf32>
    %c0_58 = arith.constant 0 : index
    %c0_59 = arith.constant 0 : index
    %c0_60 = arith.constant 0 : index
    %152 = vector.load %arg2[%c0_58, %c0_59, %c0_60] : memref<1x32x384xbf16, #tpu.memory_space<vmem>>, vector<1x32x384xbf16>
    %153 = vector.shape_cast %152 : vector<1x32x384xbf16> to vector<32x384xbf16>
    %154 = vector.extract_strided_slice %153 {offsets = [0, 128], sizes = [32, 96], strides = [1, 1]} : vector<32x384xbf16> to vector<32x96xbf16>
    %155 = arith.truncf %8 : vector<16x32xf32> to vector<16x32xbf16>
    %cst_61 = arith.constant dense<0.000000e+00> : vector<16x96xf32>
    %156 = tpu.matmul %155, %154, %cst_61 {dimension_numbers = #tpu.dot_dimension_numbers<[1], [0], [0], [1], [0, 0, 1, 1], [], []>} : vector<16x32xbf16>, vector<32x96xbf16>, vector<16x96xf32> -> vector<16x96xf32>
    %c13 = arith.constant 13 : index
    %c0_62 = arith.constant 0 : index
    %157 = vector.load %arg7[%c13, %c0_62] : memref<32x128xf32, #tpu.memory_space<vmem>>, vector<1x96xf32>
    %158 = vector.broadcast %157 : vector<1x96xf32> to vector<16x96xf32>
    %159 = arith.addf %156, %158 : vector<16x96xf32>
    %160 = vector.extract_strided_slice %159 {offsets = [0, 0], sizes = [16, 32], strides = [1, 1]} : vector<16x96xf32> to vector<16x32xf32>
    %161 = vector.extract_strided_slice %159 {offsets = [0, 32], sizes = [16, 32], strides = [1, 1]} : vector<16x96xf32> to vector<16x32xf32>
    %162 = vector.extract_strided_slice %159 {offsets = [0, 64], sizes = [16, 32], strides = [1, 1]} : vector<16x96xf32> to vector<16x32xf32>
    %163 = vector.shape_cast %160 : vector<16x32xf32> to vector<2x8x32xf32>
    %164 = vector.shape_cast %161 : vector<16x32xf32> to vector<2x8x32xf32>
    %165 = vector.shape_cast %162 : vector<16x32xf32> to vector<2x8x32xf32>
    %166 = vector.extract_strided_slice %163 {offsets = [0, 0, 0], sizes = [2, 8, 16], strides = [1, 1, 1]} : vector<2x8x32xf32> to vector<2x8x16xf32>
    %167 = vector.extract_strided_slice %164 {offsets = [0, 0, 0], sizes = [2, 8, 16], strides = [1, 1, 1]} : vector<2x8x32xf32> to vector<2x8x16xf32>
    "tpu.trace_start"() <{level = 10 : i32, message = "bqd,bkd->bqk"}> : () -> ()
    %cst_63 = arith.constant dense<0.000000e+00> : vector<2x8x8xf32>
    %168 = tpu.matmul %166, %167, %cst_63 {dimension_numbers = #tpu.dot_dimension_numbers<[2], [2], [1], [1], [0, 0, 0, 1, 1, 1], [0], [0]>} : vector<2x8x16xf32>, vector<2x8x16xf32>, vector<2x8x8xf32> -> vector<2x8x8xf32>
    "tpu.trace_stop"() : () -> ()
    %cst_64 = arith.constant dense<0xFF800000> : vector<2x8xf32>
    %169 = vector.multi_reduction <maximumf>, %168, %cst_64 [2] : vector<2x8x8xf32> to vector<2x8xf32>
    %170 = vector.shape_cast %169 : vector<2x8xf32> to vector<2x8x1xf32>
    %171 = vector.broadcast %170 : vector<2x8x1xf32> to vector<2x8x8xf32>
    %172 = arith.subf %168, %171 : vector<2x8x8xf32>
    %173 = math.exp %172 : vector<2x8x8xf32>
    %cst_65 = arith.constant dense<0.000000e+00> : vector<2x8xf32>
    %174 = vector.multi_reduction <add>, %173, %cst_65 [2] : vector<2x8x8xf32> to vector<2x8xf32>
    %175 = vector.shape_cast %174 : vector<2x8xf32> to vector<2x8x1xf32>
    %176 = tpu.reciprocal %175 {approx = true} : vector<2x8x1xf32> -> vector<2x8x1xf32>
    %177 = vector.broadcast %176 : vector<2x8x1xf32> to vector<2x8x8xf32>
    %178 = arith.mulf %173, %177 : vector<2x8x8xf32>
    %179 = vector.extract_strided_slice %165 {offsets = [0, 0, 0], sizes = [2, 8, 16], strides = [1, 1, 1]} : vector<2x8x32xf32> to vector<2x8x16xf32>
    "tpu.trace_start"() <{level = 10 : i32, message = "bqk,bkd->bqd"}> : () -> ()
    %cst_66 = arith.constant dense<0.000000e+00> : vector<2x8x16xf32>
    %180 = tpu.matmul %178, %179, %cst_66 {dimension_numbers = #tpu.dot_dimension_numbers<[2], [1], [1], [2], [0, 0, 0, 1, 1, 2], [0], [0]>} : vector<2x8x8xf32>, vector<2x8x16xf32>, vector<2x8x16xf32> -> vector<2x8x16xf32>
    "tpu.trace_stop"() : () -> ()
    %181 = vector.extract_strided_slice %163 {offsets = [0, 0, 16], sizes = [2, 8, 16], strides = [1, 1, 1]} : vector<2x8x32xf32> to vector<2x8x16xf32>
    %182 = vector.extract_strided_slice %164 {offsets = [0, 0, 16], sizes = [2, 8, 16], strides = [1, 1, 1]} : vector<2x8x32xf32> to vector<2x8x16xf32>
    "tpu.trace_start"() <{level = 10 : i32, message = "bqd,bkd->bqk"}> : () -> ()
    %cst_67 = arith.constant dense<0.000000e+00> : vector<2x8x8xf32>
    %183 = tpu.matmul %181, %182, %cst_67 {dimension_numbers = #tpu.dot_dimension_numbers<[2], [2], [1], [1], [0, 0, 0, 1, 1, 1], [0], [0]>} : vector<2x8x16xf32>, vector<2x8x16xf32>, vector<2x8x8xf32> -> vector<2x8x8xf32>
    "tpu.trace_stop"() : () -> ()
    %cst_68 = arith.constant dense<0xFF800000> : vector<2x8xf32>
    %184 = vector.multi_reduction <maximumf>, %183, %cst_68 [2] : vector<2x8x8xf32> to vector<2x8xf32>
    %185 = vector.shape_cast %184 : vector<2x8xf32> to vector<2x8x1xf32>
    %186 = vector.broadcast %185 : vector<2x8x1xf32> to vector<2x8x8xf32>
    %187 = arith.subf %183, %186 : vector<2x8x8xf32>
    %188 = math.exp %187 : vector<2x8x8xf32>
    %cst_69 = arith.constant dense<0.000000e+00> : vector<2x8xf32>
    %189 = vector.multi_reduction <add>, %188, %cst_69 [2] : vector<2x8x8xf32> to vector<2x8xf32>
    %190 = vector.shape_cast %189 : vector<2x8xf32> to vector<2x8x1xf32>
    %191 = tpu.reciprocal %190 {approx = true} : vector<2x8x1xf32> -> vector<2x8x1xf32>
    %192 = vector.broadcast %191 : vector<2x8x1xf32> to vector<2x8x8xf32>
    %193 = arith.mulf %188, %192 : vector<2x8x8xf32>
    %194 = vector.extract_strided_slice %165 {offsets = [0, 0, 16], sizes = [2, 8, 16], strides = [1, 1, 1]} : vector<2x8x32xf32> to vector<2x8x16xf32>
    "tpu.trace_start"() <{level = 10 : i32, message = "bqk,bkd->bqd"}> : () -> ()
    %cst_70 = arith.constant dense<0.000000e+00> : vector<2x8x16xf32>
    %195 = tpu.matmul %193, %194, %cst_70 {dimension_numbers = #tpu.dot_dimension_numbers<[2], [1], [1], [2], [0, 0, 0, 1, 1, 2], [0], [0]>} : vector<2x8x8xf32>, vector<2x8x16xf32>, vector<2x8x16xf32> -> vector<2x8x16xf32>
    "tpu.trace_stop"() : () -> ()
    %196 = tpu.concatenate %180, %195 in 2 : vector<2x8x16xf32>, vector<2x8x16xf32> -> vector<2x8x32xf32>
    %197 = vector.shape_cast %196 : vector<2x8x32xf32> to vector<16x32xf32>
    %198 = vector.extract_strided_slice %153 {offsets = [0, 224], sizes = [32, 32], strides = [1, 1]} : vector<32x384xbf16> to vector<32x32xbf16>
    %199 = arith.truncf %197 : vector<16x32xf32> to vector<16x32xbf16>
    %cst_71 = arith.constant dense<0.000000e+00> : vector<16x32xf32>
    %200 = tpu.matmul %199, %198, %cst_71 {dimension_numbers = #tpu.dot_dimension_numbers<[1], [0], [0], [1], [0, 0, 1, 1], [], []>} : vector<16x32xbf16>, vector<32x32xbf16>, vector<16x32xf32> -> vector<16x32xf32>
    %c14 = arith.constant 14 : index
    %c0_72 = arith.constant 0 : index
    %201 = vector.load %arg7[%c14, %c0_72] : memref<32x128xf32, #tpu.memory_space<vmem>>, vector<1x32xf32>
    %202 = vector.broadcast %201 : vector<1x32xf32> to vector<16x32xf32>
    %203 = arith.addf %200, %202 : vector<16x32xf32>
    %204 = arith.addf %8, %203 : vector<16x32xf32>
    %c19 = arith.constant 19 : index
    %c0_73 = arith.constant 0 : index
    %205 = vector.load %arg7[%c19, %c0_73] : memref<32x128xf32, #tpu.memory_space<vmem>>, vector<1x32xf32>
    %c20 = arith.constant 20 : index
    %c0_74 = arith.constant 0 : index
    %206 = vector.load %arg7[%c20, %c0_74] : memref<32x128xf32, #tpu.memory_space<vmem>>, vector<1x32xf32>
    %cst_75 = arith.constant dense<0.000000e+00> : vector<16xf32>
    %207 = vector.multi_reduction <add>, %204, %cst_75 [1] : vector<16x32xf32> to vector<16xf32>
    %208 = vector.shape_cast %207 : vector<16xf32> to vector<16x1xf32>
    %cst_76 = arith.constant 3.200000e+01 : f32
    %209 = vector.broadcast %cst_76 : f32 to vector<16x1xf32>
    %210 = arith.divf %208, %209 : vector<16x1xf32>
    %211 = vector.broadcast %210 : vector<16x1xf32> to vector<16x32xf32>
    %212 = arith.subf %204, %211 : vector<16x32xf32>
    %213 = arith.mulf %212, %212 : vector<16x32xf32>
    %cst_77 = arith.constant dense<0.000000e+00> : vector<16xf32>
    %214 = vector.multi_reduction <add>, %213, %cst_77 [1] : vector<16x32xf32> to vector<16xf32>
    %215 = vector.shape_cast %214 : vector<16xf32> to vector<16x1xf32>
    %cst_78 = arith.constant 3.200000e+01 : f32
    %216 = vector.broadcast %cst_78 : f32 to vector<16x1xf32>
    %217 = arith.divf %215, %216 : vector<16x1xf32>
    %218 = vector.broadcast %210 : vector<16x1xf32> to vector<16x32xf32>
    %219 = arith.subf %204, %218 : vector<16x32xf32>
    %cst_79 = arith.constant 9.99999974E-6 : f32
    %220 = vector.broadcast %cst_79 : f32 to vector<16x1xf32>
    %221 = arith.addf %217, %220 : vector<16x1xf32>
    %222 = math.rsqrt %221 : vector<16x1xf32>
    %223 = vector.broadcast %222 : vector<16x1xf32> to vector<16x32xf32>
    %224 = arith.mulf %219, %223 : vector<16x32xf32>
    %225 = vector.broadcast %205 : vector<1x32xf32> to vector<16x32xf32>
    %226 = arith.mulf %224, %225 : vector<16x32xf32>
    %227 = vector.broadcast %206 : vector<1x32xf32> to vector<16x32xf32>
    %228 = arith.addf %226, %227 : vector<16x32xf32>
    %229 = vector.extract_strided_slice %153 {offsets = [0, 256], sizes = [32, 32], strides = [1, 1]} : vector<32x384xbf16> to vector<32x32xbf16>
    %230 = arith.truncf %228 : vector<16x32xf32> to vector<16x32xbf16>
    %cst_80 = arith.constant dense<0.000000e+00> : vector<16x32xf32>
    %231 = tpu.matmul %230, %229, %cst_80 {dimension_numbers = #tpu.dot_dimension_numbers<[1], [0], [0], [1], [0, 0, 1, 1], [], []>} : vector<16x32xbf16>, vector<32x32xbf16>, vector<16x32xf32> -> vector<16x32xf32>
    %c15 = arith.constant 15 : index
    %c0_81 = arith.constant 0 : index
    %232 = vector.load %arg7[%c15, %c0_81] : memref<32x128xf32, #tpu.memory_space<vmem>>, vector<1x32xf32>
    %233 = vector.broadcast %232 : vector<1x32xf32> to vector<16x32xf32>
    %234 = arith.addf %231, %233 : vector<16x32xf32>
    %235 = vector.extract_strided_slice %153 {offsets = [0, 288], sizes = [32, 64], strides = [1, 1]} : vector<32x384xbf16> to vector<32x64xbf16>
    %236 = arith.truncf %151 : vector<16x32xf32> to vector<16x32xbf16>
    %cst_82 = arith.constant dense<0.000000e+00> : vector<16x64xf32>
    %237 = tpu.matmul %236, %235, %cst_82 {dimension_numbers = #tpu.dot_dimension_numbers<[1], [0], [0], [1], [0, 0, 1, 1], [], []>} : vector<16x32xbf16>, vector<32x64xbf16>, vector<16x64xf32> -> vector<16x64xf32>
    %c16 = arith.constant 16 : index
    %c0_83 = arith.constant 0 : index
    %238 = vector.load %arg7[%c16, %c0_83] : memref<32x128xf32, #tpu.memory_space<vmem>>, vector<1x64xf32>
    %239 = vector.broadcast %238 : vector<1x64xf32> to vector<16x64xf32>
    %240 = arith.addf %237, %239 : vector<16x64xf32>
    %241 = vector.extract_strided_slice %240 {offsets = [0, 0], sizes = [16, 32], strides = [1, 1]} : vector<16x64xf32> to vector<16x32xf32>
    %242 = vector.extract_strided_slice %240 {offsets = [0, 32], sizes = [16, 32], strides = [1, 1]} : vector<16x64xf32> to vector<16x32xf32>
    %243 = vector.shape_cast %234 : vector<16x32xf32> to vector<2x8x32xf32>
    %244 = vector.shape_cast %241 : vector<16x32xf32> to vector<2x8x32xf32>
    %245 = vector.shape_cast %242 : vector<16x32xf32> to vector<2x8x32xf32>
    %246 = vector.extract_strided_slice %243 {offsets = [0, 0, 0], sizes = [2, 8, 16], strides = [1, 1, 1]} : vector<2x8x32xf32> to vector<2x8x16xf32>
    %247 = vector.extract_strided_slice %244 {offsets = [0, 0, 0], sizes = [2, 8, 16], strides = [1, 1, 1]} : vector<2x8x32xf32> to vector<2x8x16xf32>
    "tpu.trace_start"() <{level = 10 : i32, message = "bqd,bkd->bqk"}> : () -> ()
    %cst_84 = arith.constant dense<0.000000e+00> : vector<2x8x8xf32>
    %248 = tpu.matmul %246, %247, %cst_84 {dimension_numbers = #tpu.dot_dimension_numbers<[2], [2], [1], [1], [0, 0, 0, 1, 1, 1], [0], [0]>} : vector<2x8x16xf32>, vector<2x8x16xf32>, vector<2x8x8xf32> -> vector<2x8x8xf32>
    "tpu.trace_stop"() : () -> ()
    %cst_85 = arith.constant dense<0xFF800000> : vector<2x8xf32>
    %249 = vector.multi_reduction <maximumf>, %248, %cst_85 [2] : vector<2x8x8xf32> to vector<2x8xf32>
    %250 = vector.shape_cast %249 : vector<2x8xf32> to vector<2x8x1xf32>
    %251 = vector.broadcast %250 : vector<2x8x1xf32> to vector<2x8x8xf32>
    %252 = arith.subf %248, %251 : vector<2x8x8xf32>
    %253 = math.exp %252 : vector<2x8x8xf32>
    %cst_86 = arith.constant dense<0.000000e+00> : vector<2x8xf32>
    %254 = vector.multi_reduction <add>, %253, %cst_86 [2] : vector<2x8x8xf32> to vector<2x8xf32>
    %255 = vector.shape_cast %254 : vector<2x8xf32> to vector<2x8x1xf32>
    %256 = tpu.reciprocal %255 {approx = true} : vector<2x8x1xf32> -> vector<2x8x1xf32>
    %257 = vector.broadcast %256 : vector<2x8x1xf32> to vector<2x8x8xf32>
    %258 = arith.mulf %253, %257 : vector<2x8x8xf32>
    %259 = vector.extract_strided_slice %245 {offsets = [0, 0, 0], sizes = [2, 8, 16], strides = [1, 1, 1]} : vector<2x8x32xf32> to vector<2x8x16xf32>
    "tpu.trace_start"() <{level = 10 : i32, message = "bqk,bkd->bqd"}> : () -> ()
    %cst_87 = arith.constant dense<0.000000e+00> : vector<2x8x16xf32>
    %260 = tpu.matmul %258, %259, %cst_87 {dimension_numbers = #tpu.dot_dimension_numbers<[2], [1], [1], [2], [0, 0, 0, 1, 1, 2], [0], [0]>} : vector<2x8x8xf32>, vector<2x8x16xf32>, vector<2x8x16xf32> -> vector<2x8x16xf32>
    "tpu.trace_stop"() : () -> ()
    %261 = vector.extract_strided_slice %243 {offsets = [0, 0, 16], sizes = [2, 8, 16], strides = [1, 1, 1]} : vector<2x8x32xf32> to vector<2x8x16xf32>
    %262 = vector.extract_strided_slice %244 {offsets = [0, 0, 16], sizes = [2, 8, 16], strides = [1, 1, 1]} : vector<2x8x32xf32> to vector<2x8x16xf32>
    "tpu.trace_start"() <{level = 10 : i32, message = "bqd,bkd->bqk"}> : () -> ()
    %cst_88 = arith.constant dense<0.000000e+00> : vector<2x8x8xf32>
    %263 = tpu.matmul %261, %262, %cst_88 {dimension_numbers = #tpu.dot_dimension_numbers<[2], [2], [1], [1], [0, 0, 0, 1, 1, 1], [0], [0]>} : vector<2x8x16xf32>, vector<2x8x16xf32>, vector<2x8x8xf32> -> vector<2x8x8xf32>
    "tpu.trace_stop"() : () -> ()
    %cst_89 = arith.constant dense<0xFF800000> : vector<2x8xf32>
    %264 = vector.multi_reduction <maximumf>, %263, %cst_89 [2] : vector<2x8x8xf32> to vector<2x8xf32>
    %265 = vector.shape_cast %264 : vector<2x8xf32> to vector<2x8x1xf32>
    %266 = vector.broadcast %265 : vector<2x8x1xf32> to vector<2x8x8xf32>
    %267 = arith.subf %263, %266 : vector<2x8x8xf32>
    %268 = math.exp %267 : vector<2x8x8xf32>
    %cst_90 = arith.constant dense<0.000000e+00> : vector<2x8xf32>
    %269 = vector.multi_reduction <add>, %268, %cst_90 [2] : vector<2x8x8xf32> to vector<2x8xf32>
    %270 = vector.shape_cast %269 : vector<2x8xf32> to vector<2x8x1xf32>
    %271 = tpu.reciprocal %270 {approx = true} : vector<2x8x1xf32> -> vector<2x8x1xf32>
    %272 = vector.broadcast %271 : vector<2x8x1xf32> to vector<2x8x8xf32>
    %273 = arith.mulf %268, %272 : vector<2x8x8xf32>
    %274 = vector.extract_strided_slice %245 {offsets = [0, 0, 16], sizes = [2, 8, 16], strides = [1, 1, 1]} : vector<2x8x32xf32> to vector<2x8x16xf32>
    "tpu.trace_start"() <{level = 10 : i32, message = "bqk,bkd->bqd"}> : () -> ()
    %cst_91 = arith.constant dense<0.000000e+00> : vector<2x8x16xf32>
    %275 = tpu.matmul %273, %274, %cst_91 {dimension_numbers = #tpu.dot_dimension_numbers<[2], [1], [1], [2], [0, 0, 0, 1, 1, 2], [0], [0]>} : vector<2x8x8xf32>, vector<2x8x16xf32>, vector<2x8x16xf32> -> vector<2x8x16xf32>
    "tpu.trace_stop"() : () -> ()
    %276 = tpu.concatenate %260, %275 in 2 : vector<2x8x16xf32>, vector<2x8x16xf32> -> vector<2x8x32xf32>
    %277 = vector.shape_cast %276 : vector<2x8x32xf32> to vector<16x32xf32>
    %278 = vector.extract_strided_slice %153 {offsets = [0, 352], sizes = [32, 32], strides = [1, 1]} : vector<32x384xbf16> to vector<32x32xbf16>
    %279 = arith.truncf %277 : vector<16x32xf32> to vector<16x32xbf16>
    %cst_92 = arith.constant dense<0.000000e+00> : vector<16x32xf32>
    %280 = tpu.matmul %279, %278, %cst_92 {dimension_numbers = #tpu.dot_dimension_numbers<[1], [0], [0], [1], [0, 0, 1, 1], [], []>} : vector<16x32xbf16>, vector<32x32xbf16>, vector<16x32xf32> -> vector<16x32xf32>
    %c17 = arith.constant 17 : index
    %c0_93 = arith.constant 0 : index
    %281 = vector.load %arg7[%c17, %c0_93] : memref<32x128xf32, #tpu.memory_space<vmem>>, vector<1x32xf32>
    %282 = vector.broadcast %281 : vector<1x32xf32> to vector<16x32xf32>
    %283 = arith.addf %280, %282 : vector<16x32xf32>
    %284 = arith.addf %228, %283 : vector<16x32xf32>
    %c21 = arith.constant 21 : index
    %c0_94 = arith.constant 0 : index
    %285 = vector.load %arg7[%c21, %c0_94] : memref<32x128xf32, #tpu.memory_space<vmem>>, vector<1x32xf32>
    %c22 = arith.constant 22 : index
    %c0_95 = arith.constant 0 : index
    %286 = vector.load %arg7[%c22, %c0_95] : memref<32x128xf32, #tpu.memory_space<vmem>>, vector<1x32xf32>
    %cst_96 = arith.constant dense<0.000000e+00> : vector<16xf32>
    %287 = vector.multi_reduction <add>, %284, %cst_96 [1] : vector<16x32xf32> to vector<16xf32>
    %288 = vector.shape_cast %287 : vector<16xf32> to vector<16x1xf32>
    %cst_97 = arith.constant 3.200000e+01 : f32
    %289 = vector.broadcast %cst_97 : f32 to vector<16x1xf32>
    %290 = arith.divf %288, %289 : vector<16x1xf32>
    %291 = vector.broadcast %290 : vector<16x1xf32> to vector<16x32xf32>
    %292 = arith.subf %284, %291 : vector<16x32xf32>
    %293 = arith.mulf %292, %292 : vector<16x32xf32>
    %cst_98 = arith.constant dense<0.000000e+00> : vector<16xf32>
    %294 = vector.multi_reduction <add>, %293, %cst_98 [1] : vector<16x32xf32> to vector<16xf32>
    %295 = vector.shape_cast %294 : vector<16xf32> to vector<16x1xf32>
    %cst_99 = arith.constant 3.200000e+01 : f32
    %296 = vector.broadcast %cst_99 : f32 to vector<16x1xf32>
    %297 = arith.divf %295, %296 : vector<16x1xf32>
    %298 = vector.broadcast %290 : vector<16x1xf32> to vector<16x32xf32>
    %299 = arith.subf %284, %298 : vector<16x32xf32>
    %cst_100 = arith.constant 9.99999974E-6 : f32
    %300 = vector.broadcast %cst_100 : f32 to vector<16x1xf32>
    %301 = arith.addf %297, %300 : vector<16x1xf32>
    %302 = math.rsqrt %301 : vector<16x1xf32>
    %303 = vector.broadcast %302 : vector<16x1xf32> to vector<16x32xf32>
    %304 = arith.mulf %299, %303 : vector<16x32xf32>
    %305 = vector.broadcast %285 : vector<1x32xf32> to vector<16x32xf32>
    %306 = arith.mulf %304, %305 : vector<16x32xf32>
    %307 = vector.broadcast %286 : vector<1x32xf32> to vector<16x32xf32>
    %308 = arith.addf %306, %307 : vector<16x32xf32>
    %c1_101 = arith.constant 1 : index
    %c0_102 = arith.constant 0 : index
    %c0_103 = arith.constant 0 : index
    %c0_104 = arith.constant 0 : index
    %309 = vector.load %arg3[%c1_101, %c0_102, %c0_103, %c0_104] : memref<2x1x32x2048xbf16, #tpu.memory_space<vmem>>, vector<1x1x32x2048xbf16>
    %310 = vector.shape_cast %309 : vector<1x1x32x2048xbf16> to vector<32x2048xbf16>
    %311 = arith.truncf %308 : vector<16x32xf32> to vector<16x32xbf16>
    %cst_105 = arith.constant dense<0.000000e+00> : vector<16x2048xf32>
    %312 = tpu.matmul %311, %310, %cst_105 {dimension_numbers = #tpu.dot_dimension_numbers<[1], [0], [0], [1], [0, 0, 1, 1], [], []>} : vector<16x32xbf16>, vector<32x2048xbf16>, vector<16x2048xf32> -> vector<16x2048xf32>
    %c1_106 = arith.constant 1 : index
    %c0_107 = arith.constant 0 : index
    %c0_108 = arith.constant 0 : index
    %c0_109 = arith.constant 0 : index
    %313 = vector.load %arg5[%c1_106, %c0_107, %c0_108, %c0_109] : memref<2x1x1x2048xf32, #tpu.memory_space<vmem>>, vector<1x1x1x2048xf32>
    %314 = vector.shape_cast %313 : vector<1x1x1x2048xf32> to vector<1x2048xf32>
    %315 = vector.broadcast %314 : vector<1x2048xf32> to vector<16x2048xf32>
    %316 = arith.addf %312, %315 : vector<16x2048xf32>
    %cst_110 = arith.constant 0.000000e+00 : f32
    %317 = vector.broadcast %cst_110 : f32 to vector<16x2048xf32>
    %318 = arith.maximumf %316, %317 : vector<16x2048xf32>
    %c1_111 = arith.constant 1 : index
    %c0_112 = arith.constant 0 : index
    %c0_113 = arith.constant 0 : index
    %c0_114 = arith.constant 0 : index
    %319 = vector.load %arg4[%c1_111, %c0_112, %c0_113, %c0_114] : memref<2x1x2048x32xbf16, #tpu.memory_space<vmem>>, vector<1x1x2048x32xbf16>
    %320 = vector.shape_cast %319 : vector<1x1x2048x32xbf16> to vector<2048x32xbf16>
    %321 = arith.truncf %318 : vector<16x2048xf32> to vector<16x2048xbf16>
    %cst_115 = arith.constant dense<0.000000e+00> : vector<16x32xf32>
    %322 = tpu.matmul %321, %320, %cst_115 {dimension_numbers = #tpu.dot_dimension_numbers<[1], [0], [0], [1], [0, 0, 1, 1], [], []>} : vector<16x2048xbf16>, vector<2048x32xbf16>, vector<16x32xf32> -> vector<16x32xf32>
    %c18 = arith.constant 18 : index
    %c0_116 = arith.constant 0 : index
    %323 = vector.load %arg7[%c18, %c0_116] : memref<32x128xf32, #tpu.memory_space<vmem>>, vector<1x32xf32>
    %324 = vector.broadcast %323 : vector<1x32xf32> to vector<16x32xf32>
    %325 = arith.addf %322, %324 : vector<16x32xf32>
    %326 = arith.addf %308, %325 : vector<16x32xf32>
    %c23 = arith.constant 23 : index
    %c0_117 = arith.constant 0 : index
    %327 = vector.load %arg7[%c23, %c0_117] : memref<32x128xf32, #tpu.memory_space<vmem>>, vector<1x32xf32>
    %c24 = arith.constant 24 : index
    %c0_118 = arith.constant 0 : index
    %328 = vector.load %arg7[%c24, %c0_118] : memref<32x128xf32, #tpu.memory_space<vmem>>, vector<1x32xf32>
    %cst_119 = arith.constant dense<0.000000e+00> : vector<16xf32>
    %329 = vector.multi_reduction <add>, %326, %cst_119 [1] : vector<16x32xf32> to vector<16xf32>
    %330 = vector.shape_cast %329 : vector<16xf32> to vector<16x1xf32>
    %cst_120 = arith.constant 3.200000e+01 : f32
    %331 = vector.broadcast %cst_120 : f32 to vector<16x1xf32>
    %332 = arith.divf %330, %331 : vector<16x1xf32>
    %333 = vector.broadcast %332 : vector<16x1xf32> to vector<16x32xf32>
    %334 = arith.subf %326, %333 : vector<16x32xf32>
    %335 = arith.mulf %334, %334 : vector<16x32xf32>
    %cst_121 = arith.constant dense<0.000000e+00> : vector<16xf32>
    %336 = vector.multi_reduction <add>, %335, %cst_121 [1] : vector<16x32xf32> to vector<16xf32>
    %337 = vector.shape_cast %336 : vector<16xf32> to vector<16x1xf32>
    %cst_122 = arith.constant 3.200000e+01 : f32
    %338 = vector.broadcast %cst_122 : f32 to vector<16x1xf32>
    %339 = arith.divf %337, %338 : vector<16x1xf32>
    %340 = vector.broadcast %332 : vector<16x1xf32> to vector<16x32xf32>
    %341 = arith.subf %326, %340 : vector<16x32xf32>
    %cst_123 = arith.constant 9.99999974E-6 : f32
    %342 = vector.broadcast %cst_123 : f32 to vector<16x1xf32>
    %343 = arith.addf %339, %342 : vector<16x1xf32>
    %344 = math.rsqrt %343 : vector<16x1xf32>
    %345 = vector.broadcast %344 : vector<16x1xf32> to vector<16x32xf32>
    %346 = arith.mulf %341, %345 : vector<16x32xf32>
    %347 = vector.broadcast %327 : vector<1x32xf32> to vector<16x32xf32>
    %348 = arith.mulf %346, %347 : vector<16x32xf32>
    %349 = vector.broadcast %328 : vector<1x32xf32> to vector<16x32xf32>
    %350 = arith.addf %348, %349 : vector<16x32xf32>
    %c3 = arith.constant 3 : index
    %c0_124 = arith.constant 0 : index
    %351 = vector.load %arg7[%c3, %c0_124] : memref<32x128xf32, #tpu.memory_space<vmem>>, vector<1x32xf32>
    %c4 = arith.constant 4 : index
    %c0_125 = arith.constant 0 : index
    %352 = vector.load %arg7[%c4, %c0_125] : memref<32x128xf32, #tpu.memory_space<vmem>>, vector<1x32xf32>
    %cst_126 = arith.constant dense<0.000000e+00> : vector<16xf32>
    %353 = vector.multi_reduction <add>, %350, %cst_126 [1] : vector<16x32xf32> to vector<16xf32>
    %354 = vector.shape_cast %353 : vector<16xf32> to vector<16x1xf32>
    %cst_127 = arith.constant 3.200000e+01 : f32
    %355 = vector.broadcast %cst_127 : f32 to vector<16x1xf32>
    %356 = arith.divf %354, %355 : vector<16x1xf32>
    %357 = vector.broadcast %356 : vector<16x1xf32> to vector<16x32xf32>
    %358 = arith.subf %350, %357 : vector<16x32xf32>
    %359 = arith.mulf %358, %358 : vector<16x32xf32>
    %cst_128 = arith.constant dense<0.000000e+00> : vector<16xf32>
    %360 = vector.multi_reduction <add>, %359, %cst_128 [1] : vector<16x32xf32> to vector<16xf32>
    %361 = vector.shape_cast %360 : vector<16xf32> to vector<16x1xf32>
    %cst_129 = arith.constant 3.200000e+01 : f32
    %362 = vector.broadcast %cst_129 : f32 to vector<16x1xf32>
    %363 = arith.divf %361, %362 : vector<16x1xf32>
    %364 = vector.broadcast %356 : vector<16x1xf32> to vector<16x32xf32>
    %365 = arith.subf %350, %364 : vector<16x32xf32>
    %cst_130 = arith.constant 9.99999974E-6 : f32
    %366 = vector.broadcast %cst_130 : f32 to vector<16x1xf32>
    %367 = arith.addf %363, %366 : vector<16x1xf32>
    %368 = math.rsqrt %367 : vector<16x1xf32>
    %369 = vector.broadcast %368 : vector<16x1xf32> to vector<16x32xf32>
    %370 = arith.mulf %365, %369 : vector<16x32xf32>
    %371 = vector.broadcast %351 : vector<1x32xf32> to vector<16x32xf32>
    %372 = arith.mulf %370, %371 : vector<16x32xf32>
    %373 = vector.broadcast %352 : vector<1x32xf32> to vector<16x32xf32>
    %374 = arith.addf %372, %373 : vector<16x32xf32>
    %375 = vector.shape_cast %374 : vector<16x32xf32> to vector<2x8x32xf32>
    %376 = vector.extract_strided_slice %375 {offsets = [0, 0, 0], sizes = [2, 1, 32], strides = [1, 1, 1]} : vector<2x8x32xf32> to vector<2x1x32xf32>
    %377 = vector.shape_cast %376 : vector<2x1x32xf32> to vector<2x32xf32>
    %c0_131 = arith.constant 0 : index
    %c0_132 = arith.constant 0 : index
    %c0_133 = arith.constant 0 : index
    %378 = vector.load %arg6[%c0_131, %c0_132, %c0_133] : memref<8x32x128xbf16, #tpu.memory_space<vmem>>, vector<1x32x128xbf16>
    %379 = vector.shape_cast %378 : vector<1x32x128xbf16> to vector<32x128xbf16>
    %380 = arith.truncf %377 : vector<2x32xf32> to vector<2x32xbf16>
    %cst_134 = arith.constant dense<0.000000e+00> : vector<2x128xf32>
    %381 = tpu.matmul %380, %379, %cst_134 {dimension_numbers = #tpu.dot_dimension_numbers<[1], [0], [0], [1], [0, 0, 1, 1], [], []>} : vector<2x32xbf16>, vector<32x128xbf16>, vector<2x128xf32> -> vector<2x128xf32>
    %382 = vector.extract_strided_slice %375 {offsets = [0, 1, 0], sizes = [2, 1, 32], strides = [1, 1, 1]} : vector<2x8x32xf32> to vector<2x1x32xf32>
    %383 = vector.shape_cast %382 : vector<2x1x32xf32> to vector<2x32xf32>
    %c1_135 = arith.constant 1 : index
    %c0_136 = arith.constant 0 : index
    %c0_137 = arith.constant 0 : index
    %384 = vector.load %arg6[%c1_135, %c0_136, %c0_137] : memref<8x32x128xbf16, #tpu.memory_space<vmem>>, vector<1x32x128xbf16>
    %385 = vector.shape_cast %384 : vector<1x32x128xbf16> to vector<32x128xbf16>
    %386 = arith.truncf %383 : vector<2x32xf32> to vector<2x32xbf16>
    %cst_138 = arith.constant dense<0.000000e+00> : vector<2x128xf32>
    %387 = tpu.matmul %386, %385, %cst_138 {dimension_numbers = #tpu.dot_dimension_numbers<[1], [0], [0], [1], [0, 0, 1, 1], [], []>} : vector<2x32xbf16>, vector<32x128xbf16>, vector<2x128xf32> -> vector<2x128xf32>
    %388 = arith.addf %381, %387 : vector<2x128xf32>
    %389 = vector.extract_strided_slice %375 {offsets = [0, 2, 0], sizes = [2, 1, 32], strides = [1, 1, 1]} : vector<2x8x32xf32> to vector<2x1x32xf32>
    %390 = vector.shape_cast %389 : vector<2x1x32xf32> to vector<2x32xf32>
    %c2_139 = arith.constant 2 : index
    %c0_140 = arith.constant 0 : index
    %c0_141 = arith.constant 0 : index
    %391 = vector.load %arg6[%c2_139, %c0_140, %c0_141] : memref<8x32x128xbf16, #tpu.memory_space<vmem>>, vector<1x32x128xbf16>
    %392 = vector.shape_cast %391 : vector<1x32x128xbf16> to vector<32x128xbf16>
    %393 = arith.truncf %390 : vector<2x32xf32> to vector<2x32xbf16>
    %cst_142 = arith.constant dense<0.000000e+00> : vector<2x128xf32>
    %394 = tpu.matmul %393, %392, %cst_142 {dimension_numbers = #tpu.dot_dimension_numbers<[1], [0], [0], [1], [0, 0, 1, 1], [], []>} : vector<2x32xbf16>, vector<32x128xbf16>, vector<2x128xf32> -> vector<2x128xf32>
    %395 = arith.addf %388, %394 : vector<2x128xf32>
    %396 = vector.extract_strided_slice %375 {offsets = [0, 3, 0], sizes = [2, 1, 32], strides = [1, 1, 1]} : vector<2x8x32xf32> to vector<2x1x32xf32>
    %397 = vector.shape_cast %396 : vector<2x1x32xf32> to vector<2x32xf32>
    %c3_143 = arith.constant 3 : index
    %c0_144 = arith.constant 0 : index
    %c0_145 = arith.constant 0 : index
    %398 = vector.load %arg6[%c3_143, %c0_144, %c0_145] : memref<8x32x128xbf16, #tpu.memory_space<vmem>>, vector<1x32x128xbf16>
    %399 = vector.shape_cast %398 : vector<1x32x128xbf16> to vector<32x128xbf16>
    %400 = arith.truncf %397 : vector<2x32xf32> to vector<2x32xbf16>
    %cst_146 = arith.constant dense<0.000000e+00> : vector<2x128xf32>
    %401 = tpu.matmul %400, %399, %cst_146 {dimension_numbers = #tpu.dot_dimension_numbers<[1], [0], [0], [1], [0, 0, 1, 1], [], []>} : vector<2x32xbf16>, vector<32x128xbf16>, vector<2x128xf32> -> vector<2x128xf32>
    %402 = arith.addf %395, %401 : vector<2x128xf32>
    %403 = vector.extract_strided_slice %375 {offsets = [0, 4, 0], sizes = [2, 1, 32], strides = [1, 1, 1]} : vector<2x8x32xf32> to vector<2x1x32xf32>
    %404 = vector.shape_cast %403 : vector<2x1x32xf32> to vector<2x32xf32>
    %c4_147 = arith.constant 4 : index
    %c0_148 = arith.constant 0 : index
    %c0_149 = arith.constant 0 : index
    %405 = vector.load %arg6[%c4_147, %c0_148, %c0_149] : memref<8x32x128xbf16, #tpu.memory_space<vmem>>, vector<1x32x128xbf16>
    %406 = vector.shape_cast %405 : vector<1x32x128xbf16> to vector<32x128xbf16>
    %407 = arith.truncf %404 : vector<2x32xf32> to vector<2x32xbf16>
    %cst_150 = arith.constant dense<0.000000e+00> : vector<2x128xf32>
    %408 = tpu.matmul %407, %406, %cst_150 {dimension_numbers = #tpu.dot_dimension_numbers<[1], [0], [0], [1], [0, 0, 1, 1], [], []>} : vector<2x32xbf16>, vector<32x128xbf16>, vector<2x128xf32> -> vector<2x128xf32>
    %409 = arith.addf %402, %408 : vector<2x128xf32>
    %410 = vector.extract_strided_slice %375 {offsets = [0, 5, 0], sizes = [2, 1, 32], strides = [1, 1, 1]} : vector<2x8x32xf32> to vector<2x1x32xf32>
    %411 = vector.shape_cast %410 : vector<2x1x32xf32> to vector<2x32xf32>
    %c5 = arith.constant 5 : index
    %c0_151 = arith.constant 0 : index
    %c0_152 = arith.constant 0 : index
    %412 = vector.load %arg6[%c5, %c0_151, %c0_152] : memref<8x32x128xbf16, #tpu.memory_space<vmem>>, vector<1x32x128xbf16>
    %413 = vector.shape_cast %412 : vector<1x32x128xbf16> to vector<32x128xbf16>
    %414 = arith.truncf %411 : vector<2x32xf32> to vector<2x32xbf16>
    %cst_153 = arith.constant dense<0.000000e+00> : vector<2x128xf32>
    %415 = tpu.matmul %414, %413, %cst_153 {dimension_numbers = #tpu.dot_dimension_numbers<[1], [0], [0], [1], [0, 0, 1, 1], [], []>} : vector<2x32xbf16>, vector<32x128xbf16>, vector<2x128xf32> -> vector<2x128xf32>
    %416 = arith.addf %409, %415 : vector<2x128xf32>
    %417 = vector.extract_strided_slice %375 {offsets = [0, 6, 0], sizes = [2, 1, 32], strides = [1, 1, 1]} : vector<2x8x32xf32> to vector<2x1x32xf32>
    %418 = vector.shape_cast %417 : vector<2x1x32xf32> to vector<2x32xf32>
    %c6_154 = arith.constant 6 : index
    %c0_155 = arith.constant 0 : index
    %c0_156 = arith.constant 0 : index
    %419 = vector.load %arg6[%c6_154, %c0_155, %c0_156] : memref<8x32x128xbf16, #tpu.memory_space<vmem>>, vector<1x32x128xbf16>
    %420 = vector.shape_cast %419 : vector<1x32x128xbf16> to vector<32x128xbf16>
    %421 = arith.truncf %418 : vector<2x32xf32> to vector<2x32xbf16>
    %cst_157 = arith.constant dense<0.000000e+00> : vector<2x128xf32>
    %422 = tpu.matmul %421, %420, %cst_157 {dimension_numbers = #tpu.dot_dimension_numbers<[1], [0], [0], [1], [0, 0, 1, 1], [], []>} : vector<2x32xbf16>, vector<32x128xbf16>, vector<2x128xf32> -> vector<2x128xf32>
    %423 = arith.addf %416, %422 : vector<2x128xf32>
    %424 = vector.extract_strided_slice %375 {offsets = [0, 7, 0], sizes = [2, 1, 32], strides = [1, 1, 1]} : vector<2x8x32xf32> to vector<2x1x32xf32>
    %425 = vector.shape_cast %424 : vector<2x1x32xf32> to vector<2x32xf32>
    %c7_158 = arith.constant 7 : index
    %c0_159 = arith.constant 0 : index
    %c0_160 = arith.constant 0 : index
    %426 = vector.load %arg6[%c7_158, %c0_159, %c0_160] : memref<8x32x128xbf16, #tpu.memory_space<vmem>>, vector<1x32x128xbf16>
    %427 = vector.shape_cast %426 : vector<1x32x128xbf16> to vector<32x128xbf16>
    %428 = arith.truncf %425 : vector<2x32xf32> to vector<2x32xbf16>
    %cst_161 = arith.constant dense<0.000000e+00> : vector<2x128xf32>
    %429 = tpu.matmul %428, %427, %cst_161 {dimension_numbers = #tpu.dot_dimension_numbers<[1], [0], [0], [1], [0, 0, 1, 1], [], []>} : vector<2x32xbf16>, vector<32x128xbf16>, vector<2x128xf32> -> vector<2x128xf32>
    %430 = arith.addf %423, %429 : vector<2x128xf32>
    %c5_162 = arith.constant 5 : index
    %c0_163 = arith.constant 0 : index
    %431 = vector.load %arg7[%c5_162, %c0_163] : memref<32x128xf32, #tpu.memory_space<vmem>>, vector<1x128xf32>
    %432 = vector.broadcast %431 : vector<1x128xf32> to vector<2x128xf32>
    %433 = arith.addf %430, %432 : vector<2x128xf32>
    %c0_164 = arith.constant 0 : index
    %c0_165 = arith.constant 0 : index
    %434 = vector.load %arg8[%c0_164, %c0_165] : memref<2x128xf32, #tpu.memory_space<vmem>>, vector<2x128xf32>
    tpu.vector_store %arg8[%c0_164, %c0_165], %433 {strides = array<i32>} : memref<2x128xf32, #tpu.memory_space<vmem>>, vector<2x128xf32>,
    return
  }
}

</mosaic_0001>

<bundles_post_ra>
// kernel: att_classifier_forward.1
= control target key start
LH: loop header
LB: loop body
LE: loop exit
PB: predicated region body
PF: predicated region fallthrough
CT: control target
= control target key end

     0   :  { %v9290_v1 = vmov 0.0   ;;  %vm63_vm0 = vcmask 1043456   ;;  %vm9291_vm1 = vmmov 0   ;;  %vm59_vm2 = vcmask 326656   ;;  %s11105_s0 = inlined_call_operand.vmem [shape: f32[16,40], index: 0, kind: input, shape index: {}]   ;;  %s11106_s1 = inlined_call_operand.vmem [shape: bf16[40,32], index: 1, kind: input, shape index: {}]   ;;  %s11107_s2 = inlined_call_operand.vmem [shape: bf16[1,32,384], index: 2, kind: input, shape index: {}]   ;;  %s11108_s3 = inlined_call_operand.vmem [shape: bf16[2,1,32,2048], index: 3, kind: input, shape index: {}]   ;;  %s11109_s4 = inlined_call_operand.vmem [shape: bf16[2,1,2048,32], index: 4, kind: input, shape index: {}]   ;;  %s11110_s5 = inlined_call_operand.vmem [shape: f32[2,1,1,2048], index: 5, kind: input, shape index: {}]   ;;  %s11111_s6 = inlined_call_operand.vmem [shape: bf16[8,32,128], index: 6, kind: input, shape index: {}]   ;;  %s11112_s7 = inlined_call_operand.vmem [shape: f32[32,128], index: 7, kind: input, shape index: {}]   ;;  %s11113_s8 = inlined_call_operand.hbm [shape: f32[2,128], index: 8, kind: output, shape index: {}]  }
   0x1   :  { %v8909_v0 = vld [vmem:[%s11106_s1] sm:$0xff]   ;;  %8633 = vmatprep.subr.bf16.mxu0 %v9290_v1  ;;  %8643 = vmatprep.subr.bf16.mxu1 %v9290_v1  ;;  %v8910_v2 = vld [vmem:[%s11106_s1 + $0x8] sm:$0xff]   ;;  %v8911_v3 = vld [vmem:[%s11106_s1 + $0x10] ss:$0 sps:$4 sm:$0xff]  }
   0x2   :  { %8634 = vmatpush3.bf16.msra.mxu0 %v8909_v0  ;;  %8639 = vmatprep.mubr.msk.bf16.mxu0 %vm9291_vm1, %v9290_v1  ;;  %v65_v4 = vsel %vm63_vm0, %v8911_v3, 0  ;;  %v31_v5 = vld [vmem:[%s11105_s0] sm:$0xff]  ;;  %v32_v6 = vld [vmem:[%s11105_s0 + $0x8] sm:$0xff] }
   0x3   :  { %8635 = vmatprep.subr.bf16.mxu0 %v9290_v1  ;;  %8647 = vmatprep.mubr.msk.bf16.mxu1 %vm9291_vm1, %v9290_v1  ;;  %v38_v7 = vpack.c.bf16 %v32_v6, %v31_v5  ;;  %v9375_v8 = vld [vmem:[%s11107_s2] ss:$12 sps:$4 sm:$0xff]   ;;  %v9382_v9 = vld [vmem:[%s11107_s2 + $0x18] ss:$12 sps:$4 sm:$0xff]  }
   0x4   :  { %8644 = vmatpush3.bf16.msra.mxu1 %v9375_v8 }
   0x5   :  { %8645 = vmatprep.subr.bf16.mxu1 %v9290_v1 }
   0x6   :  { %8636 = vmatpush3.bf16.msra.mxu0 %v8910_v2 }
   0x7   :  { %8637 = vmatprep.subr.bf16.mxu0 %v9290_v1 }
   0x8   :  { %8646 = vmatpush3.bf16.msra.mxu1 %v9382_v9 }
   0x9   :  { %8651 = vmatprep.subr.mxu1 %v9290_v1 }
   0xa   :  { %8638 = vmatpush3.bf16.msra.mxu0 %v65_v4 }
   0xb   :  { %8656 = vmatprep.subr.mxu0 %v9290_v1 }
   0xd   :  { %8640 = vmatmul.mubr.msk.bf16.vlgmr.msra.gmra.mrb[0].mxu0 %vm59_vm2, %v38_v7 }
   0xe   :  { %8658 = vmatprep.mubr.msk.f32.mxu0 %vm9291_vm1, %v9290_v1 }
   0xf   :  { %13 = vsyncpa [#allocation3], 0  ;;  %v7428_v10 = vld [vmem:[%s11112_s7] ss:$0 sm:$0xff]  ;;  %vm132_vm3 = vcmask 261120   ;;  %s9292_s21 = smov 96  }
  0x10   :  { %v7433_v20 = vld [vmem:[%s11112_s7 + $0x6] ss:$0 sm:$0xff]  ;;  %vm180_vm4 = vcmask 130048   ;;  %vm332_vm5 = vcmask 64512   ;;  %s9293_s22 = smov 64   ;;  %s9294_s23 = smov 80  }
  0x11   :  { %s9295_s24 = smov 112   ;;  %s9296_s25 = smov 48   ;;  %vm6901_vm6 = vcmask 1041409  }
  0x12   :  { %s9297_s26 = smov 32   ;;  %s9298_s27 = smov 16  }
  0xe0   :  { %v101_v11 = vpop.f32.mrb[0].mxu0 }
  0xe1   :  { %v102_v12 = vadd.f32 %v7428_v10, %v101_v11  ;;  %v8641_v13 = vpop.f32.mrb[1].mxu0 }
  0xe2   :  { %v104_v14 = vpop.f32.mrb[2].mxu0 }
  0xe3   :  { %v105_v15 = vadd.f32 %v7428_v10, %v104_v14  ;;  %v8642_v16 = vpop.f32.mrb[3].mxu0  ;;  %v9389_v17 = vmax.f32 %v102_v12, 0.0 }
  0xe5   :  { %v9391_v18 = vmax.f32 %v105_v15, 0.0 }
  0xe7   :  { %v9395_v19 = vpack.c.bf16 %v9391_v18, %v9389_v17 }
  0xe9   :  { %8648 = vmatmul.mubr.msk.bf16.vlgmr.msra.gmra.mrb[0].mxu1 %vm132_vm3, %v9395_v19 }
  0xea   :  { %8653 = vmatprep.mubr.msk.f32.mxu1 %vm9291_vm1, %v9290_v1 }
 0x1bc   :  { %v170_v21 = vpop.f32.mrb[0].mxu1 }
 0x1bd   :  { %v9404_v22 = vadd.f32 %v7433_v20, %v170_v21  ;;  %v8649_v23 = vpop.f32.mrb[1].mxu1 }
 0x1be   :  { %v173_v24 = vpop.f32.mrb[2].mxu1 }
 0x1bf   :  { %178 = vrot.lane.b32.xlu0 %v9404_v22, %s9292_s21  ;;  %v8650_v25 = vpop.f32.mrb[3].mxu1  ;;  %v9408_v26 = vadd.f32 %v7433_v20, %v173_v24 }
 0x1c3   :  { %256 = vrot.lane.b32.xlu0 %v9408_v26, %s9292_s21 }
 0x231   :  { %v179_v27 = vpop.permute.xlu0 %178 }
 0x232   :  { %8652 = vmatpush3.xpose.msk.msra.mxu1 %vm180_vm4, %v179_v27 }
 0x233   :  { %8661 = vmatprep.subr.mxu1 %v9290_v1 }
 0x235   :  { %8654 = vmatmul.mubr.msk.f32.vlgmr.msra.gmra.mrb[4].mxu1 %vm180_vm4, %v9404_v22  ;;  %v257_v28 = vpop.permute.xlu0 %256 }
 0x236   :  { %8657 = vmatpush3.xpose.msk.msra.mxu0 %vm180_vm4, %v257_v28  ;;  %8663 = vmatprep.mubr.msk.f32.mxu1 %vm9291_vm1, %v9290_v1 }
 0x237   :  { %8666 = vmatprep.subr.mxu0 %v9290_v1 }
 0x239   :  { %8659 = vmatmul.mubr.msk.f32.vlgmr.msra.gmra.mrb[4].mxu0 %vm180_vm4, %v9408_v26 }
 0x23a   :  { %8668 = vmatprep.mubr.msk.f32.mxu0 %vm9291_vm1, %v9290_v1 }
 0x308   :  { %v251_v29 = vpop.f32.mrb[4].mxu1 }
 0x309   :  { %v8655_v30 = vpop.f32.mrb[5].mxu1  ;;  %v333_v31 = vsel %vm332_vm5, %v251_v29, -inf }
 0x30a   :  { %334 = vmax.xlane.f32.xlu1 %v333_v31 }
 0x30c   :  { %v328_v32 = vpop.f32.mrb[4].mxu0 }
 0x30d   :  { %v8660_v33 = vpop.f32.mrb[5].mxu0  ;;  %v336_v34 = vsel %vm332_vm5, %v328_v32, -inf }
 0x30e   :  { %337 = vmax.xlane.f32.xlu1 %v336_v34 }
 0x31f   :  { %355 = vrot.lane.b32.xlu1 %v9404_v22, %s9293_s22 }
 0x323   :  { %431 = vrot.lane.b32.xlu1 %v9408_v26, %s9293_s22 }
 0x327   :  { %509 = vrot.lane.b32.xlu1 %v9404_v22, %s9294_s23 }
 0x32b   :  { %587 = vrot.lane.b32.xlu1 %v9408_v26, %s9294_s23 }
 0x397   :  { %v335_v35 = vpop.xlane.xlu1 %334 }
 0x398   :  { %v339_v36 = vsub.f32 %v251_v29, %v335_v35 }
 0x39a   :  { %v341_v37 = vmul.f32 1.442695, %v339_v36 }
 0x39b   :  { %v338_v38 = vpop.xlane.xlu1 %337 }
 0x39c   :  { %9190 = vpow2.f32 %v341_v37  ;;  %v340_v39 = vsub.f32 %v328_v32, %v338_v38  ;;  %v7449_v38 = vld [vmem:[%s11112_s7 + $0x7] ss:$0 sm:$0xff] }
 0x39e   :  { %v343_v40 = vmul.f32 1.442695, %v340_v39 }
 0x39f   :  { %v356_v41 = vpop.permute.xlu1 %355 }
 0x3a0   :  { %9192 = vpow2.f32 %v343_v40  ;;  %8662 = vmatpush3.msra.mxu1 %v356_v41 }
 0x3a1   :  { %8671 = vmatprep.subr.mxu1 %v9290_v1 }
 0x3a3   :  { %v432_v42 = vpop.permute.xlu1 %431 }
 0x3a4   :  { %8667 = vmatpush3.msra.mxu0 %v432_v42 }
 0x3a5   :  { %8676 = vmatprep.subr.mxu0 %v9290_v1 }
 0x3a6   :  { %v9191_v43 = vpop.eup %9190 }
 0x3a7   :  { %v345_v44 = vsel %vm332_vm5, %v9191_v43, 0.0  ;;  %v510_v47 = vpop.permute.xlu1 %509 }
 0x3a8   :  { %346 = vadd.xlane.f32.xlu0 %v345_v44 }
 0x3aa   :  { %v9193_v45 = vpop.eup %9192 }
 0x3ab   :  { %v348_v46 = vsel %vm332_vm5, %v9193_v45, 0.0  ;;  %v588_v48 = vpop.permute.xlu1 %587 }
 0x3ac   :  { %349 = vadd.xlane.f32.xlu1 %v348_v46 }
 0x3bd   :  { %585 = vrot.lane.b32.xlu1 %v9408_v26, %s9295_s24 }
 0x3be   :  { %507 = vrot.lane.b32.xlu0 %v9404_v22, %s9295_s24 }
 0x435   :  { %v347_v49 = vpop.xlane.xlu0 %346 }
 0x436   :  { %9194 = vrcp.f32 %v347_v49 }
 0x439   :  { %v350_v50 = vpop.xlane.xlu1 %349  ;;  %v508_v55 = vpop.permute.xlu0 %507 }
 0x43a   :  { %9196 = vrcp.f32 %v350_v50 }
 0x43d   :  { %v586_v56 = vpop.permute.xlu1 %585 }
 0x440   :  { %v9195_v51 = vpop.eup %9194 }
 0x441   :  { %v353_v52 = vmul.f32 %v9195_v51, %v9191_v43 }
 0x443   :  { %8664 = vmatmul.mubr.msk.f32.vlgmr.msra.gmra.mrb[6].mxu1 %vm332_vm5, %v353_v52 }
 0x444   :  { %v9197_v53 = vpop.eup %9196  ;;  %8672 = vmatpush3.xpose.msk.msra.mxu1 %vm180_vm4, %v510_v47  ;;  %8673 = vmatprep.mubr.msk.f32.mxu1 %vm9291_vm1, %v9290_v1 }
 0x445   :  { %v354_v54 = vmul.f32 %v9197_v53, %v9193_v45  ;;  %8681 = vmatprep.subr.mxu1 %v9290_v1 }
 0x447   :  { %8669 = vmatmul.mubr.msk.f32.vlgmr.msra.gmra.mrb[6].mxu0 %vm332_vm5, %v354_v54  ;;  %8674 = vmatmul.mubr.msk.f32.vlgmr.msra.gmra.mrb[8].mxu1 %vm180_vm4, %v508_v55 }
 0x448   :  { %8677 = vmatpush3.xpose.msk.msra.mxu0 %vm180_vm4, %v588_v48  ;;  %8678 = vmatprep.mubr.msk.f32.mxu0 %vm9291_vm1, %v9290_v1 }
 0x449   :  { %8686 = vmatprep.subr.mxu0 %v9290_v1  ;;  %8683 = vmatprep.mubr.msk.f32.mxu1 %vm9291_vm1, %v9290_v1 }
 0x44b   :  { %8679 = vmatmul.mubr.msk.f32.vlgmr.msra.gmra.mrb[8].mxu0 %vm180_vm4, %v586_v56 }
 0x44c   :  { %8688 = vmatprep.mubr.msk.f32.mxu0 %vm9291_vm1, %v9290_v1 }
 0x516   :  { %v9458_v57 = vpop.f32.mrb[6].mxu1 }
 0x517   :  { %v8665_v58 = vpop.f32.mrb[7].mxu1 }
 0x51a   :  { %v503_v59 = vpop.f32.mrb[6].mxu0  ;;  %v581_v60 = vpop.f32.mrb[8].mxu1 }
 0x51b   :  { %v8670_v61 = vpop.f32.mrb[7].mxu0  ;;  %v8675_v62 = vpop.f32.mrb[9].mxu1  ;;  %v663_v63 = vsel %vm332_vm5, %v581_v60, -inf }
 0x51c   :  { %664 = vmax.xlane.f32.xlu1 %v663_v63  ;;  %v947_v61 = vld [vmem:[%s11108_s3 + $0x8] sm:$0xff] }
 0x51d   :  { %v955_v63 = vld [vmem:[%s11108_s3 + $0x48] sm:$0xff] }
 0x51e   :  { %v659_v0 = vpop.f32.mrb[8].mxu0 }
 0x51f   :  { %v8680_v2 = vpop.f32.mrb[9].mxu0  ;;  %v666_v3 = vsel %vm332_vm5, %v659_v0, -inf }
 0x520   :  { %667 = vmax.xlane.f32.xlu0 %v666_v3  ;;  %v7455_v2 = vcombine.low %v947_v61, %v955_v63  ;;  %v7456_v3 = vcombine.high %v947_v61, %v955_v63  ;;  %v952_v63 = vld [vmem:[%s11108_s3 + $0x30] sm:$0xff] }
 0x536   :  { %761 = vrot.lane.b32.xlu0 %v9408_v26, %s9296_s25 }
 0x53a   :  { %855 = vrot.lane.b32.xlu0 %v9382_v9, %s9297_s26 }
 0x5a9   :  { %v665_v4 = vpop.xlane.xlu1 %664 }
 0x5aa   :  { %v669_v5 = vsub.f32 %v581_v60, %v665_v4  ;;  %v954_v60 = vld [vmem:[%s11108_s3 + $0x40] sm:$0xff] }
 0x5ab   :  { %v962_v4 = vld [vmem:[%s11108_s3 + $0x80] sm:$0xff] }
 0x5ac   :  { %v671_v6 = vmul.f32 1.442695, %v669_v5  ;;  %v970_v5 = vld [vmem:[%s11108_s3 + $0xc0] sm:$0xff] }
 0x5ad   :  { %v668_v7 = vpop.xlane.xlu0 %667 }
 0x5ae   :  { %9198 = vpow2.f32 %v671_v6  ;;  %v670_v10 = vsub.f32 %v659_v0, %v668_v7  ;;  %v963_v6 = vld [vmem:[%s11108_s3 + $0x88] sm:$0xff]  ;;  %v7470_v7 = vcombine.high %v962_v4, %v970_v5 }
 0x5b0   :  { %v673_v11 = vmul.f32 1.442695, %v670_v10  ;;  %v971_v10 = vld [vmem:[%s11108_s3 + $0xc8] sm:$0xff] }
 0x5b1   :  { %v762_v12 = vpop.permute.xlu0 %761 }
 0x5b2   :  { %9200 = vpow2.f32 %v673_v11  ;;  %8687 = vmatpush3.msra.mxu0 %v762_v12  ;;  %v7469_v11 = vcombine.low %v962_v4, %v970_v5  ;;  %v7471_v12 = vcombine.low %v963_v6, %v971_v10 }
 0x5b5   :  { %v856_v28 = vpop.permute.xlu0 %855 }
 0x5b8   :  { %v9199_v13 = vpop.eup %9198 }
 0x5b9   :  { %v675_v14 = vsel %vm332_vm5, %v9199_v13, 0.0 }
 0x5ba   :  { %676 = vadd.xlane.f32.xlu1 %v675_v14  ;;  %v948_v14 = vld [vmem:[%s11108_s3 + $0x10] sm:$0xff] }
 0x5bc   :  { %v9201_v15 = vpop.eup %9200 }
 0x5bd   :  { %v678_v16 = vsel %vm332_vm5, %v9201_v15, 0.0 }
 0x5be   :  { %679 = vadd.xlane.f32.xlu1 %v678_v16  ;;  %v949_v16 = vld [vmem:[%s11108_s3 + $0x18] sm:$0xff] }
 0x5cf   :  { %685 = vrot.lane.b32.xlu1 %v9404_v22, %s9296_s25 }
 0x5d3   :  { %853 = vrot.lane.b32.xlu1 %v9375_v8, %s9297_s26 }
 0x647   :  { %v677_v20 = vpop.xlane.xlu1 %676 }
 0x648   :  { %9202 = vrcp.f32 %v677_v20  ;;  %v9299_v20 = vmov 0  }
 0x64b   :  { %v680_v21 = vpop.xlane.xlu1 %679 }
 0x64c   :  { %9204 = vrcp.f32 %v680_v21 }
 0x64f   :  { %v686_v23 = vpop.permute.xlu1 %685 }
 0x650   :  { %8682 = vmatpush3.msra.mxu1 %v686_v23  ;;  %v957_v23 = vld [vmem:[%s11108_s3 + $0x58] sm:$0xff] }
 0x651   :  { %8691 = vmatprep.subr.bf16.mxu1 %v9290_v1 }
 0x652   :  { %v9203_v24 = vpop.eup %9202 }
 0x653   :  { %v683_v25 = vmul.f32 %v9203_v24, %v9199_v13  ;;  %v854_v22 = vpop.permute.xlu1 %853  ;;  %v7472_v13 = vcombine.high %v963_v6, %v971_v10  ;;  %v968_v10 = vld [vmem:[%s11108_s3 + $0xb0] sm:$0xff] }
 0x655   :  { %8684 = vmatmul.mubr.msk.f32.vlgmr.msra.gmra.mrb[10].mxu1 %vm332_vm5, %v683_v25  ;;  %v7459_v25 = vcombine.low %v949_v16, %v957_v23 }
 0x656   :  { %v9205_v26 = vpop.eup %9204  ;;  %8695 = vmatprep.mubr.msk.bf16.mxu1 %vm9291_vm1, %v9290_v1  ;;  %8692 = vmatpush3.bf16.msra.mxu1 %v854_v22 }
 0x657   :  { %v684_v27 = vmul.f32 %v9205_v26, %v9201_v15  ;;  %8693 = vmatprep.subr.bf16.mxu1 %v9290_v1  ;;  %v956_v15 = vld [vmem:[%s11108_s3 + $0x50] sm:$0xff]  ;;  %v7460_v26 = vcombine.high %v949_v16, %v957_v23 }
 0x658   :  { %v7458_v21 = vcombine.high %v948_v14, %v956_v15  ;;  %v7457_v24 = vcombine.low %v948_v14, %v956_v15 }
 0x659   :  { %8689 = vmatmul.mubr.msk.f32.vlgmr.msra.gmra.mrb[10].mxu0 %vm332_vm5, %v684_v27 }
 0x65a   :  { %8694 = vmatpush3.bf16.msra.mxu1 %v856_v28  ;;  %1258 = vmatprep.mubr.bf16.mxu0 %v9299_v20 }
 0x65b   :  { %1269 = vmatprep.subr.bf16.mxu1 %v7456_v3  ;;  %v961_v3 = vld [vmem:[%s11108_s3 + $0x78] sm:$0xff] }
 0x728   :  { %v757_v29 = vpop.f32.mrb[10].mxu1 }
 0x729   :  { %v8685_v30 = vpop.f32.mrb[11].mxu1 }
 0x72c   :  { %v833_v31 = vpop.f32.mrb[10].mxu0 }
 0x72d   :  { %v8894_v32 = vpack.i.bf16 %v833_v31, %v757_v29  ;;  %v8690_v33 = vpop.f32.mrb[11].mxu0 }
 0x72e   :  { %v7451_v33 = vld [vmem:[%s11112_s7 + $0x9] ss:$0 sm:$0xff] }
 0x72f   :  { %8895 = vrot.lane.b32.xlu1 %v8894_v32, %s9298_s27 }
 0x7a1   :  { %v8896_v34 = vpop.permute.xlu1 %8895 }
 0x7a2   :  { %v8898_v35 = vunpack.i.h.bf16 %v8896_v34  ;;  %v8897_v8 = vunpack.i.l.bf16 %v8896_v34 }
 0x7a4   :  { %v846_v36 = vsel %vm180_vm4, %v503_v59, %v8898_v35  ;;  %v845_v9 = vsel %vm180_vm4, %v9458_v57, %v8897_v8  ;;  %v946_v59 = vld [vmem:[%s11108_s3] sm:$0xff] }
 0x7a5   :  { %v847_v37 = vpack.c.bf16 %v846_v36, %v845_v9  ;;  %v7454_v62 = vcombine.high %v946_v59, %v954_v60  ;;  %v7453_v0 = vcombine.low %v946_v59, %v954_v60  ;;  %v7452_v9 = vld [vmem:[%s11112_s7 + $0xa] ss:$0 sm:$0xff] }
 0x7a7   :  { %8696 = vmatmul.mubr.msk.bf16.vlgmr.msra.gmra.mrb[12].mxu1 %vm132_vm3, %v847_v37  ;;  %1226 = vmatprep.subr.bf16.mxu0 %v7454_v62 }
 0x7a8   :  { %1227 = vmatpush1.bf16.msra.mxu0 %v7453_v0  ;;  %1270 = vmatpush1.bf16.msra.mxu1 %v7455_v2  ;;  %v960_v0 = vld [vmem:[%s11108_s3 + $0x70] sm:$0xff]  ;;  %v953_v2 = vld [vmem:[%s11108_s3 + $0x38] sm:$0xff] }
 0x7a9   :  { %1228 = vmatprep.subr.bf16.mxu0 %v7470_v7  ;;  %1271 = vmatprep.subr.bf16.mxu1 %v7472_v13  ;;  %v7466_v6 = vcombine.high %v952_v63, %v960_v0  ;;  %v7468_v7 = vcombine.high %v953_v2, %v961_v3  ;;  %v977_v13 = vld [vmem:[%s11108_s3 + $0xf8] sm:$0xff]  ;;  %v7465_v14 = vcombine.low %v952_v63, %v960_v0 }
 0x7aa   :  { %1301 = vmatprep.mubr.bf16.mxu1 %v9299_v20  ;;  %v7467_v15 = vcombine.low %v953_v2, %v961_v3 }
 0x7ac   :  { %1229 = vmatpush1.bf16.msra.mxu0 %v7469_v11  ;;  %1272 = vmatpush1.bf16.msra.mxu1 %v7471_v12  ;;  %v976_v11 = vld [vmem:[%s11108_s3 + $0xf0] sm:$0xff]  ;;  %v969_v12 = vld [vmem:[%s11108_s3 + $0xb8] sm:$0xff] }
 0x7ad   :  { %1312 = vmatprep.subr.bf16.mxu0 %v7458_v21  ;;  %1355 = vmatprep.subr.bf16.mxu1 %v7460_v26  ;;  %v7482_v16 = vcombine.high %v968_v10, %v976_v11  ;;  %v7484_v21 = vcombine.high %v969_v12, %v977_v13  ;;  %v7481_v23 = vcombine.low %v968_v10, %v976_v11  ;;  %v8915_v26 = vld [vmem:[%s11109_s4 + $0xc0] sm:$0xff]  }
 0x87a   :  { %v896_v39 = vpop.f32.mrb[12].mxu1 }
 0x87b   :  { %v897_v40 = vadd.f32 %v7449_v38, %v896_v39  ;;  %v8697_v41 = vpop.f32.mrb[13].mxu1  ;;  %v972_v39 = vld [vmem:[%s11108_s3 + $0xd0] sm:$0xff] }
 0x87c   :  { %v899_v42 = vpop.f32.mrb[14].mxu1  ;;  %v973_v41 = vld [vmem:[%s11108_s3 + $0xd8] sm:$0xff] }
 0x87d   :  { %v900_v43 = vadd.f32 %v7449_v38, %v899_v42  ;;  %v8698_v44 = vpop.f32.mrb[15].mxu1  ;;  %v903_v45 = vadd.f32 %v897_v40, %v9389_v17  ;;  %v964_v38 = vld [vmem:[%s11108_s3 + $0x90] sm:$0xff]  ;;  %v965_v40 = vld [vmem:[%s11108_s3 + $0x98] sm:$0xff] }
 0x87f   :  { %v907_v46 = vsel %vm132_vm3, %v903_v45, 0.0  ;;  %v904_v47 = vadd.f32 %v900_v43, %v9391_v18 }
 0x880   :  { %908 = vadd.xlane.f32.xlu1 %v907_v46  ;;  %v7476_v46 = vcombine.high %v965_v40, %v973_v41 }
 0x881   :  { %v910_v48 = vsel %vm132_vm3, %v904_v47, 0.0 }
 0x882   :  { %911 = vadd.xlane.f32.xlu0 %v910_v48  ;;  %v958_v48 = vld [vmem:[%s11108_s3 + $0x60] sm:$0xff] }
 0x90d   :  { %v909_v49 = vpop.xlane.xlu1 %908 }
 0x90e   :  { %v914_v50 = vmul.f32 0.03125, %v909_v49  ;;  %v951_v49 = vld [vmem:[%s11108_s3 + $0x28] sm:$0xff] }
 0x90f   :  { %v912_v51 = vpop.xlane.xlu0 %911 }
 0x910   :  { %v916_v52 = vsub.f32 %v903_v45, %v914_v50  ;;  %v915_v53 = vmul.f32 0.03125, %v912_v51  ;;  %v7474_v45 = vcombine.high %v964_v38, %v972_v39  ;;  %v959_v50 = vld [vmem:[%s11108_s3 + $0x68] sm:$0xff]  ;;  %v7473_v51 = vcombine.low %v964_v38, %v972_v39  ;;  %v8930_v38 = vld [vmem:[%s11109_s4 + $0x60] sm:$0xff]  }
 0x911   :  { %v7463_v60 = vcombine.low %v951_v49, %v959_v50  ;;  %v8931_v39 = vld [vmem:[%s11109_s4 + $0xe0] sm:$0xff]  }
 0x912   :  { %v917_v54 = vsub.f32 %v904_v47, %v915_v53  ;;  %v918_v55 = vmul.f32 %v916_v52, %v916_v52  ;;  %v950_v47 = vld [vmem:[%s11108_s3 + $0x20] sm:$0xff] }
 0x913   :  { %v7462_v53 = vcombine.high %v950_v47, %v958_v48  ;;  %v7461_v59 = vcombine.low %v950_v47, %v958_v48  ;;  %v8937_v47 = vld [vmem:[%s11109_s4 + $0xa8] sm:$0xff]   ;;  %v8938_v48 = vld [vmem:[%s11109_s4 + $0x70] sm:$0xff]  }
 0x914   :  { %v920_v56 = vsel %vm132_vm3, %v918_v55, 0.0  ;;  %v919_v57 = vmul.f32 %v917_v54, %v917_v54  ;;  %v966_v55 = vld [vmem:[%s11108_s3 + $0xa0] sm:$0xff] }
 0x915   :  { %921 = vadd.xlane.f32.xlu0 %v920_v56  ;;  %v974_v56 = vld [vmem:[%s11108_s3 + $0xe0] sm:$0xff] }
 0x916   :  { %v923_v58 = vsel %vm132_vm3, %v919_v57, 0.0  ;;  %v967_v57 = vld [vmem:[%s11108_s3 + $0xa8] sm:$0xff]  ;;  %v7478_v61 = vcombine.high %v966_v55, %v974_v56  ;;  %v7477_v4 = vcombine.low %v966_v55, %v974_v56  ;;  %v8945_v55 = vld [vmem:[%s11109_s4 + $0xb8] sm:$0xff]   ;;  %v8946_v56 = vld [vmem:[%s11109_s4 + $0x140] sm:$0xff]  }
 0x917   :  { %924 = vadd.xlane.f32.xlu1 %v923_v58  ;;  %v975_v58 = vld [vmem:[%s11108_s3 + $0xe8] sm:$0xff] }
 0x918   :  { %v7480_v62 = vcombine.high %v967_v57, %v975_v58  ;;  %v7479_v5 = vcombine.low %v967_v57, %v975_v58  ;;  %v8947_v57 = vld [vmem:[%s11109_s4 + $0x1c0] sm:$0xff]   ;;  %v983_v58 = vlaneseq }
 0x9a2   :  { %v922_v27 = vpop.xlane.xlu0 %921 }
 0x9a3   :  { %v926_v22 = vmul.f32 0.03125, %v922_v27  ;;  %v8916_v27 = vld [vmem:[%s11109_s4] sm:$0xff]  }
 0x9a4   :  { %v925_v28 = vpop.xlane.xlu1 %924 }
 0x9a5   :  { %v928_v29 = vadd.f32 1e-05, %v926_v22  ;;  %v927_v30 = vmul.f32 0.03125, %v925_v28  ;;  %v8917_v22 = vld [vmem:[%s11109_s4 + $0x80] sm:$0xff]   ;;  %v8918_v28 = vld [vmem:[%s11109_s4 + $0x48] sm:$0xff]  }
 0x9a7   :  { %9206 = vrsqrt.f32 %v928_v29  ;;  %v929_v31 = vadd.f32 1e-05, %v927_v30  ;;  %v8919_v29 = vld [vmem:[%s11109_s4 + $0xc8] sm:$0xff]  }
 0x9a8   :  { %v8920_v30 = vld [vmem:[%s11109_s4 + $0x8] sm:$0xff]  }
 0x9a9   :  { %9208 = vrsqrt.f32 %v929_v31  ;;  %v8921_v31 = vld [vmem:[%s11109_s4 + $0x88] sm:$0xff]  }
 0x9b1   :  { %v9207_v32 = vpop.eup %9206 }
 0x9b2   :  { %v932_v34 = vmul.f32 %v9207_v32, %v916_v52  ;;  %v7475_v52 = vcombine.low %v965_v40, %v973_v41  ;;  %v8922_v32 = vld [vmem:[%s11109_s4 + $0x50] sm:$0xff]   ;;  %v8932_v40 = vld [vmem:[%s11109_s4 + $0x20] sm:$0xff]  }
 0x9b3   :  { %v9209_v35 = vpop.eup %9208  ;;  %v8933_v41 = vld [vmem:[%s11109_s4 + $0xa0] sm:$0xff]  }
 0x9b4   :  { %v938_v8 = vmul.f32 %v7451_v33, %v932_v34  ;;  %v933_v36 = vmul.f32 %v9209_v35, %v917_v54  ;;  %v7464_v54 = vcombine.high %v951_v49, %v959_v50  ;;  %v8924_v34 = vld [vmem:[%s11109_s4 + $0x10] sm:$0xff]  }
 0x9b5   :  { %v8925_v35 = vld [vmem:[%s11109_s4 + $0x90] sm:$0xff]  }
 0x9b6   :  { %v939_v37 = vmul.f32 %v7451_v33, %v933_v36  ;;  %v9548_v42 = vadd.f32 %v7452_v9, %v938_v8  ;;  %v8923_v33 = vld [vmem:[%s11109_s4 + $0xd0] sm:$0xff]   ;;  %v8926_v8 = vld [vmem:[%s11109_s4 + $0x58] sm:$0xff]  }
 0x9b7   :  { %v8927_v36 = vld [vmem:[%s11109_s4 + $0xd8] sm:$0xff]   ;;  %v8939_v49 = vld [vmem:[%s11109_s4 + $0xf0] sm:$0xff]  }
 0x9b8   :  { %v9550_v43 = vadd.f32 %v7452_v9, %v939_v37  ;;  %v8928_v9 = vld [vmem:[%s11109_s4 + $0x18] sm:$0xff]   ;;  %v8940_v50 = vld [vmem:[%s11109_s4 + $0x30] sm:$0xff]  }
 0x9b9   :  { %v8929_v37 = vld [vmem:[%s11109_s4 + $0x98] sm:$0xff]  }
 0x9ba   :  { %v9554_v44 = vpack.c.bf16 %v9550_v43, %v9548_v42 }
 0x9bc   :  { %7485 = vmatmul.mubr.msk.bf16.vlgmr.msra.gmra.mrb[12].mxu0 %vm132_vm3, %v9554_v44  ;;  %7486 = vmatmul.mubr.msk.bf16.vlgmr.msra.gmra.mrb[16].mxu1 %vm132_vm3, %v9554_v44 }
 0x9bd   :  { %1313 = vmatpush1.bf16.msra.mxu0 %v7457_v24  ;;  %1356 = vmatpush1.bf16.msra.mxu1 %v7459_v25  ;;  %v7483_v24 = vcombine.low %v969_v12, %v977_v13  ;;  %v8914_v25 = vld [vmem:[%s11109_s4 + $0x40] sm:$0xff]  }
 0x9be   :  { %1314 = vmatprep.subr.bf16.mxu0 %v7474_v45  ;;  %1357 = vmatprep.subr.bf16.mxu1 %v7476_v46  ;;  %v8935_v45 = vld [vmem:[%s11109_s4 + $0xe8] sm:$0xff]  }
 0x9bf   :  { %1344 = vmatprep.mubr.bf16.mxu0 %v9299_v20  ;;  %1387 = vmatprep.mubr.bf16.mxu1 %v9299_v20  ;;  %v8936_v46 = vld [vmem:[%s11109_s4 + $0x28] sm:$0xff]  }
 0x9c1   :  { %1315 = vmatpush1.bf16.msra.mxu0 %v7473_v51  ;;  %1358 = vmatpush1.bf16.msra.mxu1 %v7475_v52  ;;  %v8941_v51 = vld [vmem:[%s11109_s4 + $0xb0] sm:$0xff]   ;;  %v8942_v52 = vld [vmem:[%s11109_s4 + $0x78] sm:$0xff]  }
 0x9c2   :  { %1398 = vmatprep.subr.bf16.mxu0 %v7462_v53  ;;  %1441 = vmatprep.subr.bf16.mxu1 %v7464_v54  ;;  %v8943_v53 = vld [vmem:[%s11109_s4 + $0xf8] sm:$0xff]  }
 0x9c3   :  { %v8944_v54 = vld [vmem:[%s11109_s4 + $0x38] sm:$0xff]  }
 0x9c4   :  { %7487 = vmatmul.mubr.msk.bf16.vlgmr.msra.gmra.mrb[16].mxu0 %vm132_vm3, %v9554_v44  ;;  %7488 = vmatmul.mubr.msk.bf16.vlgmr.msra.gmra.mrb[20].mxu1 %vm132_vm3, %v9554_v44 }
 0x9c5   :  { %1399 = vmatpush1.bf16.msra.mxu0 %v7461_v59  ;;  %1442 = vmatpush1.bf16.msra.mxu1 %v7463_v60  ;;  %v984_v59 = vshrl.u32 %v983_v58, 7  ;;  %v8951_v58 = vld [vmem:[%s11109_s4 + $0x1c8] sm:$0xff]  }
 0x9c6   :  { %1400 = vmatprep.subr.bf16.mxu0 %v7478_v61  ;;  %1443 = vmatprep.subr.bf16.mxu1 %v7480_v62  ;;  %v979_v62 = vld [vmem:[%s11110_s5] sm:$0xff] }
 0x9c7   :  { %1430 = vmatprep.mubr.bf16.mxu0 %v9299_v20  ;;  %1473 = vmatprep.mubr.bf16.mxu1 %v9299_v20  ;;  %v9728_v60 = vsub.s32 0, %v984_v59  ;;  %v9730_v61 = vsub.s32 2, %v984_v59  ;;  %v9735_v63 = vsub.s32 1, %v984_v59  ;;  %v9737_v0 = vsub.s32 3, %v984_v59 }
 0x9c8   :  { %v9747_v12 = vsub.s32 5, %v984_v59  ;;  %v9749_v13 = vsub.s32 7, %v984_v59 }
 0x9c9   :  { %1401 = vmatpush1.bf16.msra.mxu0 %v7477_v4  ;;  %1444 = vmatpush1.bf16.msra.mxu1 %v7479_v5  ;;  %v986_v2 = vrot.slane %v979_v62, %v9728_v60  ;;  %v994_v3 = vrot.slane %v979_v62, %v9730_v61  ;;  %v990_v4 = vrot.slane %v979_v62, %v9735_v63 }
 0x9ca   :  { %1484 = vmatprep.subr.bf16.mxu0 %v7466_v6  ;;  %1527 = vmatprep.subr.bf16.mxu1 %v7468_v7  ;;  %v998_v5 = vrot.slane %v979_v62, %v9737_v0  ;;  %v9743_v6 = vsub.s32 4, %v984_v59  ;;  %v9745_v7 = vsub.s32 6, %v984_v59 }
 0x9cc   :  { %7489 = vmatmul.mubr.msk.bf16.vlgmr.msra.gmra.mrb[20].mxu0 %vm132_vm3, %v9554_v44  ;;  %7490 = vmatmul.mubr.msk.bf16.vlgmr.msra.gmra.mrb[24].mxu1 %vm132_vm3, %v9554_v44 }
 0x9cd   :  { %1485 = vmatpush1.bf16.msra.mxu0 %v7465_v14  ;;  %1528 = vmatpush1.bf16.msra.mxu1 %v7467_v15 }
 0x9ce   :  { %1486 = vmatprep.subr.bf16.mxu0 %v7482_v16  ;;  %1529 = vmatprep.subr.bf16.mxu1 %v7484_v21 }
 0x9cf   :  { %1516 = vmatprep.mubr.bf16.mxu0 %v9299_v20  ;;  %1559 = vmatprep.mubr.bf16.mxu1 %v9299_v20 }
 0x9d1   :  { %1487 = vmatpush1.bf16.msra.mxu0 %v7481_v23  ;;  %1530 = vmatpush1.bf16.msra.mxu1 %v7483_v24 }
 0x9d2   :  { %8210 = vmatprep.subr.bf16.mxu0 %v8914_v25  ;;  %8232 = vmatprep.subr.bf16.mxu1 %v8915_v26 }
 0x9d4   :  { %7491 = vmatmul.mubr.msk.bf16.vlgmr.msra.gmra.mrb[24].mxu0 %vm132_vm3, %v9554_v44  ;;  %7492 = vmatmul.mubr.msk.bf16.vlgmr.msra.gmra.mrb[28].mxu1 %vm132_vm3, %v9554_v44  ;;  %v8934_v44 = vld [vmem:[%s11109_s4 + $0x68] sm:$0xff]  }
 0x9d5   :  { %8211 = vmatpush3.bf16.msra.mxu0 %v8916_v27  ;;  %8233 = vmatpush3.bf16.msra.mxu1 %v8917_v22 }
 0x9d6   :  { %8212 = vmatprep.subr.bf16.mxu0 %v8918_v28  ;;  %8234 = vmatprep.subr.bf16.mxu1 %v8919_v29 }
 0x9d9   :  { %8213 = vmatpush3.bf16.msra.mxu0 %v8920_v30  ;;  %8235 = vmatpush3.bf16.msra.mxu1 %v8921_v31  ;;  %v1002_v30 = vrot.slane %v979_v62, %v9743_v6  ;;  %v1010_v31 = vrot.slane %v979_v62, %v9745_v7 }
 0x9da   :  { %8214 = vmatprep.subr.bf16.mxu0 %v8922_v32  ;;  %8236 = vmatprep.subr.bf16.mxu1 %v8923_v33 }
 0x9dd   :  { %8215 = vmatpush3.bf16.msra.mxu0 %v8924_v34  ;;  %8237 = vmatpush3.bf16.msra.mxu1 %v8925_v35  ;;  %v1006_v34 = vrot.slane %v979_v62, %v9747_v12  ;;  %v1014_v35 = vrot.slane %v979_v62, %v9749_v13 }
 0x9de   :  { %8216 = vmatprep.subr.bf16.mxu0 %v8926_v8  ;;  %8238 = vmatprep.subr.bf16.mxu1 %v8927_v36 }
 0x9e1   :  { %8217 = vmatpush3.bf16.msra.mxu0 %v8928_v9  ;;  %8239 = vmatpush3.bf16.msra.mxu1 %v8929_v37 }
 0x9e2   :  { %8218 = vmatprep.subr.bf16.mxu0 %v8930_v38  ;;  %8240 = vmatprep.subr.bf16.mxu1 %v8931_v39 }
 0x9e5   :  { %8219 = vmatpush3.bf16.msra.mxu0 %v8932_v40  ;;  %8241 = vmatpush3.bf16.msra.mxu1 %v8933_v41 }
 0x9e6   :  { %8220 = vmatprep.subr.bf16.mxu0 %v8934_v44  ;;  %8242 = vmatprep.subr.bf16.mxu1 %v8935_v45  ;;  %v9758_v44 = vld [vmem:[%s11110_s5 + $0x8] sm:$0xff] }
 0x9e7   :  { %v1018_v59 = vrot.slane %v9758_v44, %v9728_v60 }
 0x9e9   :  { %8221 = vmatpush3.bf16.msra.mxu0 %v8936_v46  ;;  %8243 = vmatpush3.bf16.msra.mxu1 %v8937_v47 }
 0x9ea   :  { %8222 = vmatprep.subr.bf16.mxu0 %v8938_v48  ;;  %8244 = vmatprep.subr.bf16.mxu1 %v8939_v49 }
 0x9ed   :  { %8223 = vmatpush3.bf16.msra.mxu0 %v8940_v50  ;;  %8245 = vmatpush3.bf16.msra.mxu1 %v8941_v51  ;;  %v8948_v51 = vld [vmem:[%s11109_s4 + $0x100] sm:$0xff]  }
 0x9ee   :  { %8224 = vmatprep.subr.bf16.mxu0 %v8942_v52  ;;  %8246 = vmatprep.subr.bf16.mxu1 %v8943_v53  ;;  %v8949_v52 = vld [vmem:[%s11109_s4 + $0x180] sm:$0xff]  }
 0x9f1   :  { %8225 = vmatpush3.bf16.msra.mxu0 %v8944_v54  ;;  %8247 = vmatpush3.bf16.msra.mxu1 %v8945_v55 }
 0x9f2   :  { %8254 = vmatprep.subr.bf16.mxu0 %v8946_v56  ;;  %8276 = vmatprep.subr.bf16.mxu1 %v8947_v57  ;;  %v8950_v57 = vld [vmem:[%s11109_s4 + $0x148] sm:$0xff]  }
 0xa8f   :  { %v1260_v10 = vpop.f32.mrb[12].mxu0  ;;  %v1303_v11 = vpop.f32.mrb[16].mxu1 }
 0xa90   :  { %v1261_v14 = vadd.f32 %v1260_v10, %v986_v2  ;;  %v1304_v15 = vadd.f32 %v1303_v11, %v994_v3  ;;  %v1262_v16 = vpop.f32.mrb[13].mxu0  ;;  %v1305_v21 = vpop.f32.mrb[17].mxu1 }
 0xa91   :  { %v1263_v23 = vadd.f32 %v1262_v16, %v990_v4  ;;  %v1306_v24 = vadd.f32 %v1305_v21, %v998_v5  ;;  %v1264_v25 = vpop.f32.mrb[14].mxu0  ;;  %v1307_v26 = vpop.f32.mrb[18].mxu1  ;;  %v1022_v16 = vrot.slane %v9758_v44, %v9735_v63 }
 0xa92   :  { %v1265_v27 = vadd.f32 %v1264_v25, %v986_v2  ;;  %v1308_v22 = vadd.f32 %v1307_v26, %v994_v3  ;;  %v1266_v28 = vpop.f32.mrb[15].mxu0  ;;  %v1309_v29 = vpop.f32.mrb[19].mxu1  ;;  %v1570_v8 = vmax.f32 %v1261_v14, 0.0  ;;  %v1572_v36 = vmax.f32 %v1304_v15, 0.0  ;;  %v8953_v25 = vld [vmem:[%s11109_s4 + $0x188] sm:$0xff]  }
 0xa93   :  { %v1267_v32 = vadd.f32 %v1266_v28, %v990_v4  ;;  %v1310_v33 = vadd.f32 %v1309_v29, %v998_v5  ;;  %v1571_v38 = vmax.f32 %v1263_v23, 0.0  ;;  %v1573_v39 = vmax.f32 %v1306_v24, 0.0  ;;  %v8952_v24 = vld [vmem:[%s11109_s4 + $0x108] sm:$0xff]  }
 0xa94   :  { %v1586_v9 = vmax.f32 %v1265_v27, 0.0  ;;  %v1588_v37 = vmax.f32 %v1308_v22, 0.0  ;;  %v1026_v5 = vrot.slane %v9758_v44, %v9730_v61  ;;  %v1030_v26 = vrot.slane %v9758_v44, %v9737_v0 }
 0xa95   :  { %v1587_v40 = vmax.f32 %v1267_v32, 0.0  ;;  %v1589_v41 = vmax.f32 %v1310_v33, 0.0 }
 0xa96   :  { %v1858_v45 = vpack.c.bf16 %v1586_v9, %v1570_v8  ;;  %v1860_v46 = vpack.c.bf16 %v1588_v37, %v1572_v36 }
 0xa97   :  { %v1859_v47 = vpack.c.bf16 %v1587_v40, %v1571_v38  ;;  %v1861_v48 = vpack.c.bf16 %v1589_v41, %v1573_v39  ;;  %v1346_v49 = vpop.f32.mrb[16].mxu0  ;;  %v1389_v50 = vpop.f32.mrb[20].mxu1  ;;  %v8956_v40 = vld [vmem:[%s11109_s4 + $0x110] sm:$0xff]  }
 0xa98   :  { %v1347_v53 = vadd.f32 %v1346_v49, %v1002_v30  ;;  %v1390_v54 = vadd.f32 %v1389_v50, %v1010_v31  ;;  %v1348_v55 = vpop.f32.mrb[17].mxu0  ;;  %v1391_v56 = vpop.f32.mrb[21].mxu1  ;;  %v8957_v41 = vld [vmem:[%s11109_s4 + $0x190] sm:$0xff]   ;;  %v8958_v49 = vld [vmem:[%s11109_s4 + $0x158] sm:$0xff]  }
 0xa99   :  { %v1349_v62 = vadd.f32 %v1348_v55, %v1006_v34  ;;  %v1392_v2 = vadd.f32 %v1391_v56, %v1014_v35  ;;  %v1350_v3 = vpop.f32.mrb[18].mxu0  ;;  %v1393_v4 = vpop.f32.mrb[22].mxu1  ;;  %2679 = vmatprep.mubr.bf16.mxu0 %v1859_v47  ;;  %2720 = vmatprep.mubr.bf16.mxu1 %v1861_v48  ;;  %v8959_v50 = vld [vmem:[%s11109_s4 + $0x1d8] sm:$0xff]   ;;  %v1034_v55 = vrot.slane %v9758_v44, %v9743_v6 }
 0xa9a   :  { %v1351_v10 = vadd.f32 %v1350_v3, %v1002_v30  ;;  %v1394_v11 = vadd.f32 %v1393_v4, %v1010_v31  ;;  %v1352_v14 = vpop.f32.mrb[19].mxu0  ;;  %v1395_v15 = vpop.f32.mrb[23].mxu1  ;;  %2680 = vmatmul.mubr.bf16.vlgmr.msra.gmra.mrb[28].mxu0 %v1858_v45  ;;  %2721 = vmatmul.mubr.bf16.vlgmr.msra.gmra.mrb[32].mxu1 %v1860_v46  ;;  %v1574_v27 = vmax.f32 %v1347_v53, 0.0  ;;  %v1576_v22 = vmax.f32 %v1390_v54, 0.0  ;;  %v8954_v30 = vld [vmem:[%s11109_s4 + $0x150] sm:$0xff]  }
 0xa9b   :  { %v1353_v21 = vadd.f32 %v1352_v14, %v1006_v34  ;;  %v1396_v23 = vadd.f32 %v1395_v15, %v1014_v35  ;;  %8255 = vmatpush3.bf16.msra.mxu0 %v8948_v51  ;;  %8277 = vmatpush3.bf16.msra.mxu1 %v8949_v52  ;;  %v8955_v31 = vld [vmem:[%s11109_s4 + $0x1d0] sm:$0xff]   ;;  %v1575_v32 = vmax.f32 %v1349_v62, 0.0  ;;  %v1577_v33 = vmax.f32 %v1392_v2, 0.0 }
 0xa9c   :  { %v1590_v28 = vmax.f32 %v1351_v10, 0.0  ;;  %v1592_v29 = vmax.f32 %v1394_v11, 0.0  ;;  %8256 = vmatprep.subr.bf16.mxu0 %v8950_v57  ;;  %8278 = vmatprep.subr.bf16.mxu1 %v8951_v58  ;;  %v1042_v2 = vrot.slane %v9758_v44, %v9745_v7  ;;  %v1038_v3 = vrot.slane %v9758_v44, %v9747_v12  ;;  %v8960_v11 = vld [vmem:[%s11109_s4 + $0x118] sm:$0xff]  }
 0xa9d   :  { %v1591_v34 = vmax.f32 %v1353_v21, 0.0  ;;  %v1593_v35 = vmax.f32 %v1396_v23, 0.0 }
 0xa9e   :  { %v9792_v8 = vpack.c.bf16 %v1590_v28, %v1574_v27  ;;  %v9794_v36 = vpack.c.bf16 %v1592_v29, %v1576_v22 }
 0xa9f   :  { %v1863_v9 = vpack.c.bf16 %v1591_v34, %v1575_v32  ;;  %v1865_v37 = vpack.c.bf16 %v1593_v35, %v1577_v33  ;;  %8257 = vmatpush3.bf16.msra.mxu0 %v8952_v24  ;;  %8279 = vmatpush3.bf16.msra.mxu1 %v8953_v25  ;;  %v1432_v38 = vpop.f32.mrb[20].mxu0  ;;  %v1475_v39 = vpop.f32.mrb[24].mxu1  ;;  %v8963_v24 = vld [vmem:[%s11109_s4 + $0x1e0] sm:$0xff]  }
 0xaa0   :  { %v1433_v45 = vadd.f32 %v1432_v38, %v1018_v59  ;;  %v1476_v46 = vadd.f32 %v1475_v39, %v1026_v5  ;;  %v1434_v47 = vpop.f32.mrb[21].mxu0  ;;  %v1477_v48 = vpop.f32.mrb[25].mxu1  ;;  %8258 = vmatprep.subr.bf16.mxu0 %v8954_v30  ;;  %8280 = vmatprep.subr.bf16.mxu1 %v8955_v31  ;;  %v8964_v33 = vld [vmem:[%s11109_s4 + $0x120] sm:$0xff]   ;;  %v8966_v39 = vld [vmem:[%s11109_s4 + $0x168] sm:$0xff]  }
 0xaa1   :  { %v1435_v51 = vadd.f32 %v1434_v47, %v1022_v16  ;;  %v1478_v52 = vadd.f32 %v1477_v48, %v1030_v26  ;;  %v1436_v53 = vpop.f32.mrb[22].mxu0  ;;  %v1479_v54 = vpop.f32.mrb[26].mxu1  ;;  %2761 = vmatprep.mubr.bf16.mxu0 %v1863_v9  ;;  %2802 = vmatprep.mubr.bf16.mxu1 %v1865_v37  ;;  %v8965_v34 = vld [vmem:[%s11109_s4 + $0x1a0] sm:$0xff]  }
 0xaa2   :  { %v1437_v56 = vadd.f32 %v1436_v53, %v1018_v59  ;;  %v1480_v57 = vadd.f32 %v1479_v54, %v1026_v5  ;;  %v1438_v58 = vpop.f32.mrb[23].mxu0  ;;  %v1481_v62 = vpop.f32.mrb[27].mxu1  ;;  %v8961_v59 = vld [vmem:[%s11109_s4 + $0x198] sm:$0xff]   ;;  %v1046_v5 = vrot.slane %v9758_v44, %v9749_v13  ;;  %v1578_v14 = vmax.f32 %v1433_v45, 0.0  ;;  %v8968_v54 = vld [vmem:[%s11109_s4 + $0x128] sm:$0xff]  }
 0xaa3   :  { %v1439_v4 = vadd.f32 %v1438_v58, %v1022_v16  ;;  %v1482_v10 = vadd.f32 %v1481_v62, %v1030_v26  ;;  %8259 = vmatpush3.bf16.msra.mxu0 %v8956_v40  ;;  %8281 = vmatpush3.bf16.msra.mxu1 %v8957_v41  ;;  %v1580_v15 = vmax.f32 %v1476_v46, 0.0  ;;  %v8962_v16 = vld [vmem:[%s11109_s4 + $0x160] sm:$0xff]   ;;  %v1579_v25 = vmax.f32 %v1435_v51, 0.0  ;;  %v8967_v40 = vld [vmem:[%s11109_s4 + $0x1e8] sm:$0xff]  }
 0xaa4   :  { %v1594_v21 = vmax.f32 %v1437_v56, 0.0  ;;  %v1596_v23 = vmax.f32 %v1480_v57, 0.0  ;;  %8260 = vmatprep.subr.bf16.mxu0 %v8958_v49  ;;  %8282 = vmatprep.subr.bf16.mxu1 %v8959_v50  ;;  %v1581_v26 = vmax.f32 %v1478_v52, 0.0  ;;  %v8969_v56 = vld [vmem:[%s11109_s4 + $0x1a8] sm:$0xff]  }
 0xaa5   :  { %v1595_v27 = vmax.f32 %v1439_v4, 0.0  ;;  %v1597_v22 = vmax.f32 %v1482_v10, 0.0 }
 0xaa6   :  { %v9828_v28 = vpack.c.bf16 %v1594_v21, %v1578_v14  ;;  %v9830_v44 = vpack.c.bf16 %v1596_v23, %v1580_v15  ;;  %v8972_v23 = vld [vmem:[%s11109_s4 + $0x130] sm:$0xff]  }
 0xaa7   :  { %v9832_v29 = vpack.c.bf16 %v1595_v27, %v1579_v25  ;;  %v9834_v30 = vpack.c.bf16 %v1597_v22, %v1581_v26  ;;  %8261 = vmatpush3.bf16.msra.mxu0 %v8960_v11  ;;  %8283 = vmatpush3.bf16.msra.mxu1 %v8961_v59  ;;  %v1518_v31 = vpop.f32.mrb[24].mxu0  ;;  %v1561_v32 = vpop.f32.mrb[28].mxu1  ;;  %v8975_v25 = vld [vmem:[%s11109_s4 + $0x1f8] sm:$0xff]   ;;  %v8978_v22 = vld [vmem:[%s11109_s4 + $0x240] sm:$0xff]  }
 0xaa8   :  { %v1519_v35 = vadd.f32 %v1518_v31, %v1034_v55  ;;  %v1562_v9 = vadd.f32 %v1561_v32, %v1042_v2  ;;  %v1520_v37 = vpop.f32.mrb[25].mxu0  ;;  %v1563_v38 = vpop.f32.mrb[29].mxu1  ;;  %8262 = vmatprep.subr.bf16.mxu0 %v8962_v16  ;;  %8284 = vmatprep.subr.bf16.mxu1 %v8963_v24  ;;  %v8973_v16 = vld [vmem:[%s11109_s4 + $0x1b0] sm:$0xff]   ;;  %v8974_v24 = vld [vmem:[%s11109_s4 + $0x178] sm:$0xff]   ;;  %v8979_v31 = vld [vmem:[%s11109_s4 + $0x2c0] sm:$0xff]  }
 0xaa9   :  { %v1521_v41 = vadd.f32 %v1520_v37, %v1038_v3  ;;  %v1564_v45 = vadd.f32 %v1563_v38, %v1046_v5  ;;  %v1522_v46 = vpop.f32.mrb[26].mxu0  ;;  %v1565_v47 = vpop.f32.mrb[30].mxu1  ;;  %v8976_v26 = vld [vmem:[%s11109_s4 + $0x138] sm:$0xff]   ;;  %v8980_v32 = vld [vmem:[%s11109_s4 + $0x200] sm:$0xff]   ;;  %v8985_v37 = vld [vmem:[%s11109_s4 + $0x288] sm:$0xff]  }
 0xaaa   :  { %v1523_v48 = vadd.f32 %v1522_v46, %v1034_v55  ;;  %v1566_v49 = vadd.f32 %v1565_v47, %v1042_v2  ;;  %v1524_v50 = vpop.f32.mrb[27].mxu0  ;;  %v1567_v51 = vpop.f32.mrb[31].mxu1  ;;  %v1582_v57 = vmax.f32 %v1519_v35, 0.0  ;;  %v1584_v58 = vmax.f32 %v1562_v9, 0.0  ;;  %v8970_v55 = vld [vmem:[%s11109_s4 + $0x170] sm:$0xff]   ;;  %v8977_v27 = vld [vmem:[%s11109_s4 + $0x1b8] sm:$0xff]  }
 0xaab   :  { %v1525_v52 = vadd.f32 %v1524_v50, %v1038_v3  ;;  %v1568_v53 = vadd.f32 %v1567_v51, %v1046_v5  ;;  %8263 = vmatpush3.bf16.msra.mxu0 %v8964_v33  ;;  %8285 = vmatpush3.bf16.msra.mxu1 %v8965_v34  ;;  %v8971_v2 = vld [vmem:[%s11109_s4 + $0x1f0] sm:$0xff]   ;;  %v1583_v3 = vmax.f32 %v1521_v41, 0.0  ;;  %v1585_v10 = vmax.f32 %v1564_v45, 0.0  ;;  %v8981_v33 = vld [vmem:[%s11109_s4 + $0x280] sm:$0xff]   ;;  %v8982_v34 = vld [vmem:[%s11109_s4 + $0x248] sm:$0xff]  }
 0xaac   :  { %v1598_v62 = vmax.f32 %v1523_v48, 0.0  ;;  %v1600_v4 = vmax.f32 %v1566_v49, 0.0  ;;  %8264 = vmatprep.subr.bf16.mxu0 %v8966_v39  ;;  %8286 = vmatprep.subr.bf16.mxu1 %v8967_v40  ;;  %v8983_v35 = vld [vmem:[%s11109_s4 + $0x2c8] sm:$0xff]   ;;  %v8990_v38 = vld [vmem:[%s11109_s4 + $0x258] sm:$0xff]   ;;  %v8994_v45 = vld [vmem:[%s11109_s4 + $0x260] sm:$0xff]  }
 0xaad   :  { %v1599_v11 = vmax.f32 %v1525_v52, 0.0  ;;  %v1601_v59 = vmax.f32 %v1568_v53, 0.0  ;;  %v8984_v9 = vld [vmem:[%s11109_s4 + $0x208] sm:$0xff]   ;;  %v8991_v39 = vld [vmem:[%s11109_s4 + $0x2d8] sm:$0xff]   ;;  %v8995_v46 = vld [vmem:[%s11109_s4 + $0x2e0] sm:$0xff]  }
 0xaae   :  { %v9860_v5 = vpack.c.bf16 %v1598_v62, %v1582_v57  ;;  %v9862_v14 = vpack.c.bf16 %v1600_v4, %v1584_v58  ;;  %v8992_v40 = vld [vmem:[%s11109_s4 + $0x218] sm:$0xff]   ;;  %v8996_v47 = vld [vmem:[%s11109_s4 + $0x220] sm:$0xff]   ;;  %v8998_v49 = vld [vmem:[%s11109_s4 + $0x268] sm:$0xff]  }
 0xaaf   :  { %v9864_v15 = vpack.c.bf16 %v1599_v11, %v1583_v3  ;;  %v9866_v21 = vpack.c.bf16 %v1601_v59, %v1585_v10  ;;  %8265 = vmatpush3.bf16.msra.mxu0 %v8968_v54  ;;  %8287 = vmatpush3.bf16.msra.mxu1 %v8969_v56  ;;  %v8993_v41 = vld [vmem:[%s11109_s4 + $0x298] sm:$0xff]   ;;  %v8997_v48 = vld [vmem:[%s11109_s4 + $0x2a0] sm:$0xff]   ;;  %v8999_v50 = vld [vmem:[%s11109_s4 + $0x2e8] sm:$0xff]  }
 0xab0   :  { %8266 = vmatprep.subr.bf16.mxu0 %v8970_v55  ;;  %8288 = vmatprep.subr.bf16.mxu1 %v8971_v2  ;;  %v9000_v51 = vld [vmem:[%s11109_s4 + $0x228] sm:$0xff]   ;;  %v9002_v53 = vld [vmem:[%s11109_s4 + $0x270] sm:$0xff]   ;;  %v9006_v58 = vld [vmem:[%s11109_s4 + $0x278] sm:$0xff]  }
 0xab1   :  { %v9001_v52 = vld [vmem:[%s11109_s4 + $0x2a8] sm:$0xff]   ;;  %v9003_v54 = vld [vmem:[%s11109_s4 + $0x2f0] sm:$0xff]   ;;  %v9007_v62 = vld [vmem:[%s11109_s4 + $0x2f8] sm:$0xff]  }
 0xab2   :  { %v9004_v56 = vld [vmem:[%s11109_s4 + $0x230] sm:$0xff]   ;;  %v9008_v4 = vld [vmem:[%s11109_s4 + $0x238] sm:$0xff]   ;;  %v9010_v2 = vld [vmem:[%s11109_s4 + $0x340] sm:$0xff]  }
 0xab3   :  { %8267 = vmatpush3.bf16.msra.mxu0 %v8972_v23  ;;  %8289 = vmatpush3.bf16.msra.mxu1 %v8973_v16  ;;  %v9005_v57 = vld [vmem:[%s11109_s4 + $0x2b0] sm:$0xff]   ;;  %v9009_v55 = vld [vmem:[%s11109_s4 + $0x2b8] sm:$0xff]   ;;  %v9011_v3 = vld [vmem:[%s11109_s4 + $0x3c0] sm:$0xff]  }
 0xab4   :  { %8268 = vmatprep.subr.bf16.mxu0 %v8974_v24  ;;  %8290 = vmatprep.subr.bf16.mxu1 %v8975_v25  ;;  %v9012_v10 = vld [vmem:[%s11109_s4 + $0x300] sm:$0xff]   ;;  %v9014_v59 = vld [vmem:[%s11109_s4 + $0x348] sm:$0xff]   ;;  %v9021_v25 = vld [vmem:[%s11109_s4 + $0x390] sm:$0xff]  }
 0xab5   :  { %v9013_v11 = vld [vmem:[%s11109_s4 + $0x380] sm:$0xff]   ;;  %v9015_v23 = vld [vmem:[%s11109_s4 + $0x3c8] sm:$0xff]  }
 0xab6   :  { %v9016_v16 = vld [vmem:[%s11109_s4 + $0x308] sm:$0xff]  }
 0xab7   :  { %8269 = vmatpush3.bf16.msra.mxu0 %v8976_v26  ;;  %8291 = vmatpush3.bf16.msra.mxu1 %v8977_v27  ;;  %v9017_v24 = vld [vmem:[%s11109_s4 + $0x388] sm:$0xff]   ;;  %v9023_v26 = vld [vmem:[%s11109_s4 + $0x3d8] sm:$0xff]  }
 0xab8   :  { %8298 = vmatprep.subr.bf16.mxu0 %v8978_v22  ;;  %8320 = vmatprep.subr.bf16.mxu1 %v8979_v31  ;;  %v9024_v27 = vld [vmem:[%s11109_s4 + $0x318] sm:$0xff]   ;;  %v9026_v31 = vld [vmem:[%s11109_s4 + $0x360] sm:$0xff]  }
 0xab9   :  { %v9025_v22 = vld [vmem:[%s11109_s4 + $0x398] sm:$0xff]  }
 0xaba   :  { %2762 = vmatmul.mubr.bf16.vlgmr.msra.gmra.mrb[32].mxu0 %v9792_v8  ;;  %2803 = vmatmul.mubr.bf16.vlgmr.msra.gmra.mrb[36].mxu1 %v9794_v36  ;;  %v8986_v8 = vld [vmem:[%s11109_s4 + $0x250] sm:$0xff]  }
 0xabb   :  { %8299 = vmatpush3.bf16.msra.mxu0 %v8980_v32  ;;  %2843 = vmatprep.mubr.bf16.mxu0 %v9832_v29  ;;  %v8987_v36 = vld [vmem:[%s11109_s4 + $0x2d0] sm:$0xff]   ;;  %v9027_v32 = vld [vmem:[%s11109_s4 + $0x3e0] sm:$0xff]  }
 0xabc   :  { %8321 = vmatpush3.bf16.msra.mxu1 %v8981_v33  ;;  %2884 = vmatprep.mubr.bf16.mxu1 %v9834_v30  ;;  %v8988_v29 = vld [vmem:[%s11109_s4 + $0x210] sm:$0xff]   ;;  %v9028_v33 = vld [vmem:[%s11109_s4 + $0x320] sm:$0xff]  }
 0xabd   :  { %8300 = vmatprep.subr.bf16.mxu0 %v8982_v34  ;;  %8322 = vmatprep.subr.bf16.mxu1 %v8983_v35  ;;  %v8989_v30 = vld [vmem:[%s11109_s4 + $0x290] sm:$0xff]   ;;  %v9029_v34 = vld [vmem:[%s11109_s4 + $0x3a0] sm:$0xff]   ;;  %v9030_v35 = vld [vmem:[%s11109_s4 + $0x368] sm:$0xff]  }
 0xabf   :  { %8301 = vmatpush3.bf16.msra.mxu0 %v8984_v9  ;;  %v9031_v9 = vld [vmem:[%s11109_s4 + $0x3e8] sm:$0xff]  }
 0xac0   :  { %8323 = vmatpush3.bf16.msra.mxu1 %v8985_v37  ;;  %8302 = vmatprep.subr.bf16.mxu0 %v8986_v8  ;;  %v9032_v37 = vld [vmem:[%s11109_s4 + $0x328] sm:$0xff]  }
 0xac1   :  { %8324 = vmatprep.subr.bf16.mxu1 %v8987_v36  ;;  %v9033_v8 = vld [vmem:[%s11109_s4 + $0x3a8] sm:$0xff]   ;;  %v9034_v36 = vld [vmem:[%s11109_s4 + $0x370] sm:$0xff]  }
 0xac3   :  { %8303 = vmatpush3.bf16.msra.mxu0 %v8988_v29  ;;  %v9035_v29 = vld [vmem:[%s11109_s4 + $0x3f0] sm:$0xff]  }
 0xac4   :  { %8325 = vmatpush3.bf16.msra.mxu1 %v8989_v30  ;;  %8304 = vmatprep.subr.bf16.mxu0 %v8990_v38  ;;  %v9036_v30 = vld [vmem:[%s11109_s4 + $0x330] sm:$0xff]  }
 0xac5   :  { %8326 = vmatprep.subr.bf16.mxu1 %v8991_v39  ;;  %v9037_v38 = vld [vmem:[%s11109_s4 + $0x3b0] sm:$0xff]   ;;  %v9038_v39 = vld [vmem:[%s11109_s4 + $0x378] sm:$0xff]  }
 0xac7   :  { %8305 = vmatpush3.bf16.msra.mxu0 %v8992_v40  ;;  %v9039_v40 = vld [vmem:[%s11109_s4 + $0x3f8] sm:$0xff]  }
 0xac8   :  { %8327 = vmatpush3.bf16.msra.mxu1 %v8993_v41  ;;  %8306 = vmatprep.subr.bf16.mxu0 %v8994_v45  ;;  %v9040_v41 = vld [vmem:[%s11109_s4 + $0x338] sm:$0xff]  }
 0xac9   :  { %8328 = vmatprep.subr.bf16.mxu1 %v8995_v46  ;;  %v9041_v45 = vld [vmem:[%s11109_s4 + $0x3b8] sm:$0xff]   ;;  %v10089_v46 = vld [vmem:[%s11107_s2 + $0x4] ss:$12 sps:$4 sm:$0xff]  }
 0xacb   :  { %8307 = vmatpush3.bf16.msra.mxu0 %v8996_v47  ;;  %v10099_v47 = vld [vmem:[%s11107_s2 + $0x1c] ss:$12 sps:$4 sm:$0xff]  }
 0xacc   :  { %8329 = vmatpush3.bf16.msra.mxu1 %v8997_v48  ;;  %8308 = vmatprep.subr.bf16.mxu0 %v8998_v49  ;;  %v7493_v48 = vld [vmem:[%s11112_s7 + $0x8] ss:$0 sm:$0xff] }
 0xacd   :  { %8330 = vmatprep.subr.bf16.mxu1 %v8999_v50 }
 0xacf   :  { %8309 = vmatpush3.bf16.msra.mxu0 %v9000_v51 }
 0xad0   :  { %8331 = vmatpush3.bf16.msra.mxu1 %v9001_v52  ;;  %8310 = vmatprep.subr.bf16.mxu0 %v9002_v53 }
 0xad1   :  { %8332 = vmatprep.subr.bf16.mxu1 %v9003_v54 }
 0xad3   :  { %8311 = vmatpush3.bf16.msra.mxu0 %v9004_v56 }
 0xad4   :  { %8333 = vmatpush3.bf16.msra.mxu1 %v9005_v57  ;;  %8312 = vmatprep.subr.bf16.mxu0 %v9006_v58 }
 0xad5   :  { %8334 = vmatprep.subr.bf16.mxu1 %v9007_v62 }
 0xad7   :  { %8313 = vmatpush3.bf16.msra.mxu0 %v9008_v4 }
 0xad8   :  { %8335 = vmatpush3.bf16.msra.mxu1 %v9009_v55  ;;  %8342 = vmatprep.subr.bf16.mxu0 %v9010_v2 }
 0xad9   :  { %8364 = vmatprep.subr.bf16.mxu1 %v9011_v3 }
 0xada   :  { %2844 = vmatmul.mubr.bf16.vlgmr.msra.gmra.mrb[36].mxu0 %v9828_v28  ;;  %v9018_v28 = vld [vmem:[%s11109_s4 + $0x350] sm:$0xff]  }
 0xadb   :  { %2885 = vmatmul.mubr.bf16.vlgmr.msra.gmra.mrb[40].mxu1 %v9830_v44  ;;  %8343 = vmatpush3.bf16.msra.mxu0 %v9012_v10  ;;  %v9019_v44 = vld [vmem:[%s11109_s4 + $0x3d0] sm:$0xff]  }
 0xadc   :  { %2925 = vmatprep.mubr.bf16.mxu0 %v9864_v15  ;;  %8365 = vmatpush3.bf16.msra.mxu1 %v9013_v11  ;;  %v9020_v15 = vld [vmem:[%s11109_s4 + $0x310] sm:$0xff]  }
 0xadd   :  { %2966 = vmatprep.mubr.bf16.mxu1 %v9866_v21  ;;  %8344 = vmatprep.subr.bf16.mxu0 %v9014_v59  ;;  %v9022_v21 = vld [vmem:[%s11109_s4 + $0x358] sm:$0xff]  }
 0xade   :  { %8366 = vmatprep.subr.bf16.mxu1 %v9015_v23 }
 0xadf   :  { %8345 = vmatpush3.bf16.msra.mxu0 %v9016_v16 }
 0xae0   :  { %8367 = vmatpush3.bf16.msra.mxu1 %v9017_v24  ;;  %8346 = vmatprep.subr.bf16.mxu0 %v9018_v28 }
 0xae1   :  { %8368 = vmatprep.subr.bf16.mxu1 %v9019_v44 }
 0xae3   :  { %8347 = vmatpush3.bf16.msra.mxu0 %v9020_v15 }
 0xae4   :  { %8369 = vmatpush3.bf16.msra.mxu1 %v9021_v25  ;;  %8348 = vmatprep.subr.bf16.mxu0 %v9022_v21 }
 0xae5   :  { %8370 = vmatprep.subr.bf16.mxu1 %v9023_v26 }
 0xae7   :  { %8349 = vmatpush3.bf16.msra.mxu0 %v9024_v27 }
 0xae8   :  { %8371 = vmatpush3.bf16.msra.mxu1 %v9025_v22  ;;  %8350 = vmatprep.subr.bf16.mxu0 %v9026_v31 }
 0xae9   :  { %8372 = vmatprep.subr.bf16.mxu1 %v9027_v32 }
 0xaeb   :  { %8351 = vmatpush3.bf16.msra.mxu0 %v9028_v33 }
 0xaec   :  { %8373 = vmatpush3.bf16.msra.mxu1 %v9029_v34  ;;  %8352 = vmatprep.subr.bf16.mxu0 %v9030_v35 }
 0xaed   :  { %8374 = vmatprep.subr.bf16.mxu1 %v9031_v9 }
 0xaef   :  { %8353 = vmatpush3.bf16.msra.mxu0 %v9032_v37 }
 0xaf0   :  { %8375 = vmatpush3.bf16.msra.mxu1 %v9033_v8  ;;  %8354 = vmatprep.subr.bf16.mxu0 %v9034_v36 }
 0xaf1   :  { %8376 = vmatprep.subr.bf16.mxu1 %v9035_v29 }
 0xaf3   :  { %8355 = vmatpush3.bf16.msra.mxu0 %v9036_v30 }
 0xaf4   :  { %8377 = vmatpush3.bf16.msra.mxu1 %v9037_v38  ;;  %8356 = vmatprep.subr.bf16.mxu0 %v9038_v39 }
 0xaf5   :  { %8378 = vmatprep.subr.bf16.mxu1 %v9039_v40 }
 0xaf7   :  { %8357 = vmatpush3.bf16.msra.mxu0 %v9040_v41 }
 0xaf8   :  { %8379 = vmatpush3.bf16.msra.mxu1 %v9041_v45  ;;  %8699 = vmatprep.subr.bf16.mxu0 %v9290_v1 }
 0xaf9   :  { %8707 = vmatprep.subr.mxu1 %v9290_v1 }
 0xafa   :  { %2926 = vmatmul.mubr.bf16.vlgmr.msra.gmra.mrb[40].mxu0 %v9860_v5 }
 0xafb   :  { %2967 = vmatmul.mubr.bf16.vlgmr.msra.gmra.mrb[44].mxu1 %v9862_v14  ;;  %8700 = vmatpush3.bf16.msra.mxu0 %v10089_v46 }
 0xafc   :  { %8701 = vmatprep.subr.bf16.mxu0 %v9290_v1  ;;  %8703 = vmatprep.mubr.msk.bf16.mxu0 %vm9291_vm1, %v9290_v1 }
 0xafd   :  { %8709 = vmatprep.mubr.msk.f32.mxu1 %vm9291_vm1, %v9290_v1 }
 0xaff   :  { %8702 = vmatpush3.bf16.msra.mxu0 %v10099_v47 }
 0xb00   :  { %8712 = vmatprep.subr.mxu0 %v9290_v1 }
 0xb02   :  { %8704 = vmatmul.mubr.msk.bf16.vlgmr.msra.gmra.mrb[44].mxu0 %vm132_vm3, %v9395_v19 }
 0xb03   :  { %8714 = vmatprep.mubr.msk.f32.mxu0 %vm9291_vm1, %v9290_v1 }
 0xb6d   :  { %v8226_v5 = vpop.f32.mrb[28].mxu0  ;;  %v8248_v14 = vpop.f32.mrb[32].mxu1 }
 0xb6e   :  { %v8227_v49 = vpop.f32.mrb[29].mxu0  ;;  %v8249_v50 = vpop.f32.mrb[33].mxu1 }
 0xb6f   :  { %v8228_v51 = vadd.f32 %v8227_v49, %v8226_v5  ;;  %v8250_v52 = vadd.f32 %v8249_v50, %v8248_v14  ;;  %v8229_v53 = vpop.f32.mrb[30].mxu0  ;;  %v8251_v54 = vpop.f32.mrb[34].mxu1 }
 0xb70   :  { %v8230_v56 = vpop.f32.mrb[31].mxu0  ;;  %v8252_v57 = vpop.f32.mrb[35].mxu1 }
 0xb71   :  { %v2682_v58 = vadd.f32 %v8228_v51, %v7493_v48  ;;  %v8231_v62 = vadd.f32 %v8230_v56, %v8229_v53  ;;  %v8253_v19 = vadd.f32 %v8252_v57, %v8251_v54 }
 0xb73   :  { %v2723_v4 = vadd.f32 %v8250_v52, %v2682_v58  ;;  %v2685_v55 = vadd.f32 %v8231_v62, %v7493_v48 }
 0xb75   :  { %v2726_v2 = vadd.f32 %v8253_v19, %v2685_v55 }
 0xb8d   :  { %v8270_v3 = vpop.f32.mrb[32].mxu0  ;;  %v8292_v10 = vpop.f32.mrb[36].mxu1 }
 0xb8e   :  { %v8271_v11 = vpop.f32.mrb[33].mxu0  ;;  %v8293_v59 = vpop.f32.mrb[37].mxu1 }
 0xb8f   :  { %v8272_v23 = vadd.f32 %v8271_v11, %v8270_v3  ;;  %v8294_v16 = vadd.f32 %v8293_v59, %v8292_v10  ;;  %v8273_v24 = vpop.f32.mrb[34].mxu0  ;;  %v8295_v28 = vpop.f32.mrb[38].mxu1 }
 0xb90   :  { %v8274_v44 = vpop.f32.mrb[35].mxu0  ;;  %v8296_v15 = vpop.f32.mrb[39].mxu1 }
 0xb91   :  { %v2764_v25 = vadd.f32 %v8272_v23, %v2723_v4  ;;  %v8275_v21 = vadd.f32 %v8274_v44, %v8273_v24  ;;  %v8297_v26 = vadd.f32 %v8296_v15, %v8295_v28 }
 0xb93   :  { %v2805_v27 = vadd.f32 %v8294_v16, %v2764_v25  ;;  %v2767_v22 = vadd.f32 %v8275_v21, %v2726_v2  ;;  %v7626_v2 = vld [vmem:[%s11112_s7 + $0xd] ss:$0 sm:$0xff] }
 0xb95   :  { %v2808_v31 = vadd.f32 %v8297_v26, %v2767_v22 }
 0xbad   :  { %v8314_v32 = vpop.f32.mrb[36].mxu0 }
 0xbae   :  { %v8336_v33 = vpop.f32.mrb[40].mxu1  ;;  %v8315_v34 = vpop.f32.mrb[37].mxu0 }
 0xbaf   :  { %v8316_v35 = vadd.f32 %v8315_v34, %v8314_v32  ;;  %v8337_v9 = vpop.f32.mrb[41].mxu1  ;;  %v8317_v37 = vpop.f32.mrb[38].mxu0 }
 0xbb0   :  { %v8338_v8 = vadd.f32 %v8337_v9, %v8336_v33  ;;  %v8339_v36 = vpop.f32.mrb[42].mxu1  ;;  %v8318_v29 = vpop.f32.mrb[39].mxu0 }
 0xbb1   :  { %v2846_v30 = vadd.f32 %v8316_v35, %v2805_v27  ;;  %v8319_v38 = vadd.f32 %v8318_v29, %v8317_v37  ;;  %v8340_v39 = vpop.f32.mrb[43].mxu1 }
 0xbb2   :  { %v8341_v40 = vadd.f32 %v8340_v39, %v8339_v36 }
 0xbb3   :  { %v2887_v41 = vadd.f32 %v8338_v8, %v2846_v30  ;;  %v2849_v45 = vadd.f32 %v8319_v38, %v2808_v31 }
 0xbb5   :  { %v2890_v5 = vadd.f32 %v8341_v40, %v2849_v45 }
 0xbcd   :  { %v8358_v14 = vpop.f32.mrb[40].mxu0 }
 0xbce   :  { %v8380_v48 = vpop.f32.mrb[44].mxu1  ;;  %v8359_v49 = vpop.f32.mrb[41].mxu0 }
 0xbcf   :  { %v8360_v50 = vadd.f32 %v8359_v49, %v8358_v14  ;;  %v8381_v51 = vpop.f32.mrb[45].mxu1  ;;  %v8361_v52 = vpop.f32.mrb[42].mxu0 }
 0xbd0   :  { %v8382_v53 = vadd.f32 %v8381_v51, %v8380_v48  ;;  %v8383_v54 = vpop.f32.mrb[46].mxu1  ;;  %v8362_v56 = vpop.f32.mrb[43].mxu0 }
 0xbd1   :  { %v2928_v57 = vadd.f32 %v8360_v50, %v2887_v41  ;;  %v8363_v58 = vadd.f32 %v8362_v56, %v8361_v52  ;;  %v8384_v62 = vpop.f32.mrb[47].mxu1 }
 0xbd2   :  { %v8385_v19 = vadd.f32 %v8384_v62, %v8383_v54 }
 0xbd3   :  { %v10115_v4 = vadd.f32 %v8382_v53, %v2928_v57  ;;  %v2931_v55 = vadd.f32 %v8363_v58, %v2890_v5 }
 0xbd5   :  { %v10120_v3 = vadd.f32 %v8385_v19, %v2931_v55  ;;  %v3116_v10 = vpop.f32.mrb[44].mxu0 }
 0xbd6   :  { %v10122_v11 = vadd.f32 %v7626_v2, %v3116_v10  ;;  %v8705_v59 = vpop.f32.mrb[45].mxu0 }
 0xbd7   :  { %v3119_v23 = vpop.f32.mrb[46].mxu0 }
 0xbd8   :  { %v10124_v16 = vadd.f32 %v7626_v2, %v3119_v23  ;;  %3124 = vrot.lane.b32.xlu0 %v10122_v11, %s9292_s21  ;;  %v8706_v24 = vpop.f32.mrb[47].mxu0 }
 0xbda   :  { %3201 = vrot.lane.b32.xlu1 %v10124_v16, %s9292_s21 }
 0xc4a   :  { %v3125_v28 = vpop.permute.xlu0 %3124 }
 0xc4b   :  { %8708 = vmatpush3.xpose.msk.msra.mxu1 %vm180_vm4, %v3125_v28 }
 0xc4c   :  { %v3202_v44 = vpop.permute.xlu1 %3201  ;;  %8717 = vmatprep.subr.mxu1 %v9290_v1 }
 0xc4d   :  { %8713 = vmatpush3.xpose.msk.msra.mxu0 %vm180_vm4, %v3202_v44 }
 0xc4e   :  { %8710 = vmatmul.mubr.msk.f32.vlgmr.msra.gmra.mrb[48].mxu1 %vm180_vm4, %v10122_v11  ;;  %8722 = vmatprep.subr.mxu0 %v9290_v1 }
 0xc4f   :  { %8719 = vmatprep.mubr.msk.f32.mxu1 %vm9291_vm1, %v9290_v1 }
 0xc50   :  { %8715 = vmatmul.mubr.msk.f32.vlgmr.msra.gmra.mrb[48].mxu0 %vm180_vm4, %v10124_v16 }
 0xc51   :  { %8724 = vmatprep.mubr.msk.f32.mxu0 %vm9291_vm1, %v9290_v1 }
 0xd21   :  { %v3196_v15 = vpop.f32.mrb[48].mxu1 }
 0xd22   :  { %v8711_v25 = vpop.f32.mrb[49].mxu1  ;;  %v3277_v21 = vsel %vm332_vm5, %v3196_v15, -inf }
 0xd23   :  { %3278 = vmax.xlane.f32.xlu1 %v3277_v21  ;;  %v3273_v26 = vpop.f32.mrb[48].mxu0 }
 0xd24   :  { %v8716_v27 = vpop.f32.mrb[49].mxu0  ;;  %v3280_v22 = vsel %vm332_vm5, %v3273_v26, -inf }
 0xd25   :  { %3281 = vmax.xlane.f32.xlu0 %v3280_v22  ;;  %v2976_v27 = vadd.f32 %v10120_v3, %v9550_v43 }
 0xd27   :  { %v2982_v22 = vsel %vm132_vm3, %v2976_v27, 0.0 }
 0xd34   :  { %3375 = vrot.lane.b32.xlu1 %v10124_v16, %s9293_s22 }
 0xd38   :  { %3453 = vrot.lane.b32.xlu1 %v10122_v11, %s9294_s23 }
 0xd3b   :  { %3299 = vrot.lane.b32.xlu0 %v10122_v11, %s9293_s22 }
 0xd3f   :  { %3531 = vrot.lane.b32.xlu0 %v10124_v16, %s9294_s23 }
 0xdb0   :  { %v3279_v31 = vpop.xlane.xlu1 %3278 }
 0xdb1   :  { %v3283_v32 = vsub.f32 %v3196_v15, %v3279_v31 }
 0xdb2   :  { %v3282_v33 = vpop.xlane.xlu0 %3281 }
 0xdb3   :  { %v3285_v34 = vmul.f32 1.442695, %v3283_v32  ;;  %v3284_v35 = vsub.f32 %v3273_v26, %v3282_v33 }
 0xdb4   :  { %v3376_v9 = vpop.permute.xlu1 %3375 }
 0xdb5   :  { %9210 = vpow2.f32 %v3285_v34  ;;  %v3287_v37 = vmul.f32 1.442695, %v3284_v35  ;;  %8723 = vmatpush3.msra.mxu0 %v3376_v9 }
 0xdb6   :  { %v3300_v8 = vpop.permute.xlu0 %3299  ;;  %8732 = vmatprep.subr.mxu0 %v9290_v1 }
 0xdb7   :  { %9212 = vpow2.f32 %v3287_v37  ;;  %8718 = vmatpush3.msra.mxu1 %v3300_v8 }
 0xdb8   :  { %8727 = vmatprep.subr.mxu1 %v9290_v1  ;;  %v3454_v40 = vpop.permute.xlu1 %3453 }
 0xdba   :  { %v3532_v39 = vpop.permute.xlu0 %3531 }
 0xdbf   :  { %v9211_v36 = vpop.eup %9210 }
 0xdc0   :  { %v3289_v29 = vsel %vm332_vm5, %v9211_v36, 0.0 }
 0xdc1   :  { %v9213_v30 = vpop.eup %9212  ;;  %3290 = vadd.xlane.f32.xlu0 %v3289_v29  ;;  %v2975_v29 = vadd.f32 %v10115_v4, %v9548_v42 }
 0xdc2   :  { %v3292_v38 = vsel %vm332_vm5, %v9213_v30, 0.0 }
 0xdc3   :  { %3293 = vadd.xlane.f32.xlu1 %v3292_v38 }
 0xdd4   :  { %3451 = vrot.lane.b32.xlu1 %v10122_v11, %s9295_s24 }
 0xdd7   :  { %3529 = vrot.lane.b32.xlu0 %v10124_v16, %s9295_s24 }
 0xe4e   :  { %v3291_v41 = vpop.xlane.xlu0 %3290 }
 0xe4f   :  { %9214 = vrcp.f32 %v3291_v41 }
 0xe50   :  { %v3294_v45 = vpop.xlane.xlu1 %3293 }
 0xe51   :  { %9216 = vrcp.f32 %v3294_v45 }
 0xe52   :  { %v3530_v51 = vpop.permute.xlu0 %3529 }
 0xe54   :  { %v3452_v50 = vpop.permute.xlu1 %3451 }
 0xe59   :  { %v9215_v5 = vpop.eup %9214 }
 0xe5a   :  { %v3297_v14 = vmul.f32 %v9215_v5, %v9211_v36 }
 0xe5b   :  { %v9217_v48 = vpop.eup %9216 }
 0xe5c   :  { %v3298_v49 = vmul.f32 %v9217_v48, %v9213_v30  ;;  %8720 = vmatmul.mubr.msk.f32.vlgmr.msra.gmra.mrb[50].mxu1 %vm332_vm5, %v3297_v14  ;;  %v2979_v30 = vsel %vm132_vm3, %v2975_v29, 0.0 }
 0xe5d   :  { %8728 = vmatpush3.xpose.msk.msra.mxu1 %vm180_vm4, %v3454_v40  ;;  %8729 = vmatprep.mubr.msk.f32.mxu1 %vm9291_vm1, %v9290_v1 }
 0xe5e   :  { %8725 = vmatmul.mubr.msk.f32.vlgmr.msra.gmra.mrb[50].mxu0 %vm332_vm5, %v3298_v49  ;;  %8737 = vmatprep.subr.mxu1 %v9290_v1 }
 0xe5f   :  { %8733 = vmatpush3.xpose.msk.msra.mxu0 %vm180_vm4, %v3532_v39  ;;  %8734 = vmatprep.mubr.msk.f32.mxu0 %vm9291_vm1, %v9290_v1 }
 0xe60   :  { %8730 = vmatmul.mubr.msk.f32.vlgmr.msra.gmra.mrb[52].mxu1 %vm180_vm4, %v3452_v50  ;;  %8742 = vmatprep.subr.mxu0 %v9290_v1 }
 0xe61   :  { %8739 = vmatprep.mubr.msk.f32.mxu1 %vm9291_vm1, %v9290_v1 }
 0xe62   :  { %8735 = vmatmul.mubr.msk.f32.vlgmr.msra.gmra.mrb[52].mxu0 %vm180_vm4, %v3530_v51 }
 0xe63   :  { %8744 = vmatprep.mubr.msk.f32.mxu0 %vm9291_vm1, %v9290_v1 }
 0xf2f   :  { %v10176_v52 = vpop.f32.mrb[50].mxu1 }
 0xf30   :  { %v8721_v53 = vpop.f32.mrb[51].mxu1 }
 0xf31   :  { %v10178_v54 = vpop.f32.mrb[50].mxu0 }
 0xf32   :  { %v8726_v56 = vpop.f32.mrb[51].mxu0 }
 0xf33   :  { %v3525_v57 = vpop.f32.mrb[52].mxu1 }
 0xf34   :  { %v8731_v58 = vpop.f32.mrb[53].mxu1  ;;  %v3607_v62 = vsel %vm332_vm5, %v3525_v57, -inf }
 0xf35   :  { %3608 = vmax.xlane.f32.xlu1 %v3607_v62  ;;  %v3603_v19 = vpop.f32.mrb[52].mxu0 }
 0xf36   :  { %v8736_v55 = vpop.f32.mrb[53].mxu0  ;;  %v3610_v2 = vsel %vm332_vm5, %v3603_v19, -inf }
 0xf37   :  { %3611 = vmax.xlane.f32.xlu0 %v3610_v2 }
 0xfc2   :  { %v3609_v10 = vpop.xlane.xlu1 %3608 }
 0xfc3   :  { %v3613_v59 = vsub.f32 %v3525_v57, %v3609_v10 }
 0xfc4   :  { %v3612_v23 = vpop.xlane.xlu0 %3611 }
 0xfc5   :  { %v3615_v24 = vmul.f32 1.442695, %v3613_v59  ;;  %v3614_v28 = vsub.f32 %v3603_v19, %v3612_v23 }
 0xfc7   :  { %9218 = vpow2.f32 %v3615_v24  ;;  %v3617_v44 = vmul.f32 1.442695, %v3614_v28  ;;  %v7642_v28 = vld [vmem:[%s11112_s7 + $0xe] ss:$0 sm:$0xff] }
 0xfc9   :  { %9220 = vpow2.f32 %v3617_v44  ;;  %v7622_v44 = vld [vmem:[%s11112_s7 + $0xb] ss:$0 sm:$0xff] }
 0xfd1   :  { %v9219_v15 = vpop.eup %9218 }
 0xfd2   :  { %v3619_v25 = vsel %vm332_vm5, %v9219_v15, 0.0 }
 0xfd3   :  { %v9221_v21 = vpop.eup %9220  ;;  %3620 = vadd.xlane.f32.xlu0 %v3619_v25  ;;  %v7623_v25 = vld [vmem:[%s11112_s7 + $0xc] ss:$0 sm:$0xff] }
 0xfd4   :  { %v3622_v26 = vsel %vm332_vm5, %v9221_v21, 0.0 }
 0xfd5   :  { %3623 = vadd.xlane.f32.xlu1 %v3622_v26 }
 0xfe6   :  { %3705 = vrot.lane.b32.xlu1 %v10124_v16, %s9296_s25 }
 0xfe9   :  { %3629 = vrot.lane.b32.xlu0 %v10122_v11, %s9296_s25 }
 0xfea   :  { %3797 = vrot.lane.b32.xlu1 %v10089_v46, %s9297_s26 }
 0xfee   :  { %3799 = vrot.lane.b32.xlu1 %v10099_v47, %s9297_s26 }
0x1012   :  { %2983 = vadd.xlane.f32.xlu1 %v2982_v22 }
0x1060   :  { %v3621_v31 = vpop.xlane.xlu0 %3620 }
0x1061   :  { %9222 = vrcp.f32 %v3621_v31 }
0x1062   :  { %v3624_v32 = vpop.xlane.xlu1 %3623 }
0x1063   :  { %9224 = vrcp.f32 %v3624_v32 }
0x1064   :  { %v3630_v16 = vpop.permute.xlu0 %3629 }
0x1065   :  { %8738 = vmatpush3.msra.mxu1 %v3630_v16 }
0x1066   :  { %v3706_v33 = vpop.permute.xlu1 %3705  ;;  %8747 = vmatprep.subr.bf16.mxu1 %v9290_v1 }
0x1067   :  { %8743 = vmatpush3.msra.mxu0 %v3706_v33 }
0x1068   :  { %8755 = vmatprep.subr.bf16.mxu0 %v9290_v1 }
0x106a   :  { %v3798_v11 = vpop.permute.xlu1 %3797 }
0x106b   :  { %v9223_v46 = vpop.eup %9222 }
0x106c   :  { %v3627_v47 = vmul.f32 %v9223_v46, %v9219_v15 }
0x106d   :  { %v9225_v34 = vpop.eup %9224 }
0x106e   :  { %v3628_v43 = vmul.f32 %v9225_v34, %v9221_v21  ;;  %8740 = vmatmul.mubr.msk.f32.vlgmr.msra.gmra.mrb[54].mxu1 %vm332_vm5, %v3627_v47  ;;  %v3800_v3 = vpop.permute.xlu1 %3799 }
0x106f   :  { %8748 = vmatpush3.bf16.msra.mxu1 %v3798_v11  ;;  %8751 = vmatprep.mubr.msk.bf16.mxu1 %vm9291_vm1, %v9290_v1 }
0x1070   :  { %8745 = vmatmul.mubr.msk.f32.vlgmr.msra.gmra.mrb[54].mxu0 %vm332_vm5, %v3628_v43  ;;  %8749 = vmatprep.subr.bf16.mxu1 %v9290_v1 }
0x1071   :  { %8759 = vmatprep.mubr.msk.bf16.mxu0 %vm9291_vm1, %v9290_v1 }
0x1073   :  { %8750 = vmatpush3.bf16.msra.mxu1 %v3800_v3 }
0x1074   :  { %8763 = vmatprep.subr.bf16.mxu1 %v9290_v1 }
0x109f   :  { %v2984_v14 = vpop.xlane.xlu1 %2983 }
0x10a0   :  { %v2986_v42 = vmul.f32 0.03125, %v2984_v14 }
0x10a2   :  { %v2988_v49 = vsub.f32 %v2976_v27, %v2986_v42 }
0x10a4   :  { %v2990_v56 = vmul.f32 %v2988_v49, %v2988_v49 }
0x1141   :  { %v3701_v35 = vpop.f32.mrb[54].mxu1 }
0x1142   :  { %v8741_v9 = vpop.f32.mrb[55].mxu1 }
0x1143   :  { %v3777_v37 = vpop.f32.mrb[54].mxu0 }
0x1144   :  { %v8899_v8 = vpack.i.bf16 %v3777_v37, %v3701_v35  ;;  %v8746_v36 = vpop.f32.mrb[55].mxu0  ;;  %v10236_v35 = vld [vmem:[%s11107_s2 + $0x8] ss:$12 sps:$4 sm:$0xff]  }
0x1145   :  { %8756 = vmatpush3.bf16.msra.mxu0 %v10236_v35 }
0x1146   :  { %8900 = vrot.lane.b32.xlu0 %v8899_v8, %s9298_s27  ;;  %8757 = vmatprep.subr.bf16.mxu0 %v9290_v1 }
0x1165   :  { %2980 = vadd.xlane.f32.xlu0 %v2979_v30 }
0x11b8   :  { %v8901_v38 = vpop.permute.xlu0 %8900 }
0x11b9   :  { %v8903_v39 = vunpack.i.h.bf16 %v8901_v38  ;;  %v8902_v40 = vunpack.i.l.bf16 %v8901_v38 }
0x11bb   :  { %v3790_v41 = vsel %vm180_vm4, %v10178_v54, %v8903_v39  ;;  %v3789_v45 = vsel %vm180_vm4, %v10176_v52, %v8902_v40  ;;  %v2994_v54 = vsel %vm132_vm3, %v2990_v56, 0.0 }
0x11bc   :  { %v3791_v5 = vpack.c.bf16 %v3790_v41, %v3789_v45 }
0x11be   :  { %8752 = vmatmul.mubr.msk.bf16.vlgmr.msra.gmra.mrb[56].mxu1 %vm132_vm3, %v3791_v5 }
0x11bf   :  { %8767 = vmatprep.mubr.msk.bf16.mxu1 %vm9291_vm1, %v9290_v1 }
0x11f2   :  { %v2981_v4 = vpop.xlane.xlu0 %2980 }
0x11f3   :  { %v2985_v48 = vmul.f32 0.03125, %v2981_v4 }
0x11f5   :  { %v2987_v50 = vsub.f32 %v2975_v29, %v2985_v48 }
0x11f7   :  { %v2989_v51 = vmul.f32 %v2987_v50, %v2987_v50 }
0x11f9   :  { %v2991_v53 = vsel %vm132_vm3, %v2989_v51, 0.0 }
0x11fa   :  { %2992 = vadd.xlane.f32.xlu0 %v2991_v53 }
0x11fe   :  { %2995 = vadd.xlane.f32.xlu0 %v2994_v54 }
0x1287   :  { %v2993_v52 = vpop.xlane.xlu0 %2992 }
0x1288   :  { %v2997_v57 = vmul.f32 0.03125, %v2993_v52 }
0x128a   :  { %v2999_v58 = vadd.f32 1e-05, %v2997_v57 }
0x128b   :  { %v2996_v62 = vpop.xlane.xlu0 %2995 }
0x128c   :  { %9226 = vrsqrt.f32 %v2999_v58  ;;  %v2998_v19 = vmul.f32 0.03125, %v2996_v62 }
0x128e   :  { %v3000_v55 = vadd.f32 1e-05, %v2998_v19 }
0x1290   :  { %9228 = vrsqrt.f32 %v3000_v55 }
0x1291   :  { %v3840_v2 = vpop.f32.mrb[56].mxu1 }
0x1292   :  { %v8753_v10 = vpop.f32.mrb[57].mxu1  ;;  %v3841_v21 = vadd.f32 %v7642_v28, %v3840_v2 }
0x1293   :  { %v3843_v59 = vpop.f32.mrb[58].mxu1 }
0x1294   :  { %v8754_v23 = vpop.f32.mrb[59].mxu1  ;;  %v3844_v32 = vadd.f32 %v7642_v28, %v3843_v59  ;;  %v3847_v33 = vadd.f32 %v3841_v21, %v9389_v17  ;;  %v10243_v17 = vld [vmem:[%s11107_s2 + $0x20] ss:$12 sps:$4 sm:$0xff]  }
0x1295   :  { %8758 = vmatpush3.bf16.msra.mxu0 %v10243_v17 }
0x1296   :  { %v9227_v24 = vpop.eup %9226  ;;  %v3851_v11 = vsel %vm132_vm3, %v3847_v33, 0.0  ;;  %v3848_v43 = vadd.f32 %v3844_v32, %v9391_v18  ;;  %8771 = vmatprep.subr.mxu0 %v9290_v1  ;;  %v7625_v32 = vld [vmem:[%s11112_s7 + $0x2] ss:$0 sm:$0xff] }
0x1297   :  { %v3003_v15 = vmul.f32 %v9227_v24, %v2987_v50 }
0x1298   :  { %v3854_v3 = vsel %vm132_vm3, %v3848_v43, 0.0 }
0x1299   :  { %v3009_v26 = vmul.f32 %v7622_v44, %v3003_v15  ;;  %v7624_v15 = vld [vmem:[%s11112_s7 + $0x1] ss:$0 sm:$0xff] }
0x129a   :  { %v9229_v27 = vpop.eup %9228 }
0x129b   :  { %v3015_v22 = vadd.f32 %v7623_v25, %v3009_v26  ;;  %v3004_v31 = vmul.f32 %v9229_v27, %v2988_v49 }
0x129d   :  { %v3019_v16 = vsel %vm132_vm3, %v3015_v22, 0.0  ;;  %v3010_v46 = vmul.f32 %v7622_v44, %v3004_v31 }
0x129e   :  { %3020 = vadd.xlane.f32.xlu1 %v3019_v16 }
0x129f   :  { %v3016_v47 = vadd.f32 %v7623_v25, %v3010_v46 }
0x12a1   :  { %v3022_v34 = vsel %vm132_vm3, %v3016_v47, 0.0 }
0x12a2   :  { %3852 = vadd.xlane.f32.xlu1 %v3851_v11  ;;  %3023 = vadd.xlane.f32.xlu0 %v3022_v34 }
0x12a6   :  { %3855 = vadd.xlane.f32.xlu0 %v3854_v3 }
0x132b   :  { %v3021_v18 = vpop.xlane.xlu1 %3020 }
0x132c   :  { %v3025_v9 = vmul.f32 0.03125, %v3021_v18 }
0x132e   :  { %v3027_v37 = vsub.f32 %v3015_v22, %v3025_v9  ;;  %v7644_v22 = vld [vmem:[%s11112_s7 + $0x13] ss:$0 sm:$0xff] }
0x132f   :  { %v3853_v8 = vpop.xlane.xlu1 %3852  ;;  %v3024_v36 = vpop.xlane.xlu0 %3023 }
0x1330   :  { %v3857_v29 = vmul.f32 0.03125, %v3853_v8  ;;  %v3026_v30 = vmul.f32 0.03125, %v3024_v36  ;;  %v3029_v38 = vmul.f32 %v3027_v37, %v3027_v37  ;;  %v7650_v36 = vld [vmem:[%s11112_s7 + $0x10] ss:$0 sm:$0xff] }
0x1332   :  { %v3859_v39 = vsub.f32 %v3847_v33, %v3857_v29  ;;  %v3028_v40 = vsub.f32 %v3016_v47, %v3026_v30  ;;  %v3031_v41 = vsel %vm132_vm3, %v3029_v38, 0.0 }
0x1333   :  { %3032 = vadd.xlane.f32.xlu1 %v3031_v41  ;;  %v3856_v45 = vpop.xlane.xlu0 %3855 }
0x1334   :  { %v3858_v5 = vmul.f32 0.03125, %v3856_v45  ;;  %v3861_v14 = vmul.f32 %v3859_v39, %v3859_v39  ;;  %v3030_v42 = vmul.f32 %v3028_v40, %v3028_v40 }
0x1336   :  { %v3860_v4 = vsub.f32 %v3848_v43, %v3858_v5  ;;  %v3863_v48 = vsel %vm132_vm3, %v3861_v14, 0.0  ;;  %v3034_v49 = vsel %vm132_vm3, %v3030_v42, 0.0  ;;  %v7645_v43 = vld [vmem:[%s11112_s7 + $0x14] ss:$0 sm:$0xff] }
0x1337   :  { %3864 = vadd.xlane.f32.xlu1 %v3863_v48  ;;  %3035 = vadd.xlane.f32.xlu0 %v3034_v49 }
0x1338   :  { %v3862_v50 = vmul.f32 %v3860_v4, %v3860_v4 }
0x133a   :  { %v3866_v51 = vsel %vm132_vm3, %v3862_v50, 0.0 }
0x133b   :  { %3867 = vadd.xlane.f32.xlu0 %v3866_v51 }
0x1348   :  { %3957 = vrot.lane.b32.xlu1 %v10236_v35, %s9292_s21 }
0x1351   :  { %3959 = vrot.lane.b32.xlu0 %v10243_v17, %s9292_s21 }
0x13c0   :  { %v3033_v53 = vpop.xlane.xlu1 %3032 }
0x13c1   :  { %v3037_v56 = vmul.f32 0.03125, %v3033_v53 }
0x13c3   :  { %v3039_v54 = vadd.f32 1e-05, %v3037_v56 }
0x13c4   :  { %v3865_v52 = vpop.xlane.xlu1 %3864  ;;  %v3036_v57 = vpop.xlane.xlu0 %3035 }
0x13c5   :  { %9230 = vrsqrt.f32 %v3039_v54  ;;  %v3869_v58 = vmul.f32 0.03125, %v3865_v52  ;;  %v3038_v62 = vmul.f32 0.03125, %v3036_v57 }
0x13c7   :  { %v3871_v19 = vadd.f32 1e-05, %v3869_v58  ;;  %v3040_v55 = vadd.f32 1e-05, %v3038_v62 }
0x13c8   :  { %v3868_v2 = vpop.xlane.xlu0 %3867  ;;  %v3958_v10 = vpop.permute.xlu1 %3957 }
0x13c9   :  { %9232 = vrsqrt.f32 %v3871_v19  ;;  %v3870_v59 = vmul.f32 0.03125, %v3868_v2  ;;  %8764 = vmatpush3.bf16.msra.mxu1 %v3958_v10 }
0x13ca   :  { %9234 = vrsqrt.f32 %v3040_v55  ;;  %8765 = vmatprep.subr.bf16.mxu1 %v9290_v1 }
0x13cb   :  { %v3872_v23 = vadd.f32 1e-05, %v3870_v59 }
0x13cc   :  { %v3960_v24 = vpop.permute.xlu0 %3959 }
0x13cd   :  { %9236 = vrsqrt.f32 %v3872_v23  ;;  %8766 = vmatpush3.bf16.msra.mxu1 %v3960_v24 }
0x13ce   :  { %8781 = vmatprep.subr.mxu1 %v9290_v1 }
0x13cf   :  { %v9231_v28 = vpop.eup %9230 }
0x13d0   :  { %v3043_v44 = vmul.f32 %v9231_v28, %v3027_v37 }
0x13d2   :  { %v3049_v27 = vmul.f32 %v7624_v15, %v3043_v44 }
0x13d3   :  { %v9233_v25 = vpop.eup %9232 }
0x13d4   :  { %v9235_v21 = vpop.eup %9234  ;;  %v3875_v26 = vmul.f32 %v9233_v25, %v3859_v39  ;;  %v3055_v11 = vadd.f32 %v7625_v32, %v3049_v27  ;;  %v7646_v39 = vld [vmem:[%s11112_s7 + $0xf] ss:$0 sm:$0xff] }
0x13d5   :  { %v3044_v31 = vmul.f32 %v9235_v21, %v3028_v40 }
0x13d6   :  { %v3881_v46 = vmul.f32 %v7644_v22, %v3875_v26 }
0x13d7   :  { %v9237_v16 = vpop.eup %9236  ;;  %v3050_v33 = vmul.f32 %v7624_v15, %v3044_v31 }
0x13d8   :  { %v3876_v47 = vmul.f32 %v9237_v16, %v3860_v4  ;;  %v10269_v9 = vadd.f32 %v7645_v43, %v3881_v46 }
0x13d9   :  { %v3056_v34 = vadd.f32 %v7625_v32, %v3050_v33 }
0x13da   :  { %v3882_v3 = vmul.f32 %v7644_v22, %v3876_v47 }
0x13db   :  { %v3951_v18 = vpack.c.bf16 %v3056_v34, %v3055_v11 }
0x13dc   :  { %v10271_v37 = vadd.f32 %v7645_v43, %v3882_v3 }
0x13dd   :  { %8768 = vmatmul.mubr.msk.bf16.vlgmr.msra.gmra.mrb[60].mxu1 %vm132_vm3, %v3951_v18 }
0x13de   :  { %v3889_v8 = vpack.c.bf16 %v10271_v37, %v10269_v9  ;;  %8783 = vmatprep.mubr.msk.f32.mxu1 %vm9291_vm1, %v9290_v1 }
0x13e0   :  { %8760 = vmatmul.mubr.msk.bf16.vlgmr.msra.gmra.mrb[56].mxu0 %vm132_vm3, %v3889_v8 }
0x13e1   :  { %8773 = vmatprep.mubr.msk.f32.mxu0 %vm9291_vm1, %v9290_v1 }
0x14b0   :  { %v4000_v29 = vpop.f32.mrb[60].mxu1 }
0x14b1   :  { %v10284_v30 = vadd.f32 %v7650_v36, %v4000_v29  ;;  %v8769_v38 = vpop.f32.mrb[61].mxu1 }
0x14b2   :  { %v4003_v40 = vpop.f32.mrb[62].mxu1 }
0x14b3   :  { %v8770_v41 = vpop.f32.mrb[63].mxu1  ;;  %8772 = vmatpush3.xpose.msk.msra.mxu0 %vm180_vm4, %v10284_v30  ;;  %v3944_v45 = vpop.f32.mrb[56].mxu0  ;;  %v10292_v42 = vadd.f32 %v7650_v36, %v4003_v40 }
0x14b4   :  { %v3945_v5 = vadd.f32 %v7646_v39, %v3944_v45  ;;  %v8761_v14 = vpop.f32.mrb[57].mxu0  ;;  %8776 = vmatprep.subr.mxu0 %v9290_v1 }
0x14b5   :  { %v3947_v4 = vpop.f32.mrb[58].mxu0 }
0x14b6   :  { %v8762_v48 = vpop.f32.mrb[59].mxu0  ;;  %8774 = vmatmul.mubr.msk.f32.vlgmr.msra.gmra.mrb[60].mxu0 %vm180_vm4, %v3945_v5  ;;  %v3948_v49 = vadd.f32 %v7646_v39, %v3947_v4 }
0x14b7   :  { %8777 = vmatpush3.xpose.msk.msra.mxu0 %vm180_vm4, %v10292_v42  ;;  %8778 = vmatprep.mubr.msk.f32.mxu0 %vm9291_vm1, %v9290_v1 }
0x14b8   :  { %8786 = vmatprep.subr.mxu0 %v9290_v1 }
0x14ba   :  { %8779 = vmatmul.mubr.msk.f32.vlgmr.msra.gmra.mrb[62].mxu0 %vm180_vm4, %v3948_v49 }
0x14bb   :  { %8788 = vmatprep.mubr.msk.f32.mxu0 %vm9291_vm1, %v9290_v1 }
0x1589   :  { %v4079_v50 = vpop.f32.mrb[60].mxu0 }
0x158a   :  { %v8775_v51 = vpop.f32.mrb[61].mxu0  ;;  %v4159_v53 = vsel %vm332_vm5, %v4079_v50, -inf }
0x158b   :  { %4160 = vmax.xlane.f32.xlu1 %v4159_v53 }
0x158d   :  { %v4155_v56 = vpop.f32.mrb[62].mxu0 }
0x158e   :  { %v8780_v54 = vpop.f32.mrb[63].mxu0  ;;  %v4162_v52 = vsel %vm332_vm5, %v4155_v56, -inf }
0x158f   :  { %4163 = vmax.xlane.f32.xlu0 %v4162_v52 }
0x159c   :  { %4181 = vrot.lane.b32.xlu1 %v10284_v30, %s9292_s21 }
0x15a0   :  { %4335 = vrot.lane.b32.xlu1 %v10284_v30, %s9295_s24 }
0x15a4   :  { %4413 = vrot.lane.b32.xlu1 %v10292_v42, %s9295_s24 }
0x15a5   :  { %4257 = vrot.lane.b32.xlu0 %v10292_v42, %s9292_s21  ;;  %s9300_s21 = smov [#allocation2]  }
0x1618   :  { %v4161_v57 = vpop.xlane.xlu1 %4160 }
0x1619   :  { %v4165_v58 = vsub.f32 %v4079_v50, %v4161_v57 }
0x161b   :  { %v4167_v62 = vmul.f32 1.442695, %v4165_v58 }
0x161c   :  { %v4182_v19 = vpop.permute.xlu1 %4181  ;;  %v4164_v55 = vpop.xlane.xlu0 %4163 }
0x161d   :  { %9238 = vpow2.f32 %v4167_v62  ;;  %v4166_v2 = vsub.f32 %v4155_v56, %v4164_v55  ;;  %8782 = vmatpush3.msra.mxu1 %v4182_v19 }
0x161e   :  { %8791 = vmatprep.subr.mxu1 %v9290_v1 }
0x161f   :  { %v4169_v10 = vmul.f32 1.442695, %v4166_v2 }
0x1620   :  { %v4258_v59 = vpop.permute.xlu0 %4257  ;;  %v4336_v15 = vpop.permute.xlu1 %4335 }
0x1621   :  { %9240 = vpow2.f32 %v4169_v10  ;;  %8787 = vmatpush3.msra.mxu0 %v4258_v59 }
0x1622   :  { %8796 = vmatprep.subr.mxu0 %v9290_v1 }
0x1624   :  { %v4414_v25 = vpop.permute.xlu1 %4413 }
0x1627   :  { %v9239_v23 = vpop.eup %9238 }
0x1628   :  { %v4171_v24 = vsel %vm332_vm5, %v9239_v23, 0.0 }
0x1629   :  { %4172 = vadd.xlane.f32.xlu1 %v4171_v24 }
0x162b   :  { %v9241_v28 = vpop.eup %9240 }
0x162c   :  { %v4174_v44 = vsel %vm332_vm5, %v9241_v28, 0.0 }
0x162d   :  { %4175 = vadd.xlane.f32.xlu0 %v4174_v44  ;;  %v7664_v44 = vld [vmem:[%s11112_s7 + $0x11] ss:$0 sm:$0xff] }
0x163a   :  { %4411 = vrot.lane.b32.xlu1 %v3948_v49, %s9295_s24 }
0x1643   :  { %4333 = vrot.lane.b32.xlu0 %v3945_v5, %s9295_s24 }
0x16b6   :  { %v4173_v21 = vpop.xlane.xlu1 %4172 }
0x16b7   :  { %9242 = vrcp.f32 %v4173_v21 }
0x16ba   :  { %v4176_v26 = vpop.xlane.xlu0 %4175  ;;  %v4412_v33 = vpop.permute.xlu1 %4411 }
0x16bb   :  { %9244 = vrcp.f32 %v4176_v26 }
0x16be   :  { %v4334_v16 = vpop.permute.xlu0 %4333 }
0x16c1   :  { %v9243_v27 = vpop.eup %9242 }
0x16c2   :  { %v4179_v22 = vmul.f32 %v9243_v27, %v9239_v23 }
0x16c4   :  { %8784 = vmatmul.mubr.msk.f32.vlgmr.msra.gmra.mrb[64].mxu1 %vm332_vm5, %v4179_v22 }
0x16c5   :  { %v9245_v31 = vpop.eup %9244  ;;  %8792 = vmatpush3.xpose.msk.msra.mxu1 %vm180_vm4, %v4336_v15  ;;  %8793 = vmatprep.mubr.msk.f32.mxu1 %vm9291_vm1, %v9290_v1 }
0x16c6   :  { %v4180_v32 = vmul.f32 %v9245_v31, %v9241_v28  ;;  %8801 = vmatprep.subr.mxu1 %v9290_v1 }
0x16c8   :  { %8789 = vmatmul.mubr.msk.f32.vlgmr.msra.gmra.mrb[64].mxu0 %vm332_vm5, %v4180_v32  ;;  %8794 = vmatmul.mubr.msk.f32.vlgmr.msra.gmra.mrb[66].mxu1 %vm180_vm4, %v4334_v16 }
0x16c9   :  { %8797 = vmatpush3.xpose.msk.msra.mxu0 %vm180_vm4, %v4414_v25  ;;  %8798 = vmatprep.mubr.msk.f32.mxu0 %vm9291_vm1, %v9290_v1 }
0x16ca   :  { %8806 = vmatprep.subr.mxu0 %v9290_v1  ;;  %8803 = vmatprep.mubr.msk.f32.mxu1 %vm9291_vm1, %v9290_v1 }
0x16cc   :  { %8799 = vmatmul.mubr.msk.f32.vlgmr.msra.gmra.mrb[66].mxu0 %vm180_vm4, %v4412_v33 }
0x16cd   :  { %8808 = vmatprep.mubr.msk.f32.mxu0 %vm9291_vm1, %v9290_v1 }
0x1797   :  { %v10335_v46 = vpop.f32.mrb[64].mxu1 }
0x1798   :  { %v8785_v47 = vpop.f32.mrb[65].mxu1 }
0x179b   :  { %v4329_v11 = vpop.f32.mrb[64].mxu0  ;;  %v4407_v34 = vpop.f32.mrb[66].mxu1 }
0x179c   :  { %v8790_v43 = vpop.f32.mrb[65].mxu0  ;;  %v8795_v3 = vpop.f32.mrb[67].mxu1  ;;  %v4489_v18 = vsel %vm332_vm5, %v4407_v34, -inf }
0x179d   :  { %4490 = vmax.xlane.f32.xlu0 %v4489_v18 }
0x179f   :  { %v4485_v8 = vpop.f32.mrb[66].mxu0 }
0x17a0   :  { %v8800_v36 = vpop.f32.mrb[67].mxu0  ;;  %v4492_v29 = vsel %vm332_vm5, %v4485_v8, -inf }
0x17a1   :  { %4493 = vmax.xlane.f32.xlu1 %v4492_v29  ;;  %v7676_v29 = vld [vmem:[%s11108_s3 + $0x140] sm:$0xff] }
0x17b2   :  { %4511 = vrot.lane.b32.xlu1 %v10284_v30, %s9294_s23 }
0x17b6   :  { %4679 = vrot.lane.b32.xlu1 %v10236_v35, %s9297_s26 }
0x182a   :  { %v4491_v38 = vpop.xlane.xlu0 %4490 }
0x182b   :  { %v4495_v39 = vsub.f32 %v4407_v34, %v4491_v38  ;;  %v7669_v38 = vld [vmem:[%s11108_s3 + $0x108] sm:$0xff] }
0x182d   :  { %v4497_v40 = vmul.f32 1.442695, %v4495_v39 }
0x182e   :  { %v4494_v41 = vpop.xlane.xlu1 %4493 }
0x182f   :  { %9246 = vpow2.f32 %v4497_v40  ;;  %v4496_v45 = vsub.f32 %v4485_v8, %v4494_v41  ;;  %v7677_v40 = vld [vmem:[%s11108_s3 + $0x148] sm:$0xff] }
0x1831   :  { %v4499_v5 = vmul.f32 1.442695, %v4496_v45  ;;  %v7704_v45 = vcombine.low %v7669_v38, %v7677_v40 }
0x1832   :  { %v4512_v14 = vpop.permute.xlu1 %4511 }
0x1833   :  { %9248 = vpow2.f32 %v4499_v5  ;;  %8802 = vmatpush3.msra.mxu1 %v4512_v14  ;;  %v7705_v5 = vcombine.high %v7669_v38, %v7677_v40  ;;  %v7684_v14 = vld [vmem:[%s11108_s3 + $0x180] sm:$0xff]  ;;  %v7697_v40 = vld [vmem:[%s11108_s3 + $0x1e8] sm:$0xff] }
0x1834   :  { %8811 = vmatprep.subr.bf16.mxu1 %v9290_v1  ;;  %v7696_v38 = vld [vmem:[%s11108_s3 + $0x1e0] sm:$0xff] }
0x1839   :  { %v9247_v4 = vpop.eup %9246 }
0x183a   :  { %v4501_v48 = vsel %vm332_vm5, %v9247_v4, 0.0 }
0x183b   :  { %4502 = vadd.xlane.f32.xlu0 %v4501_v48  ;;  %v7685_v48 = vld [vmem:[%s11108_s3 + $0x188] sm:$0xff] }
0x183d   :  { %v9249_v30 = vpop.eup %9248 }
0x183e   :  { %v4504_v49 = vsel %vm332_vm5, %v9249_v30, 0.0 }
0x183f   :  { %4505 = vadd.xlane.f32.xlu0 %v4504_v49  ;;  %v7693_v49 = vld [vmem:[%s11108_s3 + $0x1c8] sm:$0xff] }
0x1855   :  { %4587 = vrot.lane.b32.xlu0 %v10292_v42, %s9294_s23  ;;  %s7420_s23 = sshll.u32 %s9300_s21, 4  ;;  %s7421_s23 = int_to_ptr.vmem [resolvable:$true] %s7420_s23 }
0x1856   :  { %s9266_s24 = scalar_lea.vmem %s7421_s23, 32  ;;  %p9271_p1 = scmp.lt.s32.totalorder %s7421_s23, %s7421_s23 }
0x1857   :  { %p9267_p0 = scmp.ne.s32.totalorder %s7421_s23, %s9266_s24  ;;  %p9272_p2 = scmp.lt.s32.totalorder %s9266_s24, %s9266_s24 }
0x1859   :  { %4681 = vrot.lane.b32.xlu0 %v10243_v17, %s9297_s26  ;;  %v4680_v17 = vpop.permute.xlu1 %4679  ;;  %p9273_p3 = por %p9272_p2, %p9271_p1 }
0x185b   :  { %p9274_p4 = pnand %p9273_p3, %p9267_p0 }
0x18c8   :  { %v4503_v35 = vpop.xlane.xlu0 %4502 }
0x18c9   :  { %9250 = vrcp.f32 %v4503_v35 }
0x18cc   :  { %v4506_v50 = vpop.xlane.xlu0 %4505 }
0x18cd   :  { %9252 = vrcp.f32 %v4506_v50  ;;  %v7720_v50 = vcombine.low %v7685_v48, %v7693_v49 }
0x18d0   :  { %v4588_v51 = vpop.permute.xlu0 %4587 }
0x18d1   :  { %8807 = vmatpush3.msra.mxu0 %v4588_v51  ;;  %v7721_v51 = vcombine.high %v7685_v48, %v7693_v49  ;;  %v7682_v48 = vld [vmem:[%s11108_s3 + $0x170] sm:$0xff]  ;;  %v7683_v49 = vld [vmem:[%s11108_s3 + $0x178] sm:$0xff] }
0x18d3   :  { %v9251_v53 = vpop.eup %9250 }
0x18d4   :  { %v4509_v56 = vmul.f32 %v9251_v53, %v9247_v4  ;;  %v4682_v42 = vpop.permute.xlu0 %4681  ;;  %v7692_v4 = vld [vmem:[%s11108_s3 + $0x1c0] sm:$0xff]  ;;  %v7670_v53 = vld [vmem:[%s11108_s3 + $0x110] sm:$0xff] }
0x18d5   :  { %v7718_v35 = vcombine.low %v7684_v14, %v7692_v4 }
0x18d6   :  { %8804 = vmatmul.mubr.msk.f32.vlgmr.msra.gmra.mrb[68].mxu1 %vm332_vm5, %v4509_v56  ;;  %v7678_v56 = vld [vmem:[%s11108_s3 + $0x150] sm:$0xff] }
0x18d7   :  { %v9253_v54 = vpop.eup %9252  ;;  %8815 = vmatprep.mubr.msk.bf16.mxu1 %vm9291_vm1, %v9290_v1  ;;  %8812 = vmatpush3.bf16.msra.mxu1 %v4680_v17  ;;  %v7707_v17 = vcombine.high %v7670_v53, %v7678_v56 }
0x18d8   :  { %v4510_v52 = vmul.f32 %v9253_v54, %v9249_v30  ;;  %8813 = vmatprep.subr.bf16.mxu1 %v9290_v1  ;;  %v7719_v30 = vcombine.high %v7684_v14, %v7692_v4  ;;  %v7671_v54 = vld [vmem:[%s11108_s3 + $0x118] sm:$0xff]  ;;  %v7674_v4 = vld [vmem:[%s11108_s3 + $0x130] sm:$0xff] }
0x18da   :  { %8809 = vmatmul.mubr.msk.f32.vlgmr.msra.gmra.mrb[68].mxu0 %vm332_vm5, %v4510_v52  ;;  %v7706_v52 = vcombine.low %v7670_v53, %v7678_v56  ;;  %v7690_v56 = vld [vmem:[%s11108_s3 + $0x1b0] sm:$0xff] }
0x18db   :  { %5085 = vmatprep.mubr.bf16.mxu0 %v9299_v20  ;;  %8814 = vmatpush3.bf16.msra.mxu1 %v4682_v42  ;;  %v7679_v42 = vld [vmem:[%s11108_s3 + $0x158] sm:$0xff] }
0x18dc   :  { %5096 = vmatprep.subr.bf16.mxu1 %v7705_v5 }
0x19a9   :  { %v4583_v57 = vpop.f32.mrb[68].mxu1 }
0x19aa   :  { %v8805_v58 = vpop.f32.mrb[69].mxu1 }
0x19ab   :  { %v7709_v58 = vcombine.high %v7671_v54, %v7679_v42 }
0x19ad   :  { %v4659_v62 = vpop.f32.mrb[68].mxu0 }
0x19ae   :  { %v8904_v19 = vpack.i.bf16 %v4659_v62, %v4583_v57  ;;  %v8810_v55 = vpop.f32.mrb[69].mxu0  ;;  %v7708_v57 = vcombine.low %v7671_v54, %v7679_v42  ;;  %v7698_v54 = vld [vmem:[%s11108_s3 + $0x1f0] sm:$0xff]  ;;  %v7714_v42 = vcombine.low %v7674_v4, %v7682_v48 }
0x19b0   :  { %8905 = vrot.lane.b32.xlu1 %v8904_v19, %s9298_s27 }
0x1a22   :  { %v8906_v2 = vpop.permute.xlu1 %8905 }
0x1a23   :  { %v8908_v10 = vunpack.i.h.bf16 %v8906_v2  ;;  %v8907_v59 = vunpack.i.l.bf16 %v8906_v2 }
0x1a25   :  { %v4672_v23 = vsel %vm180_vm4, %v4329_v11, %v8908_v10  ;;  %v4671_v24 = vsel %vm180_vm4, %v10335_v46, %v8907_v59 }
0x1a26   :  { %v4673_v28 = vpack.c.bf16 %v4672_v23, %v4671_v24  ;;  %v7666_v24 = vld [vmem:[%s11112_s7 + $0x15] ss:$0 sm:$0xff] }
0x1a28   :  { %8816 = vmatmul.mubr.msk.bf16.vlgmr.msra.gmra.mrb[72].mxu1 %vm132_vm3, %v4673_v28 }
0x1a29   :  { %5128 = vmatprep.mubr.bf16.mxu1 %v9299_v20  ;;  %5097 = vmatpush1.bf16.msra.mxu1 %v7704_v45 }
0x1a2a   :  { %5098 = vmatprep.subr.bf16.mxu1 %v7721_v51  ;;  %v7715_v51 = vcombine.high %v7674_v4, %v7682_v48 }
0x1a2d   :  { %5099 = vmatpush1.bf16.msra.mxu1 %v7720_v50 }
0x1a2e   :  { %5182 = vmatprep.subr.bf16.mxu1 %v7709_v58  ;;  %v7731_v58 = vcombine.high %v7690_v56, %v7698_v54 }
0x1afb   :  { %v4722_v15 = vpop.f32.mrb[72].mxu1 }
0x1afc   :  { %v4723_v25 = vadd.f32 %v7664_v44, %v4722_v15  ;;  %v8817_v21 = vpop.f32.mrb[73].mxu1 }
0x1afd   :  { %v4725_v26 = vpop.f32.mrb[74].mxu1  ;;  %v7667_v21 = vld [vmem:[%s11112_s7 + $0x16] ss:$0 sm:$0xff] }
0x1afe   :  { %v4726_v27 = vadd.f32 %v7664_v44, %v4725_v26  ;;  %v8818_v22 = vpop.f32.mrb[75].mxu1  ;;  %v4729_v31 = vadd.f32 %v4723_v25, %v10269_v9 }
0x1aff   :  { %v7694_v22 = vld [vmem:[%s11108_s3 + $0x1d0] sm:$0xff] }
0x1b00   :  { %v4733_v32 = vsel %vm132_vm3, %v4729_v31, 0.0  ;;  %v4730_v16 = vadd.f32 %v4726_v27, %v10271_v37  ;;  %v7668_v37 = vld [vmem:[%s11108_s3 + $0x100] sm:$0xff]  ;;  %v7686_v27 = vld [vmem:[%s11108_s3 + $0x190] sm:$0xff] }
0x1b01   :  { %4734 = vadd.xlane.f32.xlu1 %v4733_v32  ;;  %v7703_v39 = vcombine.high %v7668_v37, %v7676_v29  ;;  %v7702_v41 = vcombine.low %v7668_v37, %v7676_v29  ;;  %v7695_v32 = vld [vmem:[%s11108_s3 + $0x1d8] sm:$0xff]  ;;  %v7688_v29 = vld [vmem:[%s11108_s3 + $0x1a0] sm:$0xff] }
0x1b02   :  { %v4736_v33 = vsel %vm132_vm3, %v4730_v16, 0.0  ;;  %v7727_v5 = vcombine.high %v7688_v29, %v7696_v38 }
0x1b03   :  { %4737 = vadd.xlane.f32.xlu0 %v4736_v33  ;;  %5053 = vmatprep.subr.bf16.mxu0 %v7703_v39  ;;  %v7689_v39 = vld [vmem:[%s11108_s3 + $0x1a8] sm:$0xff] }
0x1b04   :  { %5054 = vmatpush1.bf16.msra.mxu0 %v7702_v41  ;;  %v7729_v14 = vcombine.high %v7689_v39, %v7697_v40  ;;  %v7728_v50 = vcombine.low %v7689_v39, %v7697_v40  ;;  %v9075_v39 = vld [vmem:[%s11109_s4 + $0x4f8] sm:$0xff]  }
0x1b05   :  { %5055 = vmatprep.subr.bf16.mxu0 %v7719_v30  ;;  %v7675_v30 = vld [vmem:[%s11108_s3 + $0x138] sm:$0xff] }
0x1b06   :  { %v7717_v53 = vcombine.high %v7675_v30, %v7683_v49  ;;  %v9076_v40 = vld [vmem:[%s11109_s4 + $0x438] sm:$0xff]  }
0x1b08   :  { %5056 = vmatpush1.bf16.msra.mxu0 %v7718_v35  ;;  %v7726_v35 = vcombine.low %v7688_v29, %v7696_v38  ;;  %v9073_v29 = vld [vmem:[%s11109_s4 + $0x4b0] sm:$0xff]   ;;  %v9074_v38 = vld [vmem:[%s11109_s4 + $0x478] sm:$0xff]  }
0x1b09   :  { %5139 = vmatprep.subr.bf16.mxu0 %v7707_v17  ;;  %v7699_v17 = vld [vmem:[%s11108_s3 + $0x1f8] sm:$0xff] }
0x1b8e   :  { %v4735_v46 = vpop.xlane.xlu1 %4734 }
0x1b8f   :  { %v4739_v47 = vmul.f32 0.03125, %v4735_v46 }
0x1b90   :  { %v4738_v11 = vpop.xlane.xlu0 %4737 }
0x1b91   :  { %v4741_v34 = vsub.f32 %v4729_v31, %v4739_v47  ;;  %v4740_v43 = vmul.f32 0.03125, %v4738_v11  ;;  %v7687_v31 = vld [vmem:[%s11108_s3 + $0x198] sm:$0xff]  ;;  %v7723_v47 = vcombine.high %v7686_v27, %v7694_v22 }
0x1b92   :  { %v7725_v11 = vcombine.high %v7687_v31, %v7695_v32 }
0x1b93   :  { %v4742_v3 = vsub.f32 %v4730_v16, %v4740_v43  ;;  %v4743_v18 = vmul.f32 %v4741_v34, %v4741_v34  ;;  %v7680_v43 = vld [vmem:[%s11108_s3 + $0x160] sm:$0xff] }
0x1b95   :  { %v4745_v8 = vsel %vm132_vm3, %v4743_v18, 0.0  ;;  %v4744_v36 = vmul.f32 %v4742_v3, %v4742_v3  ;;  %v7681_v18 = vld [vmem:[%s11108_s3 + $0x168] sm:$0xff] }
0x1b96   :  { %4746 = vadd.xlane.f32.xlu0 %v4745_v8  ;;  %v7722_v8 = vcombine.low %v7686_v27, %v7694_v22  ;;  %v9058_v27 = vld [vmem:[%s11109_s4 + $0x458] sm:$0xff]  }
0x1b97   :  { %v4748_v9 = vsel %vm132_vm3, %v4744_v36, 0.0  ;;  %v7724_v36 = vcombine.low %v7687_v31, %v7695_v32  ;;  %v9059_v22 = vld [vmem:[%s11109_s4 + $0x4d8] sm:$0xff]  }
0x1b98   :  { %4749 = vadd.xlane.f32.xlu1 %v4748_v9  ;;  %v9060_v31 = vld [vmem:[%s11109_s4 + $0x418] sm:$0xff]  }
0x1b99   :  { %v9061_v32 = vld [vmem:[%s11109_s4 + $0x498] sm:$0xff]  }
0x1c23   :  { %v4747_v62 = vpop.xlane.xlu0 %4746 }
0x1c24   :  { %v4751_v19 = vmul.f32 0.03125, %v4747_v62 }
0x1c25   :  { %v4750_v55 = vpop.xlane.xlu1 %4749 }
0x1c26   :  { %v4753_v2 = vadd.f32 1e-05, %v4751_v19  ;;  %v4752_v10 = vmul.f32 0.03125, %v4750_v55  ;;  %v7730_v19 = vcombine.low %v7690_v56, %v7698_v54 }
0x1c28   :  { %9254 = vrsqrt.f32 %v4753_v2  ;;  %v4754_v59 = vadd.f32 1e-05, %v4752_v10  ;;  %v9046_v2 = vld [vmem:[%s11109_s4 + $0x440] sm:$0xff]  }
0x1c29   :  { %v9047_v10 = vld [vmem:[%s11109_s4 + $0x4c0] sm:$0xff]  }
0x1c2a   :  { %9256 = vrsqrt.f32 %v4754_v59  ;;  %v9048_v59 = vld [vmem:[%s11109_s4 + $0x400] sm:$0xff]  }
0x1c32   :  { %v9255_v23 = vpop.eup %9254 }
0x1c33   :  { %v4757_v28 = vmul.f32 %v9255_v23, %v4741_v34  ;;  %v7672_v34 = vld [vmem:[%s11108_s3 + $0x120] sm:$0xff] }
0x1c34   :  { %v9257_v44 = vpop.eup %9256  ;;  %v7711_v9 = vcombine.high %v7672_v34, %v7680_v43  ;;  %v7710_v41 = vcombine.low %v7672_v34, %v7680_v43  ;;  %v9049_v23 = vld [vmem:[%s11109_s4 + $0x480] sm:$0xff]   ;;  %v9066_v43 = vld [vmem:[%s11109_s4 + $0x468] sm:$0xff]  }
0x1c35   :  { %v4763_v15 = vmul.f32 %v7666_v24, %v4757_v28  ;;  %v4758_v25 = vmul.f32 %v9257_v44, %v4742_v3  ;;  %v7673_v3 = vld [vmem:[%s11108_s3 + $0x128] sm:$0xff]  ;;  %v9065_v34 = vld [vmem:[%s11109_s4 + $0x4a0] sm:$0xff]  }
0x1c36   :  { %v7713_v37 = vcombine.high %v7673_v3, %v7681_v18  ;;  %v7712_v45 = vcombine.low %v7673_v3, %v7681_v18  ;;  %v9052_v28 = vld [vmem:[%s11109_s4 + $0x408] sm:$0xff]  }
0x1c37   :  { %v4764_v26 = vmul.f32 %v7666_v24, %v4758_v25  ;;  %v10425_v16 = vadd.f32 %v7667_v21, %v4763_v15  ;;  %v9050_v24 = vld [vmem:[%s11109_s4 + $0x448] sm:$0xff]   ;;  %v9054_v15 = vld [vmem:[%s11109_s4 + $0x450] sm:$0xff]  }
0x1c38   :  { %v9053_v44 = vld [vmem:[%s11109_s4 + $0x488] sm:$0xff]   ;;  %v9055_v25 = vld [vmem:[%s11109_s4 + $0x4d0] sm:$0xff]  }
0x1c39   :  { %v10427_v33 = vadd.f32 %v7667_v21, %v4764_v26  ;;  %v9056_v21 = vld [vmem:[%s11109_s4 + $0x410] sm:$0xff]   ;;  %v9067_v3 = vld [vmem:[%s11109_s4 + $0x4e8] sm:$0xff]  }
0x1c3a   :  { %v9057_v26 = vld [vmem:[%s11109_s4 + $0x490] sm:$0xff]   ;;  %v9068_v18 = vld [vmem:[%s11109_s4 + $0x428] sm:$0xff]  }
0x1c3b   :  { %v10431_v46 = vpack.c.bf16 %v10427_v33, %v10425_v16 }
0x1c3d   :  { %7734 = vmatmul.mubr.msk.bf16.vlgmr.msra.gmra.mrb[72].mxu0 %vm132_vm3, %v10431_v46  ;;  %7735 = vmatmul.mubr.msk.bf16.vlgmr.msra.gmra.mrb[76].mxu1 %vm132_vm3, %v10431_v46 }
0x1c3e   :  { %5140 = vmatpush1.bf16.msra.mxu0 %v7706_v52  ;;  %5183 = vmatpush1.bf16.msra.mxu1 %v7708_v57  ;;  %v7691_v52 = vld [vmem:[%s11108_s3 + $0x1b8] sm:$0xff]  ;;  %v7716_v57 = vcombine.low %v7675_v30, %v7683_v49 }
0x1c3f   :  { %5141 = vmatprep.subr.bf16.mxu0 %v7723_v47  ;;  %5184 = vmatprep.subr.bf16.mxu1 %v7725_v11  ;;  %v7733_v62 = vcombine.high %v7691_v52, %v7699_v17  ;;  %v7732_v55 = vcombine.low %v7691_v52, %v7699_v17  ;;  %v9063_v47 = vld [vmem:[%s11109_s4 + $0x4e0] sm:$0xff]  }
0x1c40   :  { %5171 = vmatprep.mubr.bf16.mxu0 %v9299_v20  ;;  %5214 = vmatprep.mubr.bf16.mxu1 %v9299_v20  ;;  %v9064_v11 = vld [vmem:[%s11109_s4 + $0x420] sm:$0xff]  }
0x1c42   :  { %5142 = vmatpush1.bf16.msra.mxu0 %v7722_v8  ;;  %5185 = vmatpush1.bf16.msra.mxu1 %v7724_v36  ;;  %v9069_v8 = vld [vmem:[%s11109_s4 + $0x4a8] sm:$0xff]   ;;  %v9070_v36 = vld [vmem:[%s11109_s4 + $0x470] sm:$0xff]  }
0x1c43   :  { %5225 = vmatprep.subr.bf16.mxu0 %v7711_v9  ;;  %5268 = vmatprep.subr.bf16.mxu1 %v7713_v37  ;;  %v9071_v9 = vld [vmem:[%s11109_s4 + $0x4f0] sm:$0xff]  }
0x1c44   :  { %v9072_v37 = vld [vmem:[%s11109_s4 + $0x430] sm:$0xff]  }
0x1c45   :  { %7736 = vmatmul.mubr.msk.bf16.vlgmr.msra.gmra.mrb[76].mxu0 %vm132_vm3, %v10431_v46  ;;  %7737 = vmatmul.mubr.msk.bf16.vlgmr.msra.gmra.mrb[80].mxu1 %vm132_vm3, %v10431_v46 }
0x1c46   :  { %5226 = vmatpush1.bf16.msra.mxu0 %v7710_v41  ;;  %5269 = vmatpush1.bf16.msra.mxu1 %v7712_v45  ;;  %v9077_v41 = vld [vmem:[%s11109_s4 + $0x4b8] sm:$0xff]   ;;  %v9078_v45 = vld [vmem:[%s11109_s4 + $0x540] sm:$0xff]  }
0x1c47   :  { %5227 = vmatprep.subr.bf16.mxu0 %v7727_v5  ;;  %5270 = vmatprep.subr.bf16.mxu1 %v7729_v14  ;;  %v9079_v5 = vld [vmem:[%s11109_s4 + $0x5c0] sm:$0xff]   ;;  %v7700_v14 = vld [vmem:[%s11110_s5 + $0x10] sm:$0xff] }
0x1c48   :  { %5257 = vmatprep.mubr.bf16.mxu0 %v9299_v20  ;;  %5300 = vmatprep.mubr.bf16.mxu1 %v9299_v20  ;;  %v4813_v4 = vrot.slane %v7700_v14, %v9728_v60  ;;  %v4821_v48 = vrot.slane %v7700_v14, %v9730_v61  ;;  %v4817_v30 = vrot.slane %v7700_v14, %v9735_v63 }
0x1c49   :  { %v4825_v49 = vrot.slane %v7700_v14, %v9737_v0 }
0x1c4a   :  { %5228 = vmatpush1.bf16.msra.mxu0 %v7726_v35  ;;  %5271 = vmatpush1.bf16.msra.mxu1 %v7728_v50 }
0x1c4b   :  { %5311 = vmatprep.subr.bf16.mxu0 %v7715_v51  ;;  %5354 = vmatprep.subr.bf16.mxu1 %v7717_v53 }
0x1c4d   :  { %7738 = vmatmul.mubr.msk.bf16.vlgmr.msra.gmra.mrb[80].mxu0 %vm132_vm3, %v10431_v46  ;;  %7739 = vmatmul.mubr.msk.bf16.vlgmr.msra.gmra.mrb[84].mxu1 %vm132_vm3, %v10431_v46 }
0x1c4e   :  { %5312 = vmatpush1.bf16.msra.mxu0 %v7714_v42  ;;  %5355 = vmatpush1.bf16.msra.mxu1 %v7716_v57 }
0x1c4f   :  { %5313 = vmatprep.subr.bf16.mxu0 %v7731_v58  ;;  %5356 = vmatprep.subr.bf16.mxu1 %v7733_v62 }
0x1c50   :  { %5343 = vmatprep.mubr.bf16.mxu0 %v9299_v20  ;;  %5386 = vmatprep.mubr.bf16.mxu1 %v9299_v20  ;;  %v9051_v20 = vld [vmem:[%s11109_s4 + $0x4c8] sm:$0xff]  }
0x1c52   :  { %5314 = vmatpush1.bf16.msra.mxu0 %v7730_v19  ;;  %5357 = vmatpush1.bf16.msra.mxu1 %v7732_v55 }
0x1c53   :  { %8433 = vmatprep.subr.bf16.mxu0 %v9046_v2  ;;  %8455 = vmatprep.subr.bf16.mxu1 %v9047_v10  ;;  %v4829_v2 = vrot.slane %v7700_v14, %v9743_v6  ;;  %v4837_v10 = vrot.slane %v7700_v14, %v9745_v7 }
0x1c55   :  { %7740 = vmatmul.mubr.msk.bf16.vlgmr.msra.gmra.mrb[84].mxu0 %vm132_vm3, %v10431_v46  ;;  %7741 = vmatmul.mubr.msk.bf16.vlgmr.msra.gmra.mrb[88].mxu1 %vm132_vm3, %v10431_v46  ;;  %v9062_v46 = vld [vmem:[%s11109_s4 + $0x460] sm:$0xff]  }
0x1c56   :  { %8434 = vmatpush3.bf16.msra.mxu0 %v9048_v59  ;;  %8456 = vmatpush3.bf16.msra.mxu1 %v9049_v23 }
0x1c57   :  { %8435 = vmatprep.subr.bf16.mxu0 %v9050_v24  ;;  %8457 = vmatprep.subr.bf16.mxu1 %v9051_v20  ;;  %v4833_v24 = vrot.slane %v7700_v14, %v9747_v12  ;;  %v4841_v20 = vrot.slane %v7700_v14, %v9749_v13 }
0x1c5a   :  { %8436 = vmatpush3.bf16.msra.mxu0 %v9052_v28  ;;  %8458 = vmatpush3.bf16.msra.mxu1 %v9053_v44 }
0x1c5b   :  { %8437 = vmatprep.subr.bf16.mxu0 %v9054_v15  ;;  %8459 = vmatprep.subr.bf16.mxu1 %v9055_v25 }
0x1c5e   :  { %8438 = vmatpush3.bf16.msra.mxu0 %v9056_v21  ;;  %8460 = vmatpush3.bf16.msra.mxu1 %v9057_v26 }
0x1c5f   :  { %8439 = vmatprep.subr.bf16.mxu0 %v9058_v27  ;;  %8461 = vmatprep.subr.bf16.mxu1 %v9059_v22 }
0x1c62   :  { %8440 = vmatpush3.bf16.msra.mxu0 %v9060_v31  ;;  %8462 = vmatpush3.bf16.msra.mxu1 %v9061_v32  ;;  %v10619_v31 = vld [vmem:[%s11110_s5 + $0x18] sm:$0xff] }
0x1c63   :  { %8441 = vmatprep.subr.bf16.mxu0 %v9062_v46  ;;  %8463 = vmatprep.subr.bf16.mxu1 %v9063_v47  ;;  %v4853_v14 = vrot.slane %v10619_v31, %v9730_v61  ;;  %v9085_v61 = vld [vmem:[%s11109_s4 + $0x588] sm:$0xff]  }
0x1c66   :  { %8442 = vmatpush3.bf16.msra.mxu0 %v9064_v11  ;;  %8464 = vmatpush3.bf16.msra.mxu1 %v9065_v34 }
0x1c67   :  { %8443 = vmatprep.subr.bf16.mxu0 %v9066_v43  ;;  %8465 = vmatprep.subr.bf16.mxu1 %v9067_v3  ;;  %v9080_v3 = vld [vmem:[%s11109_s4 + $0x500] sm:$0xff]  }
0x1c6a   :  { %8444 = vmatpush3.bf16.msra.mxu0 %v9068_v18  ;;  %8466 = vmatpush3.bf16.msra.mxu1 %v9069_v8  ;;  %v9081_v18 = vld [vmem:[%s11109_s4 + $0x580] sm:$0xff]  }
0x1c6b   :  { %8445 = vmatprep.subr.bf16.mxu0 %v9070_v36  ;;  %8467 = vmatprep.subr.bf16.mxu1 %v9071_v9 }
0x1c6e   :  { %8446 = vmatpush3.bf16.msra.mxu0 %v9072_v37  ;;  %8468 = vmatpush3.bf16.msra.mxu1 %v9073_v29  ;;  %v9082_v29 = vld [vmem:[%s11109_s4 + $0x548] sm:$0xff]  }
0x1c6f   :  { %8447 = vmatprep.subr.bf16.mxu0 %v9074_v38  ;;  %8469 = vmatprep.subr.bf16.mxu1 %v9075_v39  ;;  %v9083_v38 = vld [vmem:[%s11109_s4 + $0x5c8] sm:$0xff]   ;;  %v4845_v39 = vrot.slane %v10619_v31, %v9728_v60 }
0x1c72   :  { %8448 = vmatpush3.bf16.msra.mxu0 %v9076_v40  ;;  %8470 = vmatpush3.bf16.msra.mxu1 %v9077_v41 }
0x1c73   :  { %8477 = vmatprep.subr.bf16.mxu0 %v9078_v45  ;;  %8499 = vmatprep.subr.bf16.mxu1 %v9079_v5 }
0x1d10   :  { %v5087_v35 = vpop.f32.mrb[72].mxu0  ;;  %v5130_v50 = vpop.f32.mrb[76].mxu1 }
0x1d11   :  { %v5088_v51 = vadd.f32 %v5087_v35, %v4813_v4  ;;  %v5131_v53 = vadd.f32 %v5130_v50, %v4821_v48  ;;  %v5089_v56 = vpop.f32.mrb[73].mxu0  ;;  %v5132_v54 = vpop.f32.mrb[77].mxu1  ;;  %v4849_v35 = vrot.slane %v10619_v31, %v9735_v63  ;;  %v9086_v63 = vld [vmem:[%s11109_s4 + $0x550] sm:$0xff]  }
0x1d12   :  { %v5090_v52 = vadd.f32 %v5089_v56, %v4817_v30  ;;  %v5133_v17 = vadd.f32 %v5132_v54, %v4825_v49  ;;  %v5091_v42 = vpop.f32.mrb[74].mxu0  ;;  %v5134_v57 = vpop.f32.mrb[78].mxu1 }
0x1d13   :  { %v5092_v58 = vadd.f32 %v5091_v42, %v4813_v4  ;;  %v5135_v62 = vadd.f32 %v5134_v57, %v4821_v48  ;;  %v5093_v19 = vpop.f32.mrb[75].mxu0  ;;  %v5136_v55 = vpop.f32.mrb[79].mxu1  ;;  %v5397_v28 = vmax.f32 %v5088_v51, 0.0  ;;  %v5399_v44 = vmax.f32 %v5131_v53, 0.0  ;;  %v9084_v51 = vld [vmem:[%s11109_s4 + $0x508] sm:$0xff]   ;;  %v9087_v42 = vld [vmem:[%s11109_s4 + $0x5d0] sm:$0xff]  }
0x1d14   :  { %v5094_v59 = vadd.f32 %v5093_v19, %v4817_v30  ;;  %v5137_v23 = vadd.f32 %v5136_v55, %v4825_v49  ;;  %v5398_v21 = vmax.f32 %v5090_v52, 0.0  ;;  %v5400_v26 = vmax.f32 %v5133_v17, 0.0 }
0x1d15   :  { %v5413_v15 = vmax.f32 %v5092_v58, 0.0  ;;  %v5415_v25 = vmax.f32 %v5135_v62, 0.0  ;;  %v4857_v53 = vrot.slane %v10619_v31, %v9737_v0 }
0x1d16   :  { %v5414_v27 = vmax.f32 %v5094_v59, 0.0  ;;  %v5416_v22 = vmax.f32 %v5137_v23, 0.0 }
0x1d17   :  { %v5686_v32 = vpack.c.bf16 %v5413_v15, %v5397_v28  ;;  %v5688_v46 = vpack.c.bf16 %v5415_v25, %v5399_v44 }
0x1d18   :  { %v5687_v47 = vpack.c.bf16 %v5414_v27, %v5398_v21  ;;  %v5689_v11 = vpack.c.bf16 %v5416_v22, %v5400_v26  ;;  %v5173_v34 = vpop.f32.mrb[76].mxu0  ;;  %v5216_v43 = vpop.f32.mrb[80].mxu1  ;;  %v9090_v21 = vld [vmem:[%s11109_s4 + $0x558] sm:$0xff]  }
0x1d19   :  { %v5174_v8 = vadd.f32 %v5173_v34, %v4829_v2  ;;  %v5217_v36 = vadd.f32 %v5216_v43, %v4837_v10  ;;  %v5175_v9 = vpop.f32.mrb[77].mxu0  ;;  %v5218_v37 = vpop.f32.mrb[81].mxu1  ;;  %v9091_v26 = vld [vmem:[%s11109_s4 + $0x5d8] sm:$0xff]  }
0x1d1a   :  { %v5176_v40 = vadd.f32 %v5175_v9, %v4833_v24  ;;  %v5219_v41 = vadd.f32 %v5218_v37, %v4841_v20  ;;  %v5177_v45 = vpop.f32.mrb[78].mxu0  ;;  %v5220_v5 = vpop.f32.mrb[82].mxu1  ;;  %6507 = vmatprep.mubr.bf16.mxu0 %v5687_v47  ;;  %6548 = vmatprep.mubr.bf16.mxu1 %v5689_v11  ;;  %v4861_v47 = vrot.slane %v10619_v31, %v9743_v6  ;;  %v9092_v37 = vld [vmem:[%s11109_s4 + $0x518] sm:$0xff]  }
0x1d1b   :  { %v5178_v4 = vadd.f32 %v5177_v45, %v4829_v2  ;;  %v5221_v48 = vadd.f32 %v5220_v5, %v4837_v10  ;;  %v5179_v30 = vpop.f32.mrb[79].mxu0  ;;  %v5222_v49 = vpop.f32.mrb[83].mxu1  ;;  %6508 = vmatmul.mubr.bf16.vlgmr.msra.gmra.mrb[88].mxu0 %v5686_v32  ;;  %6549 = vmatmul.mubr.bf16.vlgmr.msra.gmra.mrb[92].mxu1 %v5688_v46  ;;  %v5401_v56 = vmax.f32 %v5174_v8, 0.0  ;;  %v5403_v54 = vmax.f32 %v5217_v36, 0.0  ;;  %v9093_v6 = vld [vmem:[%s11109_s4 + $0x598] sm:$0xff]  }
0x1d1c   :  { %v5180_v50 = vadd.f32 %v5179_v30, %v4833_v24  ;;  %v5223_v60 = vadd.f32 %v5222_v49, %v4841_v20  ;;  %8478 = vmatpush3.bf16.msra.mxu0 %v9080_v3  ;;  %8500 = vmatpush3.bf16.msra.mxu1 %v9081_v18  ;;  %v5402_v57 = vmax.f32 %v5176_v40, 0.0  ;;  %v5404_v58 = vmax.f32 %v5219_v41, 0.0  ;;  %v9088_v24 = vld [vmem:[%s11109_s4 + $0x510] sm:$0xff]   ;;  %v9095_v41 = vld [vmem:[%s11109_s4 + $0x5e0] sm:$0xff]  }
0x1d1d   :  { %v5417_v52 = vmax.f32 %v5178_v4, 0.0  ;;  %v5419_v17 = vmax.f32 %v5221_v48, 0.0  ;;  %8479 = vmatprep.subr.bf16.mxu0 %v9082_v29  ;;  %8501 = vmatprep.subr.bf16.mxu1 %v9083_v38  ;;  %v9089_v20 = vld [vmem:[%s11109_s4 + $0x590] sm:$0xff]   ;;  %v4869_v18 = vrot.slane %v10619_v31, %v9745_v7  ;;  %v4865_v8 = vrot.slane %v10619_v31, %v9747_v12  ;;  %v9094_v12 = vld [vmem:[%s11109_s4 + $0x560] sm:$0xff]  }
0x1d1e   :  { %v5418_v62 = vmax.f32 %v5180_v50, 0.0  ;;  %v5420_v19 = vmax.f32 %v5223_v60, 0.0  ;;  %v4873_v29 = vrot.slane %v10619_v31, %v9749_v13  ;;  %v9096_v50 = vld [vmem:[%s11109_s4 + $0x520] sm:$0xff]  }
0x1d1f   :  { %v10653_v55 = vpack.c.bf16 %v5417_v52, %v5401_v56  ;;  %v10655_v0 = vpack.c.bf16 %v5419_v17, %v5403_v54  ;;  %v9097_v60 = vld [vmem:[%s11109_s4 + $0x5a0] sm:$0xff]   ;;  %v9098_v54 = vld [vmem:[%s11109_s4 + $0x568] sm:$0xff]  }
0x1d20   :  { %v5691_v2 = vpack.c.bf16 %v5418_v62, %v5402_v57  ;;  %v5693_v10 = vpack.c.bf16 %v5420_v19, %v5404_v58  ;;  %8480 = vmatpush3.bf16.msra.mxu0 %v9084_v51  ;;  %8502 = vmatpush3.bf16.msra.mxu1 %v9085_v61  ;;  %v5259_v59 = vpop.f32.mrb[80].mxu0  ;;  %v5302_v23 = vpop.f32.mrb[84].mxu1  ;;  %v9099_v52 = vld [vmem:[%s11109_s4 + $0x5e8] sm:$0xff]  }
0x1d21   :  { %v5260_v28 = vadd.f32 %v5259_v59, %v4845_v39  ;;  %v5303_v44 = vadd.f32 %v5302_v23, %v4853_v14  ;;  %v5261_v15 = vpop.f32.mrb[81].mxu0  ;;  %v5304_v25 = vpop.f32.mrb[85].mxu1  ;;  %8481 = vmatprep.subr.bf16.mxu0 %v9086_v63  ;;  %8503 = vmatprep.subr.bf16.mxu1 %v9087_v42  ;;  %v9100_v23 = vld [vmem:[%s11109_s4 + $0x528] sm:$0xff]  }
0x1d22   :  { %v5262_v27 = vadd.f32 %v5261_v15, %v4849_v35  ;;  %v5305_v22 = vadd.f32 %v5304_v25, %v4857_v53  ;;  %v5263_v32 = vpop.f32.mrb[82].mxu0  ;;  %v5306_v46 = vpop.f32.mrb[86].mxu1  ;;  %6589 = vmatprep.mubr.bf16.mxu0 %v5691_v2  ;;  %6630 = vmatprep.mubr.bf16.mxu1 %v5693_v10  ;;  %v9102_v25 = vld [vmem:[%s11109_s4 + $0x570] sm:$0xff]  }
0x1d23   :  { %v5264_v11 = vadd.f32 %v5263_v32, %v4845_v39  ;;  %v5307_v34 = vadd.f32 %v5306_v46, %v4853_v14  ;;  %v5265_v43 = vpop.f32.mrb[83].mxu0  ;;  %v5308_v3 = vpop.f32.mrb[87].mxu1  ;;  %v5405_v38 = vmax.f32 %v5260_v28, 0.0  ;;  %v5407_v7 = vmax.f32 %v5303_v44, 0.0 }
0x1d24   :  { %v5266_v36 = vadd.f32 %v5265_v43, %v4849_v35  ;;  %v5309_v9 = vadd.f32 %v5308_v3, %v4857_v53  ;;  %8482 = vmatpush3.bf16.msra.mxu0 %v9088_v24  ;;  %8504 = vmatpush3.bf16.msra.mxu1 %v9089_v20  ;;  %v5406_v45 = vmax.f32 %v5262_v27, 0.0  ;;  %v5408_v5 = vmax.f32 %v5305_v22, 0.0  ;;  %v9101_v24 = vld [vmem:[%s11109_s4 + $0x5a8] sm:$0xff]   ;;  %v9104_v43 = vld [vmem:[%s11109_s4 + $0x530] sm:$0xff]  }
0x1d25   :  { %v5421_v39 = vmax.f32 %v5264_v11, 0.0  ;;  %v5423_v40 = vmax.f32 %v5307_v34, 0.0  ;;  %8483 = vmatprep.subr.bf16.mxu0 %v9090_v21  ;;  %8505 = vmatprep.subr.bf16.mxu1 %v9091_v26  ;;  %v9103_v21 = vld [vmem:[%s11109_s4 + $0x5f0] sm:$0xff]  }
0x1d26   :  { %v5422_v14 = vmax.f32 %v5266_v36, 0.0  ;;  %v5424_v4 = vmax.f32 %v5309_v9, 0.0  ;;  %v9105_v3 = vld [vmem:[%s11109_s4 + $0x5b0] sm:$0xff]   ;;  %v9108_v36 = vld [vmem:[%s11109_s4 + $0x538] sm:$0xff]  }
0x1d27   :  { %v10689_v48 = vpack.c.bf16 %v5421_v39, %v5405_v38  ;;  %v10691_v13 = vpack.c.bf16 %v5423_v40, %v5407_v7  ;;  %v9109_v9 = vld [vmem:[%s11109_s4 + $0x5b8] sm:$0xff]   ;;  %v9113_v38 = vld [vmem:[%s11109_s4 + $0x680] sm:$0xff]   ;;  %v9114_v7 = vld [vmem:[%s11109_s4 + $0x648] sm:$0xff]  }
0x1d28   :  { %v10693_v31 = vpack.c.bf16 %v5422_v14, %v5406_v45  ;;  %v10695_v30 = vpack.c.bf16 %v5424_v4, %v5408_v5  ;;  %8484 = vmatpush3.bf16.msra.mxu0 %v9092_v37  ;;  %8506 = vmatpush3.bf16.msra.mxu1 %v9093_v6  ;;  %v5345_v49 = vpop.f32.mrb[84].mxu0  ;;  %v5388_v35 = vpop.f32.mrb[88].mxu1  ;;  %v9110_v37 = vld [vmem:[%s11109_s4 + $0x640] sm:$0xff]   ;;  %v9115_v39 = vld [vmem:[%s11109_s4 + $0x6c8] sm:$0xff]   ;;  %v9121_v45 = vld [vmem:[%s11109_s4 + $0x690] sm:$0xff]  }
0x1d29   :  { %v5346_v51 = vadd.f32 %v5345_v49, %v4861_v47  ;;  %v5389_v61 = vadd.f32 %v5388_v35, %v4869_v18  ;;  %v5347_v53 = vpop.f32.mrb[85].mxu0  ;;  %v5390_v56 = vpop.f32.mrb[89].mxu1  ;;  %8485 = vmatprep.subr.bf16.mxu0 %v9094_v12  ;;  %8507 = vmatprep.subr.bf16.mxu1 %v9095_v41  ;;  %v9111_v6 = vld [vmem:[%s11109_s4 + $0x6c0] sm:$0xff]   ;;  %v9116_v40 = vld [vmem:[%s11109_s4 + $0x608] sm:$0xff]   ;;  %v9120_v41 = vld [vmem:[%s11109_s4 + $0x610] sm:$0xff]  }
0x1d2a   :  { %v5348_v17 = vadd.f32 %v5347_v53, %v4865_v8  ;;  %v5391_v63 = vadd.f32 %v5390_v56, %v4873_v29  ;;  %v5349_v42 = vpop.f32.mrb[86].mxu0  ;;  %v5392_v57 = vpop.f32.mrb[90].mxu1  ;;  %v9117_v12 = vld [vmem:[%s11109_s4 + $0x688] sm:$0xff]   ;;  %v9122_v5 = vld [vmem:[%s11109_s4 + $0x658] sm:$0xff]   ;;  %v9127_v49 = vld [vmem:[%s11109_s4 + $0x6e0] sm:$0xff]  }
0x1d2b   :  { %v5350_v58 = vadd.f32 %v5349_v42, %v4861_v47  ;;  %v5393_v62 = vadd.f32 %v5392_v57, %v4869_v18  ;;  %v5351_v19 = vpop.f32.mrb[87].mxu0  ;;  %v5394_v2 = vpop.f32.mrb[91].mxu1  ;;  %v5409_v20 = vmax.f32 %v5346_v51, 0.0  ;;  %v5411_v28 = vmax.f32 %v5389_v61, 0.0  ;;  %v9106_v18 = vld [vmem:[%s11109_s4 + $0x578] sm:$0xff]   ;;  %v9128_v35 = vld [vmem:[%s11109_s4 + $0x620] sm:$0xff]  }
0x1d2c   :  { %v5352_v10 = vadd.f32 %v5351_v19, %v4865_v8  ;;  %v5395_v59 = vadd.f32 %v5394_v2, %v4873_v29  ;;  %8486 = vmatpush3.bf16.msra.mxu0 %v9096_v50  ;;  %8508 = vmatpush3.bf16.msra.mxu1 %v9097_v60  ;;  %v5410_v26 = vmax.f32 %v5348_v17, 0.0  ;;  %v5412_v27 = vmax.f32 %v5391_v63, 0.0  ;;  %v9107_v8 = vld [vmem:[%s11109_s4 + $0x5f8] sm:$0xff]   ;;  %v9112_v29 = vld [vmem:[%s11109_s4 + $0x600] sm:$0xff]   ;;  %v9130_v60 = vld [vmem:[%s11109_s4 + $0x668] sm:$0xff]  }
0x1d2d   :  { %v5425_v44 = vmax.f32 %v5350_v58, 0.0  ;;  %v5427_v15 = vmax.f32 %v5393_v62, 0.0  ;;  %8487 = vmatprep.subr.bf16.mxu0 %v9098_v54  ;;  %8509 = vmatprep.subr.bf16.mxu1 %v9099_v52  ;;  %v9123_v14 = vld [vmem:[%s11109_s4 + $0x6d8] sm:$0xff]   ;;  %v9129_v50 = vld [vmem:[%s11109_s4 + $0x6a0] sm:$0xff]   ;;  %v9131_v51 = vld [vmem:[%s11109_s4 + $0x6e8] sm:$0xff]  }
0x1d2e   :  { %v5426_v22 = vmax.f32 %v5352_v10, 0.0  ;;  %v5428_v32 = vmax.f32 %v5395_v59, 0.0  ;;  %v9124_v4 = vld [vmem:[%s11109_s4 + $0x618] sm:$0xff]   ;;  %v9132_v61 = vld [vmem:[%s11109_s4 + $0x628] sm:$0xff]   ;;  %v9134_v56 = vld [vmem:[%s11109_s4 + $0x670] sm:$0xff]  }
0x1d2f   :  { %v10721_v46 = vpack.c.bf16 %v5425_v44, %v5409_v20  ;;  %v10723_v47 = vpack.c.bf16 %v5427_v15, %v5411_v28  ;;  %v9133_v53 = vld [vmem:[%s11109_s4 + $0x6a8] sm:$0xff]   ;;  %v9135_v54 = vld [vmem:[%s11109_s4 + $0x6f0] sm:$0xff]   ;;  %v9138_v63 = vld [vmem:[%s11109_s4 + $0x678] sm:$0xff]  }
0x1d30   :  { %v10725_v11 = vpack.c.bf16 %v5426_v22, %v5410_v26  ;;  %v10727_v34 = vpack.c.bf16 %v5428_v32, %v5412_v27  ;;  %8488 = vmatpush3.bf16.msra.mxu0 %v9100_v23  ;;  %8510 = vmatpush3.bf16.msra.mxu1 %v9101_v24  ;;  %v9136_v52 = vld [vmem:[%s11109_s4 + $0x630] sm:$0xff]   ;;  %v9139_v42 = vld [vmem:[%s11109_s4 + $0x6f8] sm:$0xff]   ;;  %v9142_v62 = vld [vmem:[%s11109_s4 + $0x740] sm:$0xff]  }
0x1d31   :  { %8489 = vmatprep.subr.bf16.mxu0 %v9102_v25  ;;  %8511 = vmatprep.subr.bf16.mxu1 %v9103_v21  ;;  %v9137_v17 = vld [vmem:[%s11109_s4 + $0x6b0] sm:$0xff]   ;;  %v9140_v57 = vld [vmem:[%s11109_s4 + $0x638] sm:$0xff]   ;;  %v9143_v19 = vld [vmem:[%s11109_s4 + $0x7c0] sm:$0xff]  }
0x1d32   :  { %v9141_v58 = vld [vmem:[%s11109_s4 + $0x6b8] sm:$0xff]   ;;  %v9144_v2 = vld [vmem:[%s11109_s4 + $0x700] sm:$0xff]   ;;  %v9146_v59 = vld [vmem:[%s11109_s4 + $0x748] sm:$0xff]  }
0x1d33   :  { %v9145_v10 = vld [vmem:[%s11109_s4 + $0x780] sm:$0xff]   ;;  %v9147_v23 = vld [vmem:[%s11109_s4 + $0x7c8] sm:$0xff]   ;;  %v9152_v28 = vld [vmem:[%s11109_s4 + $0x710] sm:$0xff]  }
0x1d34   :  { %8490 = vmatpush3.bf16.msra.mxu0 %v9104_v43  ;;  %8512 = vmatpush3.bf16.msra.mxu1 %v9105_v3  ;;  %v9148_v24 = vld [vmem:[%s11109_s4 + $0x708] sm:$0xff]   ;;  %v9153_v44 = vld [vmem:[%s11109_s4 + $0x790] sm:$0xff]   ;;  %v9154_v15 = vld [vmem:[%s11109_s4 + $0x758] sm:$0xff]  }
0x1d35   :  { %8491 = vmatprep.subr.bf16.mxu0 %v9106_v18  ;;  %8513 = vmatprep.subr.bf16.mxu1 %v9107_v8  ;;  %v9149_v20 = vld [vmem:[%s11109_s4 + $0x788] sm:$0xff]   ;;  %v9155_v25 = vld [vmem:[%s11109_s4 + $0x7d8] sm:$0xff]   ;;  %v9158_v27 = vld [vmem:[%s11109_s4 + $0x760] sm:$0xff]  }
0x1d36   :  { %v9156_v21 = vld [vmem:[%s11109_s4 + $0x718] sm:$0xff]   ;;  %v9159_v22 = vld [vmem:[%s11109_s4 + $0x7e0] sm:$0xff]   ;;  %v9163_v43 = vld [vmem:[%s11109_s4 + $0x7e8] sm:$0xff]  }
0x1d37   :  { %v9157_v26 = vld [vmem:[%s11109_s4 + $0x798] sm:$0xff]   ;;  %v9160_v32 = vld [vmem:[%s11109_s4 + $0x720] sm:$0xff]   ;;  %v9164_v3 = vld [vmem:[%s11109_s4 + $0x728] sm:$0xff]  }
0x1d38   :  { %8492 = vmatpush3.bf16.msra.mxu0 %v9108_v36  ;;  %8514 = vmatpush3.bf16.msra.mxu1 %v9109_v9  ;;  %v9165_v18 = vld [vmem:[%s11109_s4 + $0x7a8] sm:$0xff]   ;;  %v9166_v8 = vld [vmem:[%s11109_s4 + $0x770] sm:$0xff]  }
0x1d39   :  { %8521 = vmatprep.subr.bf16.mxu0 %v9110_v37  ;;  %8543 = vmatprep.subr.bf16.mxu1 %v9111_v6  ;;  %v9167_v36 = vld [vmem:[%s11109_s4 + $0x7f0] sm:$0xff]   ;;  %v9170_v6 = vld [vmem:[%s11109_s4 + $0x778] sm:$0xff]  }
0x1d3a   :  { %v9168_v9 = vld [vmem:[%s11109_s4 + $0x730] sm:$0xff]  }
0x1d3b   :  { %6590 = vmatmul.mubr.bf16.vlgmr.msra.gmra.mrb[92].mxu0 %v10653_v55  ;;  %6631 = vmatmul.mubr.bf16.vlgmr.msra.gmra.mrb[96].mxu1 %v10655_v0  ;;  %v9118_v55 = vld [vmem:[%s11109_s4 + $0x650] sm:$0xff]  }
0x1d3c   :  { %8522 = vmatpush3.bf16.msra.mxu0 %v9112_v29  ;;  %6671 = vmatprep.mubr.bf16.mxu0 %v10693_v31  ;;  %v9119_v0 = vld [vmem:[%s11109_s4 + $0x6d0] sm:$0xff]   ;;  %v9125_v31 = vld [vmem:[%s11109_s4 + $0x698] sm:$0xff]  }
0x1d3d   :  { %8544 = vmatpush3.bf16.msra.mxu1 %v9113_v38  ;;  %6712 = vmatprep.mubr.bf16.mxu1 %v10695_v30  ;;  %v9126_v30 = vld [vmem:[%s11109_s4 + $0x660] sm:$0xff]   ;;  %v9169_v37 = vld [vmem:[%s11109_s4 + $0x7b0] sm:$0xff]   ;;  %v9171_v29 = vld [vmem:[%s11109_s4 + $0x7f8] sm:$0xff]  }
0x1d3e   :  { %8523 = vmatprep.subr.bf16.mxu0 %v9114_v7  ;;  %8545 = vmatprep.subr.bf16.mxu1 %v9115_v39  ;;  %v9172_v38 = vld [vmem:[%s11109_s4 + $0x738] sm:$0xff]  }
0x1d3f   :  { %v9173_v7 = vld [vmem:[%s11109_s4 + $0x7b8] sm:$0xff]  }
0x1d40   :  { %8524 = vmatpush3.bf16.msra.mxu0 %v9116_v40 }
0x1d41   :  { %8546 = vmatpush3.bf16.msra.mxu1 %v9117_v12  ;;  %8525 = vmatprep.subr.bf16.mxu0 %v9118_v55  ;;  %v7998_v12 = vld [vmem:[%s11112_s7 + $0x12] ss:$0 sm:$0xff] }
0x1d42   :  { %8547 = vmatprep.subr.bf16.mxu1 %v9119_v0 }
0x1d44   :  { %8526 = vmatpush3.bf16.msra.mxu0 %v9120_v41 }
0x1d45   :  { %8548 = vmatpush3.bf16.msra.mxu1 %v9121_v45  ;;  %8527 = vmatprep.subr.bf16.mxu0 %v9122_v5 }
0x1d46   :  { %8549 = vmatprep.subr.bf16.mxu1 %v9123_v14 }
0x1d48   :  { %8528 = vmatpush3.bf16.msra.mxu0 %v9124_v4 }
0x1d49   :  { %8550 = vmatpush3.bf16.msra.mxu1 %v9125_v31  ;;  %8529 = vmatprep.subr.bf16.mxu0 %v9126_v30 }
0x1d4a   :  { %8551 = vmatprep.subr.bf16.mxu1 %v9127_v49 }
0x1d4c   :  { %8530 = vmatpush3.bf16.msra.mxu0 %v9128_v35 }
0x1d4d   :  { %8552 = vmatpush3.bf16.msra.mxu1 %v9129_v50  ;;  %8531 = vmatprep.subr.bf16.mxu0 %v9130_v60 }
0x1d4e   :  { %8553 = vmatprep.subr.bf16.mxu1 %v9131_v51 }
0x1d50   :  { %8532 = vmatpush3.bf16.msra.mxu0 %v9132_v61 }
0x1d51   :  { %8554 = vmatpush3.bf16.msra.mxu1 %v9133_v53  ;;  %8533 = vmatprep.subr.bf16.mxu0 %v9134_v56 }
0x1d52   :  { %8555 = vmatprep.subr.bf16.mxu1 %v9135_v54 }
0x1d54   :  { %8534 = vmatpush3.bf16.msra.mxu0 %v9136_v52 }
0x1d55   :  { %8556 = vmatpush3.bf16.msra.mxu1 %v9137_v17  ;;  %8535 = vmatprep.subr.bf16.mxu0 %v9138_v63 }
0x1d56   :  { %8557 = vmatprep.subr.bf16.mxu1 %v9139_v42 }
0x1d58   :  { %8536 = vmatpush3.bf16.msra.mxu0 %v9140_v57 }
0x1d59   :  { %8558 = vmatpush3.bf16.msra.mxu1 %v9141_v58  ;;  %8565 = vmatprep.subr.bf16.mxu0 %v9142_v62 }
0x1d5a   :  { %8587 = vmatprep.subr.bf16.mxu1 %v9143_v19 }
0x1d5b   :  { %6672 = vmatmul.mubr.bf16.vlgmr.msra.gmra.mrb[96].mxu0 %v10689_v48  ;;  %v9150_v48 = vld [vmem:[%s11109_s4 + $0x750] sm:$0xff]  }
0x1d5c   :  { %6713 = vmatmul.mubr.bf16.vlgmr.msra.gmra.mrb[100].mxu1 %v10691_v13  ;;  %8566 = vmatpush3.bf16.msra.mxu0 %v9144_v2  ;;  %v9151_v13 = vld [vmem:[%s11109_s4 + $0x7d0] sm:$0xff]  }
0x1d5d   :  { %6753 = vmatprep.mubr.bf16.mxu0 %v10725_v11  ;;  %8588 = vmatpush3.bf16.msra.mxu1 %v9145_v10  ;;  %v9161_v11 = vld [vmem:[%s11109_s4 + $0x7a0] sm:$0xff]  }
0x1d5e   :  { %6794 = vmatprep.mubr.bf16.mxu1 %v10727_v34  ;;  %8567 = vmatprep.subr.bf16.mxu0 %v9146_v59  ;;  %v9162_v34 = vld [vmem:[%s11109_s4 + $0x768] sm:$0xff]  }
0x1d5f   :  { %8589 = vmatprep.subr.bf16.mxu1 %v9147_v23 }
0x1d60   :  { %8568 = vmatpush3.bf16.msra.mxu0 %v9148_v24 }
0x1d61   :  { %8590 = vmatpush3.bf16.msra.mxu1 %v9149_v20  ;;  %8569 = vmatprep.subr.bf16.mxu0 %v9150_v48 }
0x1d62   :  { %8591 = vmatprep.subr.bf16.mxu1 %v9151_v13 }
0x1d64   :  { %8570 = vmatpush3.bf16.msra.mxu0 %v9152_v28 }
0x1d65   :  { %8592 = vmatpush3.bf16.msra.mxu1 %v9153_v44  ;;  %8571 = vmatprep.subr.bf16.mxu0 %v9154_v15 }
0x1d66   :  { %8593 = vmatprep.subr.bf16.mxu1 %v9155_v25 }
0x1d68   :  { %8572 = vmatpush3.bf16.msra.mxu0 %v9156_v21 }
0x1d69   :  { %8594 = vmatpush3.bf16.msra.mxu1 %v9157_v26  ;;  %8573 = vmatprep.subr.bf16.mxu0 %v9158_v27 }
0x1d6a   :  { %8595 = vmatprep.subr.bf16.mxu1 %v9159_v22 }
0x1d6c   :  { %8574 = vmatpush3.bf16.msra.mxu0 %v9160_v32 }
0x1d6d   :  { %8596 = vmatpush3.bf16.msra.mxu1 %v9161_v11  ;;  %8575 = vmatprep.subr.bf16.mxu0 %v9162_v34 }
0x1d6e   :  { %8597 = vmatprep.subr.bf16.mxu1 %v9163_v43 }
0x1d70   :  { %8576 = vmatpush3.bf16.msra.mxu0 %v9164_v3 }
0x1d71   :  { %8598 = vmatpush3.bf16.msra.mxu1 %v9165_v18  ;;  %8577 = vmatprep.subr.bf16.mxu0 %v9166_v8 }
0x1d72   :  { %8599 = vmatprep.subr.bf16.mxu1 %v9167_v36 }
0x1d74   :  { %8578 = vmatpush3.bf16.msra.mxu0 %v9168_v9 }
0x1d75   :  { %8600 = vmatpush3.bf16.msra.mxu1 %v9169_v37  ;;  %8579 = vmatprep.subr.bf16.mxu0 %v9170_v6 }
0x1d76   :  { %8601 = vmatprep.subr.bf16.mxu1 %v9171_v29 }
0x1d78   :  { %8580 = vmatpush3.bf16.msra.mxu0 %v9172_v38 }
0x1d79   :  { %8602 = vmatpush3.bf16.msra.mxu1 %v9173_v7  ;;  %8819 = vmatprep.subr.bf16.mxu0 %v9290_v1 }
0x1d7a   :  { %8827 = vmatprep.subr.bf16.mxu1 %v9290_v1 }
0x1d7b   :  { %6754 = vmatmul.mubr.bf16.vlgmr.msra.gmra.mrb[100].mxu0 %v10721_v46 }
0x1d7c   :  { %6795 = vmatmul.mubr.bf16.vlgmr.msra.gmra.mrb[104].mxu1 %v10723_v47  ;;  %8823 = vmatprep.mubr.msk.bf16.mxu0 %vm9291_vm1, %v9290_v1 }
0x1d7d   :  { %8831 = vmatprep.mubr.msk.bf16.mxu1 %vm9291_vm1, %v9290_v1 }
0x1dee   :  { %v8449_v39 = vpop.f32.mrb[88].mxu0  ;;  %v8471_v40 = vpop.f32.mrb[92].mxu1 }
0x1def   :  { %v8450_v55 = vpop.f32.mrb[89].mxu0  ;;  %v8472_v0 = vpop.f32.mrb[93].mxu1 }
0x1df0   :  { %v8451_v41 = vadd.f32 %v8450_v55, %v8449_v39  ;;  %v8473_v45 = vadd.f32 %v8472_v0, %v8471_v40  ;;  %v8452_v5 = vpop.f32.mrb[90].mxu0  ;;  %v8474_v46 = vpop.f32.mrb[94].mxu1 }
0x1df1   :  { %v8453_v14 = vpop.f32.mrb[91].mxu0  ;;  %v8475_v47 = vpop.f32.mrb[95].mxu1 }
0x1df2   :  { %v6510_v4 = vadd.f32 %v8451_v41, %v7998_v12  ;;  %v8454_v31 = vadd.f32 %v8453_v14, %v8452_v5  ;;  %v8476_v30 = vadd.f32 %v8475_v47, %v8474_v46 }
0x1df4   :  { %v6551_v49 = vadd.f32 %v8473_v45, %v6510_v4  ;;  %v6513_v35 = vadd.f32 %v8454_v31, %v7998_v12 }
0x1df6   :  { %v6554_v50 = vadd.f32 %v8476_v30, %v6513_v35 }
0x1e0e   :  { %v8493_v60 = vpop.f32.mrb[92].mxu0  ;;  %v8515_v51 = vpop.f32.mrb[96].mxu1 }
0x1e0f   :  { %v8494_v61 = vpop.f32.mrb[93].mxu0  ;;  %v8516_v53 = vpop.f32.mrb[97].mxu1 }
0x1e10   :  { %v8495_v56 = vadd.f32 %v8494_v61, %v8493_v60  ;;  %v8517_v54 = vadd.f32 %v8516_v53, %v8515_v51  ;;  %v8496_v52 = vpop.f32.mrb[94].mxu0  ;;  %v8518_v17 = vpop.f32.mrb[98].mxu1 }
0x1e11   :  { %v8497_v63 = vpop.f32.mrb[95].mxu0  ;;  %v8519_v42 = vpop.f32.mrb[99].mxu1 }
0x1e12   :  { %v6592_v57 = vadd.f32 %v8495_v56, %v6551_v49  ;;  %v8498_v58 = vadd.f32 %v8497_v63, %v8496_v52  ;;  %v8520_v62 = vadd.f32 %v8519_v42, %v8518_v17  ;;  %v8127_v52 = vld [vmem:[%s11112_s7 + $0x17] ss:$0 sm:$0xff]  ;;  %v8128_v42 = vld [vmem:[%s11112_s7 + $0x18] ss:$0 sm:$0xff] }
0x1e14   :  { %v6633_v19 = vadd.f32 %v8517_v54, %v6592_v57  ;;  %v6595_v2 = vadd.f32 %v8498_v58, %v6554_v50 }
0x1e16   :  { %v6636_v10 = vadd.f32 %v8520_v62, %v6595_v2 }
0x1e2e   :  { %v8537_v59 = vpop.f32.mrb[96].mxu0 }
0x1e2f   :  { %v8559_v23 = vpop.f32.mrb[100].mxu1  ;;  %v8538_v24 = vpop.f32.mrb[97].mxu0 }
0x1e30   :  { %v8539_v20 = vadd.f32 %v8538_v24, %v8537_v59  ;;  %v8560_v48 = vpop.f32.mrb[101].mxu1  ;;  %v8540_v13 = vpop.f32.mrb[98].mxu0 }
0x1e31   :  { %v8561_v28 = vadd.f32 %v8560_v48, %v8559_v23  ;;  %v8562_v44 = vpop.f32.mrb[102].mxu1  ;;  %v8541_v15 = vpop.f32.mrb[99].mxu0 }
0x1e32   :  { %v6674_v25 = vadd.f32 %v8539_v20, %v6633_v19  ;;  %v8542_v21 = vadd.f32 %v8541_v15, %v8540_v13  ;;  %v8563_v26 = vpop.f32.mrb[103].mxu1 }
0x1e33   :  { %v8564_v27 = vadd.f32 %v8563_v26, %v8562_v44  ;;  %v9174_v26 = vld [vmem:[%s11111_s6 + $0x10] sm:$0xff]  }
0x1e34   :  { %v6715_v22 = vadd.f32 %v8561_v28, %v6674_v25  ;;  %v6677_v32 = vadd.f32 %v8542_v21, %v6636_v10  ;;  %8820 = vmatpush3.bf16.msra.mxu0 %v9174_v26 }
0x1e35   :  { %8821 = vmatprep.subr.bf16.mxu0 %v9290_v1 }
0x1e36   :  { %v6718_v11 = vadd.f32 %v8564_v27, %v6677_v32  ;;  %v9175_v27 = vld [vmem:[%s11111_s6] sm:$0xff]   ;;  %v9177_v32 = vld [vmem:[%s11111_s6 + $0x8] sm:$0xff]  }
0x1e37   :  { %8828 = vmatpush3.bf16.msra.mxu1 %v9175_v27 }
0x1e38   :  { %8829 = vmatprep.subr.bf16.mxu1 %v9290_v1 }
0x1e3b   :  { %8830 = vmatpush3.bf16.msra.mxu1 %v9177_v32 }
0x1e3c   :  { %8843 = vmatprep.subr.bf16.mxu1 %v9290_v1 }
0x1e4e   :  { %v8581_v34 = vpop.f32.mrb[100].mxu0 }
0x1e4f   :  { %v8603_v43 = vpop.f32.mrb[104].mxu1  ;;  %v8582_v3 = vpop.f32.mrb[101].mxu0 }
0x1e50   :  { %v8583_v18 = vadd.f32 %v8582_v3, %v8581_v34  ;;  %v8604_v8 = vpop.f32.mrb[105].mxu1  ;;  %v8584_v36 = vpop.f32.mrb[102].mxu0 }
0x1e51   :  { %v8605_v9 = vadd.f32 %v8604_v8, %v8603_v43  ;;  %v8606_v37 = vpop.f32.mrb[106].mxu1  ;;  %v8585_v6 = vpop.f32.mrb[103].mxu0 }
0x1e52   :  { %v6756_v29 = vadd.f32 %v8583_v18, %v6715_v22  ;;  %v8586_v38 = vadd.f32 %v8585_v6, %v8584_v36  ;;  %v8607_v7 = vpop.f32.mrb[107].mxu1  ;;  %v9176_v22 = vld [vmem:[%s11111_s6 + $0x18] sm:$0xff]  }
0x1e53   :  { %v8608_v39 = vadd.f32 %v8607_v7, %v8606_v37  ;;  %8822 = vmatpush3.bf16.msra.mxu0 %v9176_v22 }
0x1e54   :  { %v6797_v40 = vadd.f32 %v8605_v9, %v6756_v29  ;;  %v6759_v12 = vadd.f32 %v8586_v38, %v6718_v11  ;;  %8835 = vmatprep.subr.bf16.mxu0 %v9290_v1  ;;  %v8129_v9 = vld [vmem:[%s11112_s7 + $0x3] ss:$0 sm:$0xff]  ;;  %v8130_v29 = vld [vmem:[%s11112_s7 + $0x4] ss:$0 sm:$0xff] }
0x1e56   :  { %v6800_v55 = vadd.f32 %v8608_v39, %v6759_v12  ;;  %v6803_v0 = vadd.f32 %v6797_v40, %v10425_v16 }
0x1e58   :  { %v6807_v41 = vsel %vm132_vm3, %v6803_v0, 0.0  ;;  %v6804_v45 = vadd.f32 %v6800_v55, %v10427_v33 }
0x1e59   :  { %6808 = vadd.xlane.f32.xlu0 %v6807_v41 }
0x1e5a   :  { %v6810_v5 = vsel %vm132_vm3, %v6804_v45, 0.0 }
0x1e5b   :  { %6811 = vadd.xlane.f32.xlu1 %v6810_v5 }
0x1ee6   :  { %v6809_v46 = vpop.xlane.xlu0 %6808 }
0x1ee7   :  { %v6813_v14 = vmul.f32 0.03125, %v6809_v46 }
0x1ee8   :  { %v6812_v47 = vpop.xlane.xlu1 %6811 }
0x1ee9   :  { %v6815_v4 = vsub.f32 %v6803_v0, %v6813_v14  ;;  %v6814_v31 = vmul.f32 0.03125, %v6812_v47  ;;  %v9178_v14 = vld [vmem:[%s11111_s6 + $0x20] sm:$0xff]  }
0x1eeb   :  { %v6816_v30 = vsub.f32 %v6804_v45, %v6814_v31  ;;  %v6817_v49 = vmul.f32 %v6815_v4, %v6815_v4 }
0x1eed   :  { %v6819_v35 = vsel %vm132_vm3, %v6817_v49, 0.0  ;;  %v6818_v50 = vmul.f32 %v6816_v30, %v6816_v30 }
0x1eee   :  { %6820 = vadd.xlane.f32.xlu0 %v6819_v35 }
0x1eef   :  { %v6822_v16 = vsel %vm132_vm3, %v6818_v50, 0.0  ;;  %v9180_v50 = vld [vmem:[%s11111_s6 + $0x28] sm:$0xff]  }
0x1ef0   :  { %6823 = vadd.xlane.f32.xlu1 %v6822_v16 }
0x1f7b   :  { %v6821_v60 = vpop.xlane.xlu0 %6820 }
0x1f7c   :  { %v6825_v33 = vmul.f32 0.03125, %v6821_v60 }
0x1f7d   :  { %v6824_v51 = vpop.xlane.xlu1 %6823 }
0x1f7e   :  { %v6827_v61 = vadd.f32 1e-05, %v6825_v33  ;;  %v6826_v53 = vmul.f32 0.03125, %v6824_v51  ;;  %v9181_v33 = vld [vmem:[%s11111_s6 + $0x38] sm:$0xff]  }
0x1f80   :  { %9258 = vrsqrt.f32 %v6827_v61  ;;  %v6828_v56 = vadd.f32 1e-05, %v6826_v53  ;;  %v9182_v53 = vld [vmem:[%s11111_s6 + $0x40] sm:$0xff]  }
0x1f82   :  { %9260 = vrsqrt.f32 %v6828_v56 }
0x1f8a   :  { %v9259_v54 = vpop.eup %9258 }
0x1f8b   :  { %v6831_v17 = vmul.f32 %v9259_v54, %v6815_v4 }
0x1f8c   :  { %v9261_v63 = vpop.eup %9260 }
0x1f8d   :  { %v6837_v57 = vmul.f32 %v8127_v52, %v6831_v17  ;;  %v6832_v58 = vmul.f32 %v9261_v63, %v6816_v30  ;;  %v9179_v30 = vld [vmem:[%s11111_s6 + $0x30] sm:$0xff]  }
0x1f8f   :  { %v6843_v62 = vadd.f32 %v8128_v42, %v6837_v57  ;;  %v6838_v19 = vmul.f32 %v8127_v52, %v6832_v58  ;;  %v9183_v52 = vld [vmem:[%s11111_s6 + $0x50] sm:$0xff]  }
0x1f91   :  { %v6847_v2 = vsel %vm132_vm3, %v6843_v62, 0.0  ;;  %v6844_v10 = vadd.f32 %v8128_v42, %v6838_v19  ;;  %v9184_v42 = vld [vmem:[%s11111_s6 + $0x48] sm:$0xff]  }
0x1f92   :  { %6848 = vadd.xlane.f32.xlu0 %v6847_v2 }
0x1f93   :  { %v6850_v59 = vsel %vm132_vm3, %v6844_v10, 0.0 }
0x1f94   :  { %6851 = vadd.xlane.f32.xlu1 %v6850_v59 }
0x201f   :  { %v6849_v23 = vpop.xlane.xlu0 %6848 }
0x2020   :  { %v6853_v24 = vmul.f32 0.03125, %v6849_v23 }
0x2021   :  { %v6852_v20 = vpop.xlane.xlu1 %6851 }
0x2022   :  { %v6855_v48 = vsub.f32 %v6843_v62, %v6853_v24  ;;  %v6854_v13 = vmul.f32 0.03125, %v6852_v20  ;;  %v9185_v62 = vld [vmem:[%s11111_s6 + $0x58] sm:$0xff]   ;;  %v9187_v24 = vld [vmem:[%s11111_s6 + $0x70] sm:$0xff]  }
0x2024   :  { %v6856_v28 = vsub.f32 %v6844_v10, %v6854_v13  ;;  %v6857_v44 = vmul.f32 %v6855_v48, %v6855_v48  ;;  %v9186_v10 = vld [vmem:[%s11111_s6 + $0x60] sm:$0xff]   ;;  %v9188_v13 = vld [vmem:[%s11111_s6 + $0x68] sm:$0xff]  }
0x2026   :  { %v6859_v15 = vsel %vm132_vm3, %v6857_v44, 0.0  ;;  %v6858_v25 = vmul.f32 %v6856_v28, %v6856_v28 }
0x2027   :  { %6860 = vadd.xlane.f32.xlu0 %v6859_v15  ;;  %v9189_v15 = vld [vmem:[%s11111_s6 + $0x78] sm:$0xff]  }
0x2028   :  { %v6862_v21 = vsel %vm132_vm3, %v6858_v25, 0.0 }
0x2029   :  { %6863 = vadd.xlane.f32.xlu1 %v6862_v21 }
0x20b4   :  { %v6861_v11 = vpop.xlane.xlu0 %6860 }
0x20b5   :  { %v6865_v34 = vmul.f32 0.03125, %v6861_v11 }
0x20b6   :  { %v6864_v43 = vpop.xlane.xlu1 %6863 }
0x20b7   :  { %v6867_v3 = vadd.f32 1e-05, %v6865_v34  ;;  %v6866_v18 = vmul.f32 0.03125, %v6864_v43 }
0x20b9   :  { %9262 = vrsqrt.f32 %v6867_v3  ;;  %v6868_v8 = vadd.f32 1e-05, %v6866_v18 }
0x20bb   :  { %9264 = vrsqrt.f32 %v6868_v8 }
0x20c3   :  { %v9263_v36 = vpop.eup %9262 }
0x20c4   :  { %v6871_v37 = vmul.f32 %v9263_v36, %v6855_v48 }
0x20c5   :  { %v9265_v6 = vpop.eup %9264 }
0x20c6   :  { %v6877_v38 = vmul.f32 %v8129_v9, %v6871_v37  ;;  %v6872_v7 = vmul.f32 %v9265_v6, %v6856_v28 }
0x20c8   :  { %v6883_v39 = vadd.f32 %v8130_v29, %v6877_v38  ;;  %v6878_v40 = vmul.f32 %v8129_v9, %v6872_v7 }
0x20ca   :  { %v6889_v12 = vpack.c.bf16 %v6883_v39, %v6883_v39  ;;  %v6884_v55 = vadd.f32 %v8130_v29, %v6878_v40 }
0x20cc   :  { %v10996_v0 = vunpack.c.l.b16 %v6889_v12  ;;  %v6890_v41 = vpack.c.bf16 %v6884_v55, %v6884_v55 }
0x20ce   :  { %v10998_v45 = vunpack.c.l.b16 %v6890_v41  ;;  %v6900_v5 = vrot.slane %v10996_v0, 1  ;;  %v7022_v16 = vrot.slane %v10996_v0, 2  ;;  %v7087_v61 = vrot.slane %v10996_v0, 3 }
0x20cf   :  { %v7152_v57 = vrot.slane %v10996_v0, 4  ;;  %v7217_v2 = vrot.slane %v10996_v0, 5  ;;  %v7282_v28 = vrot.slane %v10996_v0, 6  ;;  %v7347_v21 = vrot.slane %v10996_v0, 7 }
0x20d0   :  { %v6902_v46 = vsel %vm6901_vm6, %v10998_v45, %v6900_v5  ;;  %v6959_v47 = vrot.slane %v10998_v45, 7  ;;  %v7023_v49 = vrot.slane %v10998_v45, 1  ;;  %v7088_v60 = vrot.slane %v10998_v45, 2 }
0x20d1   :  { %v6903_v4 = vpack.c.b16 %v6902_v46, %v6902_v46  ;;  %v7153_v17 = vrot.slane %v10998_v45, 3  ;;  %v7218_v58 = vrot.slane %v10998_v45, 4  ;;  %v7283_v20 = vrot.slane %v10998_v45, 5 }
0x20d2   :  { %v6960_v31 = vsel %vm6901_vm6, %v6959_v47, %v10996_v0  ;;  %v7024_v51 = vsel %vm6901_vm6, %v7023_v49, %v7022_v16  ;;  %v7089_v56 = vsel %vm6901_vm6, %v7088_v60, %v7087_v61  ;;  %v7348_v44 = vrot.slane %v10998_v45, 6 }
0x20d3   :  { %8824 = vmatmul.mubr.msk.bf16.vlgmr.msra.gmra.mrb[104].mxu0 %vm132_vm3, %v6903_v4  ;;  %v6961_v35 = vpack.c.b16 %v6960_v31, %v6960_v31  ;;  %v7025_v54 = vpack.c.b16 %v7024_v51, %v7024_v51  ;;  %v7090_v63 = vpack.c.b16 %v7089_v56, %v7089_v56  ;;  %v7154_v19 = vsel %vm6901_vm6, %v7153_v17, %v7152_v57 }
0x20d4   :  { %8836 = vmatpush3.bf16.msra.mxu0 %v9178_v14  ;;  %8839 = vmatprep.mubr.msk.bf16.mxu0 %vm9291_vm1, %v9290_v1  ;;  %v7219_v59 = vsel %vm6901_vm6, %v7218_v58, %v7217_v2  ;;  %v7155_v23 = vpack.c.b16 %v7154_v19, %v7154_v19  ;;  %v7284_v25 = vsel %vm6901_vm6, %v7283_v20, %v7282_v28 }
0x20d5   :  { %8832 = vmatmul.mubr.msk.bf16.vlgmr.msra.gmra.mrb[108].mxu1 %vm132_vm3, %v6961_v35  ;;  %8837 = vmatprep.subr.bf16.mxu0 %v9290_v1  ;;  %v7220_v48 = vpack.c.b16 %v7219_v59, %v7219_v59  ;;  %v7349_v26 = vsel %vm6901_vm6, %v7348_v44, %v7347_v21  ;;  %v7285_v27 = vpack.c.b16 %v7284_v25, %v7284_v25 }
0x20d6   :  { %8844 = vmatpush3.bf16.msra.mxu1 %v9179_v30  ;;  %8847 = vmatprep.mubr.msk.bf16.mxu1 %vm9291_vm1, %v9290_v1  ;;  %v7350_v22 = vpack.c.b16 %v7349_v26, %v7349_v26 }
0x20d7   :  { %8845 = vmatprep.subr.bf16.mxu1 %v9290_v1 }
0x20d8   :  { %8838 = vmatpush3.bf16.msra.mxu0 %v9180_v50 }
0x20d9   :  { %8851 = vmatprep.subr.bf16.mxu0 %v9290_v1 }
0x20da   :  { %8846 = vmatpush3.bf16.msra.mxu1 %v9181_v33  ;;  %v8183_v33 = vld [vmem:[%s11112_s7 + $0x5] ss:$0 sm:$0xff] }
0x20db   :  { %8840 = vmatmul.mubr.msk.bf16.vlgmr.msra.gmra.mrb[108].mxu0 %vm132_vm3, %v7025_v54  ;;  %8859 = vmatprep.subr.bf16.mxu1 %v9290_v1 }
0x20dc   :  { %8852 = vmatpush3.bf16.msra.mxu0 %v9182_v53  ;;  %8855 = vmatprep.mubr.msk.bf16.mxu0 %vm9291_vm1, %v9290_v1 }
0x20dd   :  { %8848 = vmatmul.mubr.msk.bf16.vlgmr.msra.gmra.mrb[112].mxu1 %vm132_vm3, %v7090_v63  ;;  %8853 = vmatprep.subr.bf16.mxu0 %v9290_v1 }
0x20de   :  { %8860 = vmatpush3.bf16.msra.mxu1 %v9183_v52  ;;  %8863 = vmatprep.mubr.msk.bf16.mxu1 %vm9291_vm1, %v9290_v1 }
0x20df   :  { %8861 = vmatprep.subr.bf16.mxu1 %v9290_v1 }
0x20e0   :  { %8854 = vmatpush3.bf16.msra.mxu0 %v9184_v42 }
0x20e1   :  { %8867 = vmatprep.subr.bf16.mxu0 %v9290_v1 }
0x20e2   :  { %8862 = vmatpush3.bf16.msra.mxu1 %v9185_v62 }
0x20e3   :  { %8856 = vmatmul.mubr.msk.bf16.vlgmr.msra.gmra.mrb[112].mxu0 %vm132_vm3, %v7155_v23  ;;  %8875 = vmatprep.subr.bf16.mxu1 %v9290_v1 }
0x20e4   :  { %8868 = vmatpush3.bf16.msra.mxu0 %v9186_v10  ;;  %8871 = vmatprep.mubr.msk.bf16.mxu0 %vm9291_vm1, %v9290_v1 }
0x20e5   :  { %8864 = vmatmul.mubr.msk.bf16.vlgmr.msra.gmra.mrb[116].mxu1 %vm132_vm3, %v7220_v48  ;;  %8869 = vmatprep.subr.bf16.mxu0 %v9290_v1 }
0x20e6   :  { %8876 = vmatpush3.bf16.msra.mxu1 %v9187_v24  ;;  %8879 = vmatprep.mubr.msk.bf16.mxu1 %vm9291_vm1, %v9290_v1 }
0x20e7   :  { %8877 = vmatprep.subr.bf16.mxu1 %v9290_v1 }
0x20e8   :  { %8870 = vmatpush3.bf16.msra.mxu0 %v9188_v13 }
0x20ea   :  { %8878 = vmatpush3.bf16.msra.mxu1 %v9189_v15 }
0x20eb   :  { %8872 = vmatmul.mubr.msk.bf16.vlgmr.msra.gmra.mrb[116].mxu0 %vm132_vm3, %v7285_v27 }
0x20ed   :  { %8880 = vmatmul.mubr.msk.bf16.vlgmr.msra.gmra.mrb[120].mxu1 %vm132_vm3, %v7350_v22 }
0x21a6   :  { %v6953_v32 = vpop.f32.mrb[104].mxu0 }
0x21a7   :  { %v8825_v11 = vpop.f32.mrb[105].mxu0 }
0x21a8   :  { %v6956_v34 = vpop.f32.mrb[106].mxu0  ;;  %v7011_v43 = vpop.f32.mrb[108].mxu1 }
0x21a9   :  { %v7012_v3 = vadd.f32 %v7011_v43, %v6953_v32  ;;  %v8826_v18 = vpop.f32.mrb[107].mxu0  ;;  %v8833_v8 = vpop.f32.mrb[109].mxu1 }
0x21aa   :  { %v7014_v36 = vpop.f32.mrb[110].mxu1 }
0x21ab   :  { %v8834_v9 = vpop.f32.mrb[111].mxu1 }
0x21ae   :  { %v7075_v1 = vpop.f32.mrb[108].mxu0 }
0x21af   :  { %v7081_v37 = vadd.f32 %v7075_v1, %v7012_v3  ;;  %v8841_v6 = vpop.f32.mrb[109].mxu0 }
0x21b0   :  { %v7078_v29 = vpop.f32.mrb[110].mxu0  ;;  %v7140_v38 = vpop.f32.mrb[112].mxu1 }
0x21b1   :  { %v7146_v7 = vadd.f32 %v7140_v38, %v7081_v37  ;;  %v8842_v39 = vpop.f32.mrb[111].mxu0  ;;  %v8849_v40 = vpop.f32.mrb[113].mxu1 }
0x21b2   :  { %v7143_v12 = vpop.f32.mrb[114].mxu1 }
0x21b3   :  { %v8850_v55 = vpop.f32.mrb[115].mxu1 }
0x21b6   :  { %v7205_v0 = vpop.f32.mrb[112].mxu0 }
0x21b7   :  { %v7211_v41 = vadd.f32 %v7205_v0, %v7146_v7  ;;  %v8857_v45 = vpop.f32.mrb[113].mxu0 }
0x21b8   :  { %v7208_v5 = vpop.f32.mrb[114].mxu0  ;;  %v7270_v46 = vpop.f32.mrb[116].mxu1 }
0x21b9   :  { %v7276_v14 = vadd.f32 %v7270_v46, %v7211_v41  ;;  %v8858_v47 = vpop.f32.mrb[115].mxu0  ;;  %v8865_v4 = vpop.f32.mrb[117].mxu1 }
0x21ba   :  { %v7273_v31 = vpop.f32.mrb[118].mxu1 }
0x21bb   :  { %v8866_v30 = vpop.f32.mrb[119].mxu1 }
0x21be   :  { %v7335_v49 = vpop.f32.mrb[116].mxu0 }
0x21bf   :  { %v7341_v35 = vadd.f32 %v7335_v49, %v7276_v14  ;;  %v8873_v50 = vpop.f32.mrb[117].mxu0 }
0x21c0   :  { %v7338_v16 = vpop.f32.mrb[118].mxu0  ;;  %v7400_v60 = vpop.f32.mrb[120].mxu1 }
0x21c1   :  { %v7406_v51 = vadd.f32 %v7400_v60, %v7341_v35  ;;  %v8874_v61 = vpop.f32.mrb[119].mxu0  ;;  %v8881_v53 = vpop.f32.mrb[121].mxu1 }
0x21c2   :  { %v7403_v56 = vpop.f32.mrb[122].mxu1 }
0x21c3   :  { %v8882_v54 = vpop.f32.mrb[123].mxu1  ;;  %v7412_v52 = vadd.f32 %v8183_v33, %v7406_v51 }
0x21c5   :  { %7413 = vst [vmem:[#allocation2] sm:$0x3] %v7412_v52 }
0x21c6   :  { %9277 = shalt.err (!%p9274_p4)
}
0x21c7   :  { %s9278_s7 = scalar_lea.hbm %s11113_s8, 32 }
0x21c8   :  { %p9279_p5 = scmp.ne.s32.totalorder %s11113_s8, %s9278_s7  ;;  %p9282_p6 = scmp.lt.u32.totalorder %s9278_s7, %s11113_s8 }
0x21ca   :  { %p9284_p7 = pnand %p9282_p6, %p9279_p5 }
0x21cc   :  { %9287 = shalt.err (!%p9284_p7)
}
0x21cd   :  { %7423 = dma.vmem_to_hbm [thread:$0]  %s7421_s23, 32, %s11113_s8, [#allocation3]  }
0x21ce   :  { %9288 = dma.done.wait [#allocation3], 32  }
0x21cf   :  { %9289 = vsyncadd [#allocation3], 4294967264 }
0x21d0   :  { %7427 = vsyncpa [#allocation3], 1 }

</bundles_post_ra>
